<compile_context>
chip_gen: v7x
topology: tpu7x:2x2x1
jax: 0.10.0
libtpu: 0.0.40
codegen_flags: <defaults>
</compile_context>

<pallas_src>
import numpy as np
import jax
import jax.numpy as jnp
from jax.experimental import pallas as pl
from jax.experimental.pallas import tpu as pltpu

BN_EPS = 1e-4


# --------------------------------------------------------------------------
# Host-side (trace-time) constant builders
# --------------------------------------------------------------------------

def _bilinear_matrix(out_size, in_size):
    """1-D bilinear interpolation matrix, PyTorch align_corners=False (half-pixel)."""
    A = np.zeros((out_size, in_size), np.float32)
    if in_size == 1:
        A[:, 0] = 1.0
        return A
    scale = in_size / out_size
    for d in range(out_size):
        src = (d + 0.5) * scale - 0.5
        src = max(src, 0.0)
        i0 = min(int(np.floor(src)), in_size - 1)
        i1 = min(i0 + 1, in_size - 1)
        frac = src - i0
        A[d, i0] += 1.0 - frac
        A[d, i1] += frac
    return A


def _shift_mask_matrices(H, W):
    """S[t] (HW, HW) for tap t=(dy,dx) in row-major 3x3 order:
    (slab @ S[t])[c, p] = slab[c, p + dy*W + dx] where the neighbor is inside the
    image, else 0 -- i.e. the conv's zero 'same' padding is baked into S."""
    HW = H * W
    yy, xx = np.divmod(np.arange(HW), W)
    S = np.zeros((9, HW, HW), np.float32)
    t = 0
    for dy in (-1, 0, 1):
        for dx in (-1, 0, 1):
            y2, x2 = yy + dy, xx + dx
            valid = (y2 >= 0) & (y2 < H) & (x2 >= 0) & (x2 < W)
            p = np.arange(HW)[valid]
            q = (y2 * W + x2)[valid]
            S[t, q, p] = 1.0
            t += 1
    return S


# --------------------------------------------------------------------------
# Fused Pallas kernel (one batch image per grid step, everything lane-dense)
# --------------------------------------------------------------------------

def _stack_decoder_kernel(x_ref, xbig_ref, mt_ref, sw_ref,
                          w1_ref, w23_ref, sb_ref, idw_ref,
                          out_ref, slab_ref, patch_ref):
    # x_ref    : (1, Cx, h*w)        f32  small input, NCHW flattened (lane = spatial)
    # xbig_ref : (1, Cbig, H*W)      f32  skip input, NCHW flattened (lane = spatial)
    # mt_ref   : (h*w, H*W)          f32  transposed bilinear interpolation matrix
    # sw_ref   : (9, H*W, H*W)       bf16 shift+mask matrices (conv padding baked in)
    # w1_ref   : (Cout, 9*Cin1)      bf16 conv1 im2col weight (Cin1 = Cx + Cbig)
    # w23_ref  : (2, Cout, 9*Cout)   bf16 conv2 / conv3 im2col weights
    # sb_ref   : (Cout, 8)           f32  [s1,b1,s2,b2,s3,b3,id_b,0] per channel
    # idw_ref  : (Cout, Cx)          f32  1x1 identity conv weight
    # out_ref  : (1, Cout, H*W)      f32  lane-dense, already NCHW order
    # slab_ref : VMEM (Cin1, H*W)    f32  conv1 input slab (= channel concat)
    # patch_ref: VMEM (9*Cmax, H*W)  f32  im2col tap stack for the current layer
    Cx = x_ref.shape[1]
    Cbig = xbig_ref.shape[1]
    Cin1 = Cx + Cbig
    Cout = out_ref.shape[1]

    sb = sb_ref[...]                                                  # (Cout, 8)

    # Bilinear upsample, lane-dense: (Cx, hw) @ (hw, HW) -> (Cx, HW), f32.
    xs = jnp.dot(x_ref[0], mt_ref[...], preferred_element_type=jnp.float32)

    # 1x1 identity conv (with bias) immediately, so xs's live range ends once the
    # conv1 input slab is built (only the (Cout, HW) ident stays live after that).
    ident = jnp.dot(idw_ref[...], xs, preferred_element_type=jnp.float32) + sb[:, 6:7]

    # torch.cat([x_s, x_big], dim=1) realized as two sublane-block stores into the
    # slab scratch -- no lane traffic, no concatenate op.
    slab_ref[0:Cx, :] = xs
    slab_ref[Cx:Cin1, :] = xbig_ref[0]

    def conv_bn_relu(slab_bf, n_in, w_bf, s_col, b_col):
        # 9 lane-dense shift/mask dots build the im2col stack (9*n_in, HW) in
        # patch_ref (aligned full-tile stores for n_in == 8), then one weight dot.
        # The tap values are exactly the bf16 slab entries (S is 0/1), so the bf16
        # cast below is exact and products match the reference bf16 conv.
        for t in range(9):
            tap = jnp.dot(slab_bf, sw_ref[t], preferred_element_type=jnp.float32)
            patch_ref[t * n_in:(t + 1) * n_in, :] = tap
        patches = patch_ref[0:9 * n_in, :].astype(jnp.bfloat16)       # (9*n_in, HW)
        acc = jnp.dot(w_bf, patches, preferred_element_type=jnp.float32)  # (Cout, HW)
        return jnp.maximum(acc * s_col + b_col, 0.0)                  # folded BN + ReLU

    # ---- decode: ConvBnRelu x3, activations resident in VMEM / vregs ----
    y = conv_bn_relu(slab_ref[0:Cin1, :].astype(jnp.bfloat16), Cin1,
                     w1_ref[...], sb[:, 0:1], sb[:, 1:2])
    y = conv_bn_relu(y.astype(jnp.bfloat16), Cout,
                     w23_ref[0], sb[:, 2:3], sb[:, 3:4])
    y = conv_bn_relu(y.astype(jnp.bfloat16), Cout,
                     w23_ref[1], sb[:, 4:5], sb[:, 5:6])

    # Residual add; store is lane-dense and already NCHW.
    out_ref[0] = (y + ident).astype(out_ref.dtype)


# --------------------------------------------------------------------------
# Wrapper: NCHW in / NCHW out, single pallas_call, no transposes / pads
# --------------------------------------------------------------------------

def _fold_conv_weight(wk):
    # HWIO (3,3,Cin,Cout) -> im2col (Cout, 9*Cin); column index = tap*Cin + ci with
    # tap enumerated (ky, kx) row-major, matching _shift_mask_matrices and the slab
    # channel order [x_s, x_big].
    cin, cout = wk.shape[2], wk.shape[3]
    return (jnp.transpose(wk.reshape(9, cin, cout), (2, 0, 1))
            .reshape(cout, 9 * cin).astype(jnp.bfloat16))


@jax.jit
def stack_decoder_forward(params, x_big_nchw, x_nchw):
    N, Cbig, H, W = x_big_nchw.shape
    _, Cx, h, w = x_nchw.shape
    HW, hw = H * W, h * w

    # NCHW consumed directly: (N, C, H, W) -> (N, C, H*W) is a free reshape.
    x = x_nchw.reshape(N, Cx, hw).astype(jnp.float32)
    xb = x_big_nchw.reshape(N, Cbig, HW).astype(jnp.float32)

    (w1, s1, b1), (w2, s2, b2), (w3, s3, b3) = params["decode"]
    Cin1, Cout = w1.shape[2], w1.shape[3]
    assert Cin1 == Cx + Cbig

    # Trace-time constants.
    Mt = jnp.asarray(
        np.kron(_bilinear_matrix(H, h), _bilinear_matrix(W, w)).T, jnp.float32)  # (hw, HW)
    Sw = jnp.asarray(_shift_mask_matrices(H, W), jnp.bfloat16)                   # (9, HW, HW)

    w1_k = _fold_conv_weight(w1)                                       # (Cout, 9*Cin1)
    w23_k = jnp.stack([_fold_conv_weight(w2), _fold_conv_weight(w3)])  # (2, Cout, 9*Cout)
    sb = jnp.stack([s1, b1, s2, b2, s3, b3, params["id_b"],
                    jnp.zeros_like(s1)], axis=1).astype(jnp.float32)   # (Cout, 8)
    idw = params["id_w"].T.astype(jnp.float32)                         # (Cout, Cx)

    out = pl.pallas_call(
        _stack_decoder_kernel,
        out_shape=jax.ShapeDtypeStruct((N, Cout, HW), jnp.float32),
        grid=(N,),
        in_specs=[
            pl.BlockSpec((1, Cx, hw), lambda n: (n, 0, 0)),
            pl.BlockSpec((1, Cbig, HW), lambda n: (n, 0, 0)),
            pl.BlockSpec((hw, HW), lambda n: (0, 0)),
            pl.BlockSpec((9, HW, HW), lambda n: (0, 0, 0)),
            pl.BlockSpec((Cout, 9 * Cin1), lambda n: (0, 0)),
            pl.BlockSpec((2, Cout, 9 * Cout), lambda n: (0, 0, 0)),
            pl.BlockSpec((Cout, 8), lambda n: (0, 0)),
            pl.BlockSpec((Cout, Cx), lambda n: (0, 0)),
        ],
        out_specs=pl.BlockSpec((1, Cout, HW), lambda n: (n, 0, 0)),
        scratch_shapes=[pltpu.VMEM((Cin1, HW), jnp.float32),
                        pltpu.VMEM((9 * max(Cin1, Cout), HW), jnp.float32)],
        compiler_params=pltpu.CompilerParams(
            dimension_semantics=("parallel",),
            vmem_limit_bytes=32 * 1024 * 1024),
    )(x, xb, Mt, Sw, w1_k, w23_k, sb, idw)

    return out.reshape(N, Cout, H, W)          # already channel-major: free reshape


# --------------------------------------------------------------------------
# Pure-JAX reference (same numerics: f32 upsample/identity, bf16 conv inputs)
# --------------------------------------------------------------------------

def reference_forward(params, x_big_nchw, x_nchw):
    xb = jnp.transpose(x_big_nchw, (0, 2, 3, 1)).astype(jnp.float32)
    x = jnp.transpose(x_nchw, (0, 2, 3, 1)).astype(jnp.float32)
    N, H, W, Cbig = xb.shape
    _, h, w, Cx = x.shape
    M = jnp.asarray(np.kron(_bilinear_matrix(H, h), _bilinear_matrix(W, w)), jnp.float32)
    xs = jnp.einsum("pk,nkc->npc", M, x.reshape(N, h * w, Cx)).reshape(N, H, W, Cx)
    y = jnp.concatenate([xs, xb], axis=-1)
    for (wk, scale, bias) in params["decode"]:
        y = jax.lax.conv_general_dilated(
            y.astype(jnp.bfloat16), wk.astype(jnp.bfloat16),
            (1, 1), [(1, 1), (1, 1)],
            dimension_numbers=("NHWC", "HWIO", "NHWC"),
            preferred_element_type=jnp.float32)
        y = jnp.maximum(y * scale + bias, 0.0)
    ident = jnp.einsum("nhwc,cd->nhwd", xs, params["id_w"]) + params["id_b"]
    return jnp.transpose(y + ident, (0, 3, 1, 2))


# --------------------------------------------------------------------------
# Deterministic parameter construction (BN folded to eval-mode affine)
# --------------------------------------------------------------------------

def make_params(key, x_big_channels, x_channels, y_channels):
    ks = jax.random.split(key, 32)
    ki = iter(range(32))
    params = {"decode": []}
    cins = [x_big_channels + x_channels, y_channels, y_channels]
    for cin in cins:
        w = 0.1 * jax.random.normal(ks[next(ki)], (3, 3, cin, y_channels), jnp.float32)
        gamma = jax.random.uniform(ks[next(ki)], (y_channels,), jnp.float32, 0.8, 1.2)
        beta = 0.05 * jax.random.normal(ks[next(ki)], (y_channels,), jnp.float32)
        rmean = 0.05 * jax.random.normal(ks[next(ki)], (y_channels,), jnp.float32)
        rvar = jax.random.uniform(ks[next(ki)], (y_channels,), jnp.float32, 0.5, 1.5)
        scale = gamma / jnp.sqrt(rvar + BN_EPS)
        bias = beta - rmean * scale
        params["decode"].append((w, scale, bias))
    params["id_w"] = 0.1 * jax.random.normal(ks[next(ki)], (x_channels, y_channels), jnp.float32)
    params["id_b"] = 0.05 * jax.random.normal(ks[next(ki)], (y_channels,), jnp.float32)
    return params


# --------------------------------------------------------------------------
# Main
# --------------------------------------------------------------------------

if __name__ == "__main__":
    # StackDecoder(x_big_channels=4, x_channels=4, y_channels=8)
    N = 2
    x_big_channels, x_channels, y_channels = 4, 4, 8
    H = W = 16
    h = w = 8

    key = jax.random.PRNGKey(0)
    k_params, k_big, k_x = jax.random.split(key, 3)
    params = make_params(k_params, x_big_channels, x_channels, y_channels)

    x_big = jax.random.normal(k_big, (N, x_big_channels, H, W), jnp.float32)   # NCHW
    x = jax.random.normal(k_x, (N, x_channels, h, w), jnp.float32)             # NCHW

    out = jax.block_until_ready(stack_decoder_forward(params, x_big, x))
    ref = jax.block_until_ready(reference_forward(params, x_big, x))

    assert out.shape == (N, y_channels, H, W), out.shape
    np.testing.assert_allclose(np.asarray(out), np.asarray(ref), rtol=3e-3, atol=3e-3)

    print("KERNEL_OK")
</pallas_src>

<mosaic_0001>
module attributes {stable_mosaic.version = 11 : i64} {
  func.func @_stack_decoder_kernel(%arg0: i32, %arg1: memref<1x4x64xf32, #tpu.memory_space<vmem>>, %arg2: memref<1x4x256xf32, #tpu.memory_space<vmem>>, %arg3: memref<64x256xf32, #tpu.memory_space<vmem>>, %arg4: memref<9x256x256xbf16, #tpu.memory_space<vmem>>, %arg5: memref<8x72xbf16, #tpu.memory_space<vmem>>, %arg6: memref<2x8x72xbf16, #tpu.memory_space<vmem>>, %arg7: memref<8x8xf32, #tpu.memory_space<vmem>>, %arg8: memref<8x4xf32, #tpu.memory_space<vmem>>, %arg9: memref<1x8x256xf32, #tpu.memory_space<vmem>>, %arg10: memref<8x256xf32, #tpu.memory_space<vmem>>, %arg11: memref<72x256xf32, #tpu.memory_space<vmem>>) attributes {dimension_semantics = [#tpu.dimension_semantics<parallel>], iteration_bounds = array<i64: 2>, scalar_prefetch = 0 : i64, scratch_operands = 2 : i64, tpu.core_type = #tpu.core_type<tc>, window_params = [{transform_indices = @transform_0, window_bounds = array<i64: 1, 4, 64>}, {transform_indices = @transform_1, window_bounds = array<i64: 1, 4, 256>}, {pipeline_mode = #tpu.pipeline_mode<synchronous>, transform_indices = @transform_2, window_bounds = array<i64: 64, 256>}, {pipeline_mode = #tpu.pipeline_mode<synchronous>, transform_indices = @transform_3, window_bounds = array<i64: 9, 256, 256>}, {pipeline_mode = #tpu.pipeline_mode<synchronous>, transform_indices = @transform_4, window_bounds = array<i64: 8, 72>}, {pipeline_mode = #tpu.pipeline_mode<synchronous>, transform_indices = @transform_5, window_bounds = array<i64: 2, 8, 72>}, {pipeline_mode = #tpu.pipeline_mode<synchronous>, transform_indices = @transform_6, window_bounds = array<i64: 8, 8>}, {pipeline_mode = #tpu.pipeline_mode<synchronous>, transform_indices = @transform_7, window_bounds = array<i64: 8, 4>}, {transform_indices = @transform_8, window_bounds = array<i64: 1, 8, 256>}]} {
    %c0 = arith.constant 0 : index
    %c0_0 = arith.constant 0 : index
    %0 = vector.load %arg7[%c0, %c0_0] : memref<8x8xf32, #tpu.memory_space<vmem>>, vector<8x8xf32>
    %c0_1 = arith.constant 0 : index
    %c0_2 = arith.constant 0 : index
    %c0_3 = arith.constant 0 : index
    %1 = vector.load %arg1[%c0_1, %c0_2, %c0_3] : memref<1x4x64xf32, #tpu.memory_space<vmem>>, vector<1x4x64xf32>
    %2 = vector.shape_cast %1 : vector<1x4x64xf32> to vector<4x64xf32>
    %c0_4 = arith.constant 0 : index
    %c0_5 = arith.constant 0 : index
    %3 = vector.load %arg3[%c0_4, %c0_5] : memref<64x256xf32, #tpu.memory_space<vmem>>, vector<64x256xf32>
    %cst = arith.constant dense<0.000000e+00> : vector<4x256xf32>
    %4 = tpu.matmul %2, %3, %cst {dimension_numbers = #tpu.dot_dimension_numbers<[1], [0], [0], [1], [0, 0, 1, 1], [], []>} : vector<4x64xf32>, vector<64x256xf32>, vector<4x256xf32> -> vector<4x256xf32>
    %c0_6 = arith.constant 0 : index
    %c0_7 = arith.constant 0 : index
    %5 = vector.load %arg8[%c0_6, %c0_7] : memref<8x4xf32, #tpu.memory_space<vmem>>, vector<8x4xf32>
    %cst_8 = arith.constant dense<0.000000e+00> : vector<8x256xf32>
    %6 = tpu.matmul %5, %4, %cst_8 {dimension_numbers = #tpu.dot_dimension_numbers<[1], [0], [0], [1], [0, 0, 1, 1], [], []>} : vector<8x4xf32>, vector<4x256xf32>, vector<8x256xf32> -> vector<8x256xf32>
    %7 = vector.extract_strided_slice %0 {offsets = [0, 6], sizes = [8, 1], strides = [1, 1]} : vector<8x8xf32> to vector<8x1xf32>
    %8 = vector.broadcast %7 : vector<8x1xf32> to vector<8x256xf32>
    %9 = arith.addf %6, %8 : vector<8x256xf32>
    %c0_9 = arith.constant 0 : index
    %c0_10 = arith.constant 0 : index
    %10 = vector.load %arg10[%c0_9, %c0_10] : memref<8x256xf32, #tpu.memory_space<vmem>>, vector<4x256xf32>
    tpu.vector_store %arg10[%c0_9, %c0_10], %4 {strides = array<i32>} : memref<8x256xf32, #tpu.memory_space<vmem>>, vector<4x256xf32>,
    %c0_11 = arith.constant 0 : index
    %c0_12 = arith.constant 0 : index
    %c0_13 = arith.constant 0 : index
    %11 = vector.load %arg2[%c0_11, %c0_12, %c0_13] : memref<1x4x256xf32, #tpu.memory_space<vmem>>, vector<1x4x256xf32>
    %12 = vector.shape_cast %11 : vector<1x4x256xf32> to vector<4x256xf32>
    %c4 = arith.constant 4 : index
    %c0_14 = arith.constant 0 : index
    %13 = vector.load %arg10[%c4, %c0_14] : memref<8x256xf32, #tpu.memory_space<vmem>>, vector<4x256xf32>
    tpu.vector_store %arg10[%c4, %c0_14], %12 {strides = array<i32>} : memref<8x256xf32, #tpu.memory_space<vmem>>, vector<4x256xf32>,
    %c0_15 = arith.constant 0 : index
    %c0_16 = arith.constant 0 : index
    %14 = vector.load %arg10[%c0_15, %c0_16] : memref<8x256xf32, #tpu.memory_space<vmem>>, vector<8x256xf32>
    %15 = arith.truncf %14 : vector<8x256xf32> to vector<8x256xbf16>
    %c0_17 = arith.constant 0 : index
    %c0_18 = arith.constant 0 : index
    %16 = vector.load %arg5[%c0_17, %c0_18] : memref<8x72xbf16, #tpu.memory_space<vmem>>, vector<8x72xbf16>
    %17 = vector.extract_strided_slice %0 {offsets = [0, 0], sizes = [8, 1], strides = [1, 1]} : vector<8x8xf32> to vector<8x1xf32>
    %18 = vector.extract_strided_slice %0 {offsets = [0, 1], sizes = [8, 1], strides = [1, 1]} : vector<8x8xf32> to vector<8x1xf32>
    %c0_19 = arith.constant 0 : index
    %c0_20 = arith.constant 0 : index
    %c0_21 = arith.constant 0 : index
    %19 = vector.load %arg4[%c0_19, %c0_20, %c0_21] : memref<9x256x256xbf16, #tpu.memory_space<vmem>>, vector<1x256x256xbf16>
    %20 = vector.shape_cast %19 : vector<1x256x256xbf16> to vector<256x256xbf16>
    %cst_22 = arith.constant dense<0.000000e+00> : vector<8x256xf32>
    %21 = tpu.matmul %15, %20, %cst_22 {dimension_numbers = #tpu.dot_dimension_numbers<[1], [0], [0], [1], [0, 0, 1, 1], [], []>} : vector<8x256xbf16>, vector<256x256xbf16>, vector<8x256xf32> -> vector<8x256xf32>
    %c0_23 = arith.constant 0 : index
    %c0_24 = arith.constant 0 : index
    %22 = vector.load %arg11[%c0_23, %c0_24] : memref<72x256xf32, #tpu.memory_space<vmem>>, vector<8x256xf32>
    tpu.vector_store %arg11[%c0_23, %c0_24], %21 {strides = array<i32>} : memref<72x256xf32, #tpu.memory_space<vmem>>, vector<8x256xf32>,
    %c1 = arith.constant 1 : index
    %c0_25 = arith.constant 0 : index
    %c0_26 = arith.constant 0 : index
    %23 = vector.load %arg4[%c1, %c0_25, %c0_26] : memref<9x256x256xbf16, #tpu.memory_space<vmem>>, vector<1x256x256xbf16>
    %24 = vector.shape_cast %23 : vector<1x256x256xbf16> to vector<256x256xbf16>
    %cst_27 = arith.constant dense<0.000000e+00> : vector<8x256xf32>
    %25 = tpu.matmul %15, %24, %cst_27 {dimension_numbers = #tpu.dot_dimension_numbers<[1], [0], [0], [1], [0, 0, 1, 1], [], []>} : vector<8x256xbf16>, vector<256x256xbf16>, vector<8x256xf32> -> vector<8x256xf32>
    %c8 = arith.constant 8 : index
    %c0_28 = arith.constant 0 : index
    %26 = vector.load %arg11[%c8, %c0_28] : memref<72x256xf32, #tpu.memory_space<vmem>>, vector<8x256xf32>
    tpu.vector_store %arg11[%c8, %c0_28], %25 {strides = array<i32>} : memref<72x256xf32, #tpu.memory_space<vmem>>, vector<8x256xf32>,
    %c2 = arith.constant 2 : index
    %c0_29 = arith.constant 0 : index
    %c0_30 = arith.constant 0 : index
    %27 = vector.load %arg4[%c2, %c0_29, %c0_30] : memref<9x256x256xbf16, #tpu.memory_space<vmem>>, vector<1x256x256xbf16>
    %28 = vector.shape_cast %27 : vector<1x256x256xbf16> to vector<256x256xbf16>
    %cst_31 = arith.constant dense<0.000000e+00> : vector<8x256xf32>
    %29 = tpu.matmul %15, %28, %cst_31 {dimension_numbers = #tpu.dot_dimension_numbers<[1], [0], [0], [1], [0, 0, 1, 1], [], []>} : vector<8x256xbf16>, vector<256x256xbf16>, vector<8x256xf32> -> vector<8x256xf32>
    %c16 = arith.constant 16 : index
    %c0_32 = arith.constant 0 : index
    %30 = vector.load %arg11[%c16, %c0_32] : memref<72x256xf32, #tpu.memory_space<vmem>>, vector<8x256xf32>
    tpu.vector_store %arg11[%c16, %c0_32], %29 {strides = array<i32>} : memref<72x256xf32, #tpu.memory_space<vmem>>, vector<8x256xf32>,
    %c3 = arith.constant 3 : index
    %c0_33 = arith.constant 0 : index
    %c0_34 = arith.constant 0 : index
    %31 = vector.load %arg4[%c3, %c0_33, %c0_34] : memref<9x256x256xbf16, #tpu.memory_space<vmem>>, vector<1x256x256xbf16>
    %32 = vector.shape_cast %31 : vector<1x256x256xbf16> to vector<256x256xbf16>
    %cst_35 = arith.constant dense<0.000000e+00> : vector<8x256xf32>
    %33 = tpu.matmul %15, %32, %cst_35 {dimension_numbers = #tpu.dot_dimension_numbers<[1], [0], [0], [1], [0, 0, 1, 1], [], []>} : vector<8x256xbf16>, vector<256x256xbf16>, vector<8x256xf32> -> vector<8x256xf32>
    %c24 = arith.constant 24 : index
    %c0_36 = arith.constant 0 : index
    %34 = vector.load %arg11[%c24, %c0_36] : memref<72x256xf32, #tpu.memory_space<vmem>>, vector<8x256xf32>
    tpu.vector_store %arg11[%c24, %c0_36], %33 {strides = array<i32>} : memref<72x256xf32, #tpu.memory_space<vmem>>, vector<8x256xf32>,
    %c4_37 = arith.constant 4 : index
    %c0_38 = arith.constant 0 : index
    %c0_39 = arith.constant 0 : index
    %35 = vector.load %arg4[%c4_37, %c0_38, %c0_39] : memref<9x256x256xbf16, #tpu.memory_space<vmem>>, vector<1x256x256xbf16>
    %36 = vector.shape_cast %35 : vector<1x256x256xbf16> to vector<256x256xbf16>
    %cst_40 = arith.constant dense<0.000000e+00> : vector<8x256xf32>
    %37 = tpu.matmul %15, %36, %cst_40 {dimension_numbers = #tpu.dot_dimension_numbers<[1], [0], [0], [1], [0, 0, 1, 1], [], []>} : vector<8x256xbf16>, vector<256x256xbf16>, vector<8x256xf32> -> vector<8x256xf32>
    %c32 = arith.constant 32 : index
    %c0_41 = arith.constant 0 : index
    %38 = vector.load %arg11[%c32, %c0_41] : memref<72x256xf32, #tpu.memory_space<vmem>>, vector<8x256xf32>
    tpu.vector_store %arg11[%c32, %c0_41], %37 {strides = array<i32>} : memref<72x256xf32, #tpu.memory_space<vmem>>, vector<8x256xf32>,
    %c5 = arith.constant 5 : index
    %c0_42 = arith.constant 0 : index
    %c0_43 = arith.constant 0 : index
    %39 = vector.load %arg4[%c5, %c0_42, %c0_43] : memref<9x256x256xbf16, #tpu.memory_space<vmem>>, vector<1x256x256xbf16>
    %40 = vector.shape_cast %39 : vector<1x256x256xbf16> to vector<256x256xbf16>
    %cst_44 = arith.constant dense<0.000000e+00> : vector<8x256xf32>
    %41 = tpu.matmul %15, %40, %cst_44 {dimension_numbers = #tpu.dot_dimension_numbers<[1], [0], [0], [1], [0, 0, 1, 1], [], []>} : vector<8x256xbf16>, vector<256x256xbf16>, vector<8x256xf32> -> vector<8x256xf32>
    %c40 = arith.constant 40 : index
    %c0_45 = arith.constant 0 : index
    %42 = vector.load %arg11[%c40, %c0_45] : memref<72x256xf32, #tpu.memory_space<vmem>>, vector<8x256xf32>
    tpu.vector_store %arg11[%c40, %c0_45], %41 {strides = array<i32>} : memref<72x256xf32, #tpu.memory_space<vmem>>, vector<8x256xf32>,
    %c6 = arith.constant 6 : index
    %c0_46 = arith.constant 0 : index
    %c0_47 = arith.constant 0 : index
    %43 = vector.load %arg4[%c6, %c0_46, %c0_47] : memref<9x256x256xbf16, #tpu.memory_space<vmem>>, vector<1x256x256xbf16>
    %44 = vector.shape_cast %43 : vector<1x256x256xbf16> to vector<256x256xbf16>
    %cst_48 = arith.constant dense<0.000000e+00> : vector<8x256xf32>
    %45 = tpu.matmul %15, %44, %cst_48 {dimension_numbers = #tpu.dot_dimension_numbers<[1], [0], [0], [1], [0, 0, 1, 1], [], []>} : vector<8x256xbf16>, vector<256x256xbf16>, vector<8x256xf32> -> vector<8x256xf32>
    %c48 = arith.constant 48 : index
    %c0_49 = arith.constant 0 : index
    %46 = vector.load %arg11[%c48, %c0_49] : memref<72x256xf32, #tpu.memory_space<vmem>>, vector<8x256xf32>
    tpu.vector_store %arg11[%c48, %c0_49], %45 {strides = array<i32>} : memref<72x256xf32, #tpu.memory_space<vmem>>, vector<8x256xf32>,
    %c7 = arith.constant 7 : index
    %c0_50 = arith.constant 0 : index
    %c0_51 = arith.constant 0 : index
    %47 = vector.load %arg4[%c7, %c0_50, %c0_51] : memref<9x256x256xbf16, #tpu.memory_space<vmem>>, vector<1x256x256xbf16>
    %48 = vector.shape_cast %47 : vector<1x256x256xbf16> to vector<256x256xbf16>
    %cst_52 = arith.constant dense<0.000000e+00> : vector<8x256xf32>
    %49 = tpu.matmul %15, %48, %cst_52 {dimension_numbers = #tpu.dot_dimension_numbers<[1], [0], [0], [1], [0, 0, 1, 1], [], []>} : vector<8x256xbf16>, vector<256x256xbf16>, vector<8x256xf32> -> vector<8x256xf32>
    %c56 = arith.constant 56 : index
    %c0_53 = arith.constant 0 : index
    %50 = vector.load %arg11[%c56, %c0_53] : memref<72x256xf32, #tpu.memory_space<vmem>>, vector<8x256xf32>
    tpu.vector_store %arg11[%c56, %c0_53], %49 {strides = array<i32>} : memref<72x256xf32, #tpu.memory_space<vmem>>, vector<8x256xf32>,
    %c8_54 = arith.constant 8 : index
    %c0_55 = arith.constant 0 : index
    %c0_56 = arith.constant 0 : index
    %51 = vector.load %arg4[%c8_54, %c0_55, %c0_56] : memref<9x256x256xbf16, #tpu.memory_space<vmem>>, vector<1x256x256xbf16>
    %52 = vector.shape_cast %51 : vector<1x256x256xbf16> to vector<256x256xbf16>
    %cst_57 = arith.constant dense<0.000000e+00> : vector<8x256xf32>
    %53 = tpu.matmul %15, %52, %cst_57 {dimension_numbers = #tpu.dot_dimension_numbers<[1], [0], [0], [1], [0, 0, 1, 1], [], []>} : vector<8x256xbf16>, vector<256x256xbf16>, vector<8x256xf32> -> vector<8x256xf32>
    %c64 = arith.constant 64 : index
    %c0_58 = arith.constant 0 : index
    %54 = vector.load %arg11[%c64, %c0_58] : memref<72x256xf32, #tpu.memory_space<vmem>>, vector<8x256xf32>
    tpu.vector_store %arg11[%c64, %c0_58], %53 {strides = array<i32>} : memref<72x256xf32, #tpu.memory_space<vmem>>, vector<8x256xf32>,
    %c0_59 = arith.constant 0 : index
    %c0_60 = arith.constant 0 : index
    %55 = vector.load %arg11[%c0_59, %c0_60] : memref<72x256xf32, #tpu.memory_space<vmem>>, vector<72x256xf32>
    %56 = arith.truncf %55 : vector<72x256xf32> to vector<72x256xbf16>
    %cst_61 = arith.constant dense<0.000000e+00> : vector<8x256xf32>
    %57 = tpu.matmul %16, %56, %cst_61 {dimension_numbers = #tpu.dot_dimension_numbers<[1], [0], [0], [1], [0, 0, 1, 1], [], []>} : vector<8x72xbf16>, vector<72x256xbf16>, vector<8x256xf32> -> vector<8x256xf32>
    %58 = vector.broadcast %17 : vector<8x1xf32> to vector<8x256xf32>
    %59 = arith.mulf %57, %58 : vector<8x256xf32>
    %60 = vector.broadcast %18 : vector<8x1xf32> to vector<8x256xf32>
    %61 = arith.addf %59, %60 : vector<8x256xf32>
    %cst_62 = arith.constant 0.000000e+00 : f32
    %62 = vector.broadcast %cst_62 : f32 to vector<8x256xf32>
    %63 = arith.maximumf %61, %62 : vector<8x256xf32>
    %64 = arith.truncf %63 : vector<8x256xf32> to vector<8x256xbf16>
    %c0_63 = arith.constant 0 : index
    %c0_64 = arith.constant 0 : index
    %c0_65 = arith.constant 0 : index
    %65 = vector.load %arg6[%c0_63, %c0_64, %c0_65] : memref<2x8x72xbf16, #tpu.memory_space<vmem>>, vector<1x8x72xbf16>
    %66 = vector.shape_cast %65 : vector<1x8x72xbf16> to vector<8x72xbf16>
    %67 = vector.extract_strided_slice %0 {offsets = [0, 2], sizes = [8, 1], strides = [1, 1]} : vector<8x8xf32> to vector<8x1xf32>
    %68 = vector.extract_strided_slice %0 {offsets = [0, 3], sizes = [8, 1], strides = [1, 1]} : vector<8x8xf32> to vector<8x1xf32>
    %c0_66 = arith.constant 0 : index
    %c0_67 = arith.constant 0 : index
    %c0_68 = arith.constant 0 : index
    %69 = vector.load %arg4[%c0_66, %c0_67, %c0_68] : memref<9x256x256xbf16, #tpu.memory_space<vmem>>, vector<1x256x256xbf16>
    %70 = vector.shape_cast %69 : vector<1x256x256xbf16> to vector<256x256xbf16>
    %cst_69 = arith.constant dense<0.000000e+00> : vector<8x256xf32>
    %71 = tpu.matmul %64, %70, %cst_69 {dimension_numbers = #tpu.dot_dimension_numbers<[1], [0], [0], [1], [0, 0, 1, 1], [], []>} : vector<8x256xbf16>, vector<256x256xbf16>, vector<8x256xf32> -> vector<8x256xf32>
    %c0_70 = arith.constant 0 : index
    %c0_71 = arith.constant 0 : index
    %72 = vector.load %arg11[%c0_70, %c0_71] : memref<72x256xf32, #tpu.memory_space<vmem>>, vector<8x256xf32>
    tpu.vector_store %arg11[%c0_70, %c0_71], %71 {strides = array<i32>} : memref<72x256xf32, #tpu.memory_space<vmem>>, vector<8x256xf32>,
    %c1_72 = arith.constant 1 : index
    %c0_73 = arith.constant 0 : index
    %c0_74 = arith.constant 0 : index
    %73 = vector.load %arg4[%c1_72, %c0_73, %c0_74] : memref<9x256x256xbf16, #tpu.memory_space<vmem>>, vector<1x256x256xbf16>
    %74 = vector.shape_cast %73 : vector<1x256x256xbf16> to vector<256x256xbf16>
    %cst_75 = arith.constant dense<0.000000e+00> : vector<8x256xf32>
    %75 = tpu.matmul %64, %74, %cst_75 {dimension_numbers = #tpu.dot_dimension_numbers<[1], [0], [0], [1], [0, 0, 1, 1], [], []>} : vector<8x256xbf16>, vector<256x256xbf16>, vector<8x256xf32> -> vector<8x256xf32>
    %c8_76 = arith.constant 8 : index
    %c0_77 = arith.constant 0 : index
    %76 = vector.load %arg11[%c8_76, %c0_77] : memref<72x256xf32, #tpu.memory_space<vmem>>, vector<8x256xf32>
    tpu.vector_store %arg11[%c8_76, %c0_77], %75 {strides = array<i32>} : memref<72x256xf32, #tpu.memory_space<vmem>>, vector<8x256xf32>,
    %c2_78 = arith.constant 2 : index
    %c0_79 = arith.constant 0 : index
    %c0_80 = arith.constant 0 : index
    %77 = vector.load %arg4[%c2_78, %c0_79, %c0_80] : memref<9x256x256xbf16, #tpu.memory_space<vmem>>, vector<1x256x256xbf16>
    %78 = vector.shape_cast %77 : vector<1x256x256xbf16> to vector<256x256xbf16>
    %cst_81 = arith.constant dense<0.000000e+00> : vector<8x256xf32>
    %79 = tpu.matmul %64, %78, %cst_81 {dimension_numbers = #tpu.dot_dimension_numbers<[1], [0], [0], [1], [0, 0, 1, 1], [], []>} : vector<8x256xbf16>, vector<256x256xbf16>, vector<8x256xf32> -> vector<8x256xf32>
    %c16_82 = arith.constant 16 : index
    %c0_83 = arith.constant 0 : index
    %80 = vector.load %arg11[%c16_82, %c0_83] : memref<72x256xf32, #tpu.memory_space<vmem>>, vector<8x256xf32>
    tpu.vector_store %arg11[%c16_82, %c0_83], %79 {strides = array<i32>} : memref<72x256xf32, #tpu.memory_space<vmem>>, vector<8x256xf32>,
    %c3_84 = arith.constant 3 : index
    %c0_85 = arith.constant 0 : index
    %c0_86 = arith.constant 0 : index
    %81 = vector.load %arg4[%c3_84, %c0_85, %c0_86] : memref<9x256x256xbf16, #tpu.memory_space<vmem>>, vector<1x256x256xbf16>
    %82 = vector.shape_cast %81 : vector<1x256x256xbf16> to vector<256x256xbf16>
    %cst_87 = arith.constant dense<0.000000e+00> : vector<8x256xf32>
    %83 = tpu.matmul %64, %82, %cst_87 {dimension_numbers = #tpu.dot_dimension_numbers<[1], [0], [0], [1], [0, 0, 1, 1], [], []>} : vector<8x256xbf16>, vector<256x256xbf16>, vector<8x256xf32> -> vector<8x256xf32>
    %c24_88 = arith.constant 24 : index
    %c0_89 = arith.constant 0 : index
    %84 = vector.load %arg11[%c24_88, %c0_89] : memref<72x256xf32, #tpu.memory_space<vmem>>, vector<8x256xf32>
    tpu.vector_store %arg11[%c24_88, %c0_89], %83 {strides = array<i32>} : memref<72x256xf32, #tpu.memory_space<vmem>>, vector<8x256xf32>,
    %c4_90 = arith.constant 4 : index
    %c0_91 = arith.constant 0 : index
    %c0_92 = arith.constant 0 : index
    %85 = vector.load %arg4[%c4_90, %c0_91, %c0_92] : memref<9x256x256xbf16, #tpu.memory_space<vmem>>, vector<1x256x256xbf16>
    %86 = vector.shape_cast %85 : vector<1x256x256xbf16> to vector<256x256xbf16>
    %cst_93 = arith.constant dense<0.000000e+00> : vector<8x256xf32>
    %87 = tpu.matmul %64, %86, %cst_93 {dimension_numbers = #tpu.dot_dimension_numbers<[1], [0], [0], [1], [0, 0, 1, 1], [], []>} : vector<8x256xbf16>, vector<256x256xbf16>, vector<8x256xf32> -> vector<8x256xf32>
    %c32_94 = arith.constant 32 : index
    %c0_95 = arith.constant 0 : index
    %88 = vector.load %arg11[%c32_94, %c0_95] : memref<72x256xf32, #tpu.memory_space<vmem>>, vector<8x256xf32>
    tpu.vector_store %arg11[%c32_94, %c0_95], %87 {strides = array<i32>} : memref<72x256xf32, #tpu.memory_space<vmem>>, vector<8x256xf32>,
    %c5_96 = arith.constant 5 : index
    %c0_97 = arith.constant 0 : index
    %c0_98 = arith.constant 0 : index
    %89 = vector.load %arg4[%c5_96, %c0_97, %c0_98] : memref<9x256x256xbf16, #tpu.memory_space<vmem>>, vector<1x256x256xbf16>
    %90 = vector.shape_cast %89 : vector<1x256x256xbf16> to vector<256x256xbf16>
    %cst_99 = arith.constant dense<0.000000e+00> : vector<8x256xf32>
    %91 = tpu.matmul %64, %90, %cst_99 {dimension_numbers = #tpu.dot_dimension_numbers<[1], [0], [0], [1], [0, 0, 1, 1], [], []>} : vector<8x256xbf16>, vector<256x256xbf16>, vector<8x256xf32> -> vector<8x256xf32>
    %c40_100 = arith.constant 40 : index
    %c0_101 = arith.constant 0 : index
    %92 = vector.load %arg11[%c40_100, %c0_101] : memref<72x256xf32, #tpu.memory_space<vmem>>, vector<8x256xf32>
    tpu.vector_store %arg11[%c40_100, %c0_101], %91 {strides = array<i32>} : memref<72x256xf32, #tpu.memory_space<vmem>>, vector<8x256xf32>,
    %c6_102 = arith.constant 6 : index
    %c0_103 = arith.constant 0 : index
    %c0_104 = arith.constant 0 : index
    %93 = vector.load %arg4[%c6_102, %c0_103, %c0_104] : memref<9x256x256xbf16, #tpu.memory_space<vmem>>, vector<1x256x256xbf16>
    %94 = vector.shape_cast %93 : vector<1x256x256xbf16> to vector<256x256xbf16>
    %cst_105 = arith.constant dense<0.000000e+00> : vector<8x256xf32>
    %95 = tpu.matmul %64, %94, %cst_105 {dimension_numbers = #tpu.dot_dimension_numbers<[1], [0], [0], [1], [0, 0, 1, 1], [], []>} : vector<8x256xbf16>, vector<256x256xbf16>, vector<8x256xf32> -> vector<8x256xf32>
    %c48_106 = arith.constant 48 : index
    %c0_107 = arith.constant 0 : index
    %96 = vector.load %arg11[%c48_106, %c0_107] : memref<72x256xf32, #tpu.memory_space<vmem>>, vector<8x256xf32>
    tpu.vector_store %arg11[%c48_106, %c0_107], %95 {strides = array<i32>} : memref<72x256xf32, #tpu.memory_space<vmem>>, vector<8x256xf32>,
    %c7_108 = arith.constant 7 : index
    %c0_109 = arith.constant 0 : index
    %c0_110 = arith.constant 0 : index
    %97 = vector.load %arg4[%c7_108, %c0_109, %c0_110] : memref<9x256x256xbf16, #tpu.memory_space<vmem>>, vector<1x256x256xbf16>
    %98 = vector.shape_cast %97 : vector<1x256x256xbf16> to vector<256x256xbf16>
    %cst_111 = arith.constant dense<0.000000e+00> : vector<8x256xf32>
    %99 = tpu.matmul %64, %98, %cst_111 {dimension_numbers = #tpu.dot_dimension_numbers<[1], [0], [0], [1], [0, 0, 1, 1], [], []>} : vector<8x256xbf16>, vector<256x256xbf16>, vector<8x256xf32> -> vector<8x256xf32>
    %c56_112 = arith.constant 56 : index
    %c0_113 = arith.constant 0 : index
    %100 = vector.load %arg11[%c56_112, %c0_113] : memref<72x256xf32, #tpu.memory_space<vmem>>, vector<8x256xf32>
    tpu.vector_store %arg11[%c56_112, %c0_113], %99 {strides = array<i32>} : memref<72x256xf32, #tpu.memory_space<vmem>>, vector<8x256xf32>,
    %c8_114 = arith.constant 8 : index
    %c0_115 = arith.constant 0 : index
    %c0_116 = arith.constant 0 : index
    %101 = vector.load %arg4[%c8_114, %c0_115, %c0_116] : memref<9x256x256xbf16, #tpu.memory_space<vmem>>, vector<1x256x256xbf16>
    %102 = vector.shape_cast %101 : vector<1x256x256xbf16> to vector<256x256xbf16>
    %cst_117 = arith.constant dense<0.000000e+00> : vector<8x256xf32>
    %103 = tpu.matmul %64, %102, %cst_117 {dimension_numbers = #tpu.dot_dimension_numbers<[1], [0], [0], [1], [0, 0, 1, 1], [], []>} : vector<8x256xbf16>, vector<256x256xbf16>, vector<8x256xf32> -> vector<8x256xf32>
    %c64_118 = arith.constant 64 : index
    %c0_119 = arith.constant 0 : index
    %104 = vector.load %arg11[%c64_118, %c0_119] : memref<72x256xf32, #tpu.memory_space<vmem>>, vector<8x256xf32>
    tpu.vector_store %arg11[%c64_118, %c0_119], %103 {strides = array<i32>} : memref<72x256xf32, #tpu.memory_space<vmem>>, vector<8x256xf32>,
    %c0_120 = arith.constant 0 : index
    %c0_121 = arith.constant 0 : index
    %105 = vector.load %arg11[%c0_120, %c0_121] : memref<72x256xf32, #tpu.memory_space<vmem>>, vector<72x256xf32>
    %106 = arith.truncf %105 : vector<72x256xf32> to vector<72x256xbf16>
    %cst_122 = arith.constant dense<0.000000e+00> : vector<8x256xf32>
    %107 = tpu.matmul %66, %106, %cst_122 {dimension_numbers = #tpu.dot_dimension_numbers<[1], [0], [0], [1], [0, 0, 1, 1], [], []>} : vector<8x72xbf16>, vector<72x256xbf16>, vector<8x256xf32> -> vector<8x256xf32>
    %108 = vector.broadcast %67 : vector<8x1xf32> to vector<8x256xf32>
    %109 = arith.mulf %107, %108 : vector<8x256xf32>
    %110 = vector.broadcast %68 : vector<8x1xf32> to vector<8x256xf32>
    %111 = arith.addf %109, %110 : vector<8x256xf32>
    %cst_123 = arith.constant 0.000000e+00 : f32
    %112 = vector.broadcast %cst_123 : f32 to vector<8x256xf32>
    %113 = arith.maximumf %111, %112 : vector<8x256xf32>
    %114 = arith.truncf %113 : vector<8x256xf32> to vector<8x256xbf16>
    %c1_124 = arith.constant 1 : index
    %c0_125 = arith.constant 0 : index
    %c0_126 = arith.constant 0 : index
    %115 = vector.load %arg6[%c1_124, %c0_125, %c0_126] : memref<2x8x72xbf16, #tpu.memory_space<vmem>>, vector<1x8x72xbf16>
    %116 = vector.shape_cast %115 : vector<1x8x72xbf16> to vector<8x72xbf16>
    %117 = vector.extract_strided_slice %0 {offsets = [0, 4], sizes = [8, 1], strides = [1, 1]} : vector<8x8xf32> to vector<8x1xf32>
    %118 = vector.extract_strided_slice %0 {offsets = [0, 5], sizes = [8, 1], strides = [1, 1]} : vector<8x8xf32> to vector<8x1xf32>
    %c0_127 = arith.constant 0 : index
    %c0_128 = arith.constant 0 : index
    %c0_129 = arith.constant 0 : index
    %119 = vector.load %arg4[%c0_127, %c0_128, %c0_129] : memref<9x256x256xbf16, #tpu.memory_space<vmem>>, vector<1x256x256xbf16>
    %120 = vector.shape_cast %119 : vector<1x256x256xbf16> to vector<256x256xbf16>
    %cst_130 = arith.constant dense<0.000000e+00> : vector<8x256xf32>
    %121 = tpu.matmul %114, %120, %cst_130 {dimension_numbers = #tpu.dot_dimension_numbers<[1], [0], [0], [1], [0, 0, 1, 1], [], []>} : vector<8x256xbf16>, vector<256x256xbf16>, vector<8x256xf32> -> vector<8x256xf32>
    %c0_131 = arith.constant 0 : index
    %c0_132 = arith.constant 0 : index
    %122 = vector.load %arg11[%c0_131, %c0_132] : memref<72x256xf32, #tpu.memory_space<vmem>>, vector<8x256xf32>
    tpu.vector_store %arg11[%c0_131, %c0_132], %121 {strides = array<i32>} : memref<72x256xf32, #tpu.memory_space<vmem>>, vector<8x256xf32>,
    %c1_133 = arith.constant 1 : index
    %c0_134 = arith.constant 0 : index
    %c0_135 = arith.constant 0 : index
    %123 = vector.load %arg4[%c1_133, %c0_134, %c0_135] : memref<9x256x256xbf16, #tpu.memory_space<vmem>>, vector<1x256x256xbf16>
    %124 = vector.shape_cast %123 : vector<1x256x256xbf16> to vector<256x256xbf16>
    %cst_136 = arith.constant dense<0.000000e+00> : vector<8x256xf32>
    %125 = tpu.matmul %114, %124, %cst_136 {dimension_numbers = #tpu.dot_dimension_numbers<[1], [0], [0], [1], [0, 0, 1, 1], [], []>} : vector<8x256xbf16>, vector<256x256xbf16>, vector<8x256xf32> -> vector<8x256xf32>
    %c8_137 = arith.constant 8 : index
    %c0_138 = arith.constant 0 : index
    %126 = vector.load %arg11[%c8_137, %c0_138] : memref<72x256xf32, #tpu.memory_space<vmem>>, vector<8x256xf32>
    tpu.vector_store %arg11[%c8_137, %c0_138], %125 {strides = array<i32>} : memref<72x256xf32, #tpu.memory_space<vmem>>, vector<8x256xf32>,
    %c2_139 = arith.constant 2 : index
    %c0_140 = arith.constant 0 : index
    %c0_141 = arith.constant 0 : index
    %127 = vector.load %arg4[%c2_139, %c0_140, %c0_141] : memref<9x256x256xbf16, #tpu.memory_space<vmem>>, vector<1x256x256xbf16>
    %128 = vector.shape_cast %127 : vector<1x256x256xbf16> to vector<256x256xbf16>
    %cst_142 = arith.constant dense<0.000000e+00> : vector<8x256xf32>
    %129 = tpu.matmul %114, %128, %cst_142 {dimension_numbers = #tpu.dot_dimension_numbers<[1], [0], [0], [1], [0, 0, 1, 1], [], []>} : vector<8x256xbf16>, vector<256x256xbf16>, vector<8x256xf32> -> vector<8x256xf32>
    %c16_143 = arith.constant 16 : index
    %c0_144 = arith.constant 0 : index
    %130 = vector.load %arg11[%c16_143, %c0_144] : memref<72x256xf32, #tpu.memory_space<vmem>>, vector<8x256xf32>
    tpu.vector_store %arg11[%c16_143, %c0_144], %129 {strides = array<i32>} : memref<72x256xf32, #tpu.memory_space<vmem>>, vector<8x256xf32>,
    %c3_145 = arith.constant 3 : index
    %c0_146 = arith.constant 0 : index
    %c0_147 = arith.constant 0 : index
    %131 = vector.load %arg4[%c3_145, %c0_146, %c0_147] : memref<9x256x256xbf16, #tpu.memory_space<vmem>>, vector<1x256x256xbf16>
    %132 = vector.shape_cast %131 : vector<1x256x256xbf16> to vector<256x256xbf16>
    %cst_148 = arith.constant dense<0.000000e+00> : vector<8x256xf32>
    %133 = tpu.matmul %114, %132, %cst_148 {dimension_numbers = #tpu.dot_dimension_numbers<[1], [0], [0], [1], [0, 0, 1, 1], [], []>} : vector<8x256xbf16>, vector<256x256xbf16>, vector<8x256xf32> -> vector<8x256xf32>
    %c24_149 = arith.constant 24 : index
    %c0_150 = arith.constant 0 : index
    %134 = vector.load %arg11[%c24_149, %c0_150] : memref<72x256xf32, #tpu.memory_space<vmem>>, vector<8x256xf32>
    tpu.vector_store %arg11[%c24_149, %c0_150], %133 {strides = array<i32>} : memref<72x256xf32, #tpu.memory_space<vmem>>, vector<8x256xf32>,
    %c4_151 = arith.constant 4 : index
    %c0_152 = arith.constant 0 : index
    %c0_153 = arith.constant 0 : index
    %135 = vector.load %arg4[%c4_151, %c0_152, %c0_153] : memref<9x256x256xbf16, #tpu.memory_space<vmem>>, vector<1x256x256xbf16>
    %136 = vector.shape_cast %135 : vector<1x256x256xbf16> to vector<256x256xbf16>
    %cst_154 = arith.constant dense<0.000000e+00> : vector<8x256xf32>
    %137 = tpu.matmul %114, %136, %cst_154 {dimension_numbers = #tpu.dot_dimension_numbers<[1], [0], [0], [1], [0, 0, 1, 1], [], []>} : vector<8x256xbf16>, vector<256x256xbf16>, vector<8x256xf32> -> vector<8x256xf32>
    %c32_155 = arith.constant 32 : index
    %c0_156 = arith.constant 0 : index
    %138 = vector.load %arg11[%c32_155, %c0_156] : memref<72x256xf32, #tpu.memory_space<vmem>>, vector<8x256xf32>
    tpu.vector_store %arg11[%c32_155, %c0_156], %137 {strides = array<i32>} : memref<72x256xf32, #tpu.memory_space<vmem>>, vector<8x256xf32>,
    %c5_157 = arith.constant 5 : index
    %c0_158 = arith.constant 0 : index
    %c0_159 = arith.constant 0 : index
    %139 = vector.load %arg4[%c5_157, %c0_158, %c0_159] : memref<9x256x256xbf16, #tpu.memory_space<vmem>>, vector<1x256x256xbf16>
    %140 = vector.shape_cast %139 : vector<1x256x256xbf16> to vector<256x256xbf16>
    %cst_160 = arith.constant dense<0.000000e+00> : vector<8x256xf32>
    %141 = tpu.matmul %114, %140, %cst_160 {dimension_numbers = #tpu.dot_dimension_numbers<[1], [0], [0], [1], [0, 0, 1, 1], [], []>} : vector<8x256xbf16>, vector<256x256xbf16>, vector<8x256xf32> -> vector<8x256xf32>
    %c40_161 = arith.constant 40 : index
    %c0_162 = arith.constant 0 : index
    %142 = vector.load %arg11[%c40_161, %c0_162] : memref<72x256xf32, #tpu.memory_space<vmem>>, vector<8x256xf32>
    tpu.vector_store %arg11[%c40_161, %c0_162], %141 {strides = array<i32>} : memref<72x256xf32, #tpu.memory_space<vmem>>, vector<8x256xf32>,
    %c6_163 = arith.constant 6 : index
    %c0_164 = arith.constant 0 : index
    %c0_165 = arith.constant 0 : index
    %143 = vector.load %arg4[%c6_163, %c0_164, %c0_165] : memref<9x256x256xbf16, #tpu.memory_space<vmem>>, vector<1x256x256xbf16>
    %144 = vector.shape_cast %143 : vector<1x256x256xbf16> to vector<256x256xbf16>
    %cst_166 = arith.constant dense<0.000000e+00> : vector<8x256xf32>
    %145 = tpu.matmul %114, %144, %cst_166 {dimension_numbers = #tpu.dot_dimension_numbers<[1], [0], [0], [1], [0, 0, 1, 1], [], []>} : vector<8x256xbf16>, vector<256x256xbf16>, vector<8x256xf32> -> vector<8x256xf32>
    %c48_167 = arith.constant 48 : index
    %c0_168 = arith.constant 0 : index
    %146 = vector.load %arg11[%c48_167, %c0_168] : memref<72x256xf32, #tpu.memory_space<vmem>>, vector<8x256xf32>
    tpu.vector_store %arg11[%c48_167, %c0_168], %145 {strides = array<i32>} : memref<72x256xf32, #tpu.memory_space<vmem>>, vector<8x256xf32>,
    %c7_169 = arith.constant 7 : index
    %c0_170 = arith.constant 0 : index
    %c0_171 = arith.constant 0 : index
    %147 = vector.load %arg4[%c7_169, %c0_170, %c0_171] : memref<9x256x256xbf16, #tpu.memory_space<vmem>>, vector<1x256x256xbf16>
    %148 = vector.shape_cast %147 : vector<1x256x256xbf16> to vector<256x256xbf16>
    %cst_172 = arith.constant dense<0.000000e+00> : vector<8x256xf32>
    %149 = tpu.matmul %114, %148, %cst_172 {dimension_numbers = #tpu.dot_dimension_numbers<[1], [0], [0], [1], [0, 0, 1, 1], [], []>} : vector<8x256xbf16>, vector<256x256xbf16>, vector<8x256xf32> -> vector<8x256xf32>
    %c56_173 = arith.constant 56 : index
    %c0_174 = arith.constant 0 : index
    %150 = vector.load %arg11[%c56_173, %c0_174] : memref<72x256xf32, #tpu.memory_space<vmem>>, vector<8x256xf32>
    tpu.vector_store %arg11[%c56_173, %c0_174], %149 {strides = array<i32>} : memref<72x256xf32, #tpu.memory_space<vmem>>, vector<8x256xf32>,
    %c8_175 = arith.constant 8 : index
    %c0_176 = arith.constant 0 : index
    %c0_177 = arith.constant 0 : index
    %151 = vector.load %arg4[%c8_175, %c0_176, %c0_177] : memref<9x256x256xbf16, #tpu.memory_space<vmem>>, vector<1x256x256xbf16>
    %152 = vector.shape_cast %151 : vector<1x256x256xbf16> to vector<256x256xbf16>
    %cst_178 = arith.constant dense<0.000000e+00> : vector<8x256xf32>
    %153 = tpu.matmul %114, %152, %cst_178 {dimension_numbers = #tpu.dot_dimension_numbers<[1], [0], [0], [1], [0, 0, 1, 1], [], []>} : vector<8x256xbf16>, vector<256x256xbf16>, vector<8x256xf32> -> vector<8x256xf32>
    %c64_179 = arith.constant 64 : index
    %c0_180 = arith.constant 0 : index
    %154 = vector.load %arg11[%c64_179, %c0_180] : memref<72x256xf32, #tpu.memory_space<vmem>>, vector<8x256xf32>
    tpu.vector_store %arg11[%c64_179, %c0_180], %153 {strides = array<i32>} : memref<72x256xf32, #tpu.memory_space<vmem>>, vector<8x256xf32>,
    %c0_181 = arith.constant 0 : index
    %c0_182 = arith.constant 0 : index
    %155 = vector.load %arg11[%c0_181, %c0_182] : memref<72x256xf32, #tpu.memory_space<vmem>>, vector<72x256xf32>
    %156 = arith.truncf %155 : vector<72x256xf32> to vector<72x256xbf16>
    %cst_183 = arith.constant dense<0.000000e+00> : vector<8x256xf32>
    %157 = tpu.matmul %116, %156, %cst_183 {dimension_numbers = #tpu.dot_dimension_numbers<[1], [0], [0], [1], [0, 0, 1, 1], [], []>} : vector<8x72xbf16>, vector<72x256xbf16>, vector<8x256xf32> -> vector<8x256xf32>
    %158 = vector.broadcast %117 : vector<8x1xf32> to vector<8x256xf32>
    %159 = arith.mulf %157, %158 : vector<8x256xf32>
    %160 = vector.broadcast %118 : vector<8x1xf32> to vector<8x256xf32>
    %161 = arith.addf %159, %160 : vector<8x256xf32>
    %cst_184 = arith.constant 0.000000e+00 : f32
    %162 = vector.broadcast %cst_184 : f32 to vector<8x256xf32>
    %163 = arith.maximumf %161, %162 : vector<8x256xf32>
    %164 = arith.addf %163, %9 : vector<8x256xf32>
    %c0_185 = arith.constant 0 : index
    %c0_186 = arith.constant 0 : index
    %c0_187 = arith.constant 0 : index
    %165 = vector.load %arg9[%c0_185, %c0_186, %c0_187] : memref<1x8x256xf32, #tpu.memory_space<vmem>>, vector<1x8x256xf32>
    %166 = vector.shape_cast %165 : vector<1x8x256xf32> to vector<8x256xf32>
    %167 = vector.shape_cast %164 : vector<8x256xf32> to vector<1x8x256xf32>
    tpu.vector_store %arg9[%c0_185, %c0_186, %c0_187], %167 {strides = array<i32>} : memref<1x8x256xf32, #tpu.memory_space<vmem>>, vector<1x8x256xf32>,
    return
  }
  func.func @transform_0(%arg0: i32) -> (i32, i32, i32) {
    %c0_i32 = arith.constant 0 : i32
    %c0_i32_0 = arith.constant 0 : i32
    %c0_i32_1 = arith.constant 0 : i32
    return %arg0, %c0_i32, %c0_i32_0 : i32, i32, i32
  }
  func.func @transform_1(%arg0: i32) -> (i32, i32, i32) {
    %c0_i32 = arith.constant 0 : i32
    %c0_i32_0 = arith.constant 0 : i32
    %c0_i32_1 = arith.constant 0 : i32
    return %arg0, %c0_i32, %c0_i32_0 : i32, i32, i32
  }
  func.func @transform_2(%arg0: i32) -> (i32, i32) {
    %c0_i32 = arith.constant 0 : i32
    %c0_i32_0 = arith.constant 0 : i32
    %c0_i32_1 = arith.constant 0 : i32
    return %c0_i32, %c0_i32_0 : i32, i32
  }
  func.func @transform_3(%arg0: i32) -> (i32, i32, i32) {
    %c0_i32 = arith.constant 0 : i32
    %c0_i32_0 = arith.constant 0 : i32
    %c0_i32_1 = arith.constant 0 : i32
    %c0_i32_2 = arith.constant 0 : i32
    return %c0_i32, %c0_i32_0, %c0_i32_1 : i32, i32, i32
  }
  func.func @transform_4(%arg0: i32) -> (i32, i32) {
    %c0_i32 = arith.constant 0 : i32
    %c0_i32_0 = arith.constant 0 : i32
    %c0_i32_1 = arith.constant 0 : i32
    return %c0_i32, %c0_i32_0 : i32, i32
  }
  func.func @transform_5(%arg0: i32) -> (i32, i32, i32) {
    %c0_i32 = arith.constant 0 : i32
    %c0_i32_0 = arith.constant 0 : i32
    %c0_i32_1 = arith.constant 0 : i32
    %c0_i32_2 = arith.constant 0 : i32
    return %c0_i32, %c0_i32_0, %c0_i32_1 : i32, i32, i32
  }
  func.func @transform_6(%arg0: i32) -> (i32, i32) {
    %c0_i32 = arith.constant 0 : i32
    %c0_i32_0 = arith.constant 0 : i32
    %c0_i32_1 = arith.constant 0 : i32
    return %c0_i32, %c0_i32_0 : i32, i32
  }
  func.func @transform_7(%arg0: i32) -> (i32, i32) {
    %c0_i32 = arith.constant 0 : i32
    %c0_i32_0 = arith.constant 0 : i32
    %c0_i32_1 = arith.constant 0 : i32
    return %c0_i32, %c0_i32_0 : i32, i32
  }
  func.func @transform_8(%arg0: i32) -> (i32, i32, i32) {
    %c0_i32 = arith.constant 0 : i32
    %c0_i32_0 = arith.constant 0 : i32
    %c0_i32_1 = arith.constant 0 : i32
    return %arg0, %c0_i32, %c0_i32_0 : i32, i32, i32
  }
}

</mosaic_0001>

<bundles_post_ra>
// kernel: stack_decoder_forward.1
= control target key start
LH: loop header
LB: loop body
LE: loop exit
PB: predicated region body
PF: predicated region fallthrough
CT: control target
= control target key end

     0   :  { %s10282_s27 = smov 0   ;;  %s13067_s0 = inlined_call_operand.vmem [shape: f32[2,4,64], index: 0, kind: input, shape index: {}]   ;;  %s13068_s1 = inlined_call_operand.vmem [shape: f32[2,4,256], index: 1, kind: input, shape index: {}]   ;;  %s13069_s2 = inlined_call_operand.vmem [shape: f32[64,256], index: 2, kind: input, shape index: {}]   ;;  %s13070_s3 = inlined_call_operand.vmem [shape: bf16[9,256,256], index: 3, kind: input, shape index: {}]   ;;  %s13071_s4 = inlined_call_operand.vmem [shape: bf16[8,72], index: 4, kind: input, shape index: {}]   ;;  %s13072_s5 = inlined_call_operand.vmem [shape: bf16[2,8,72], index: 5, kind: input, shape index: {}]   ;;  %s13073_s6 = inlined_call_operand.vmem [shape: f32[8,8], index: 6, kind: input, shape index: {}]   ;;  %s13074_s7 = inlined_call_operand.vmem [shape: f32[8,4], index: 7, kind: input, shape index: {}]   ;;  %s13075_s8 = inlined_call_operand.vmem [shape: f32[2,8,256], index: 8, kind: output, shape index: {}]  }
   0x1 LB: > { %s7226_s28 = sadd.s32 4294967295, %s10227_s27   ;;  %p7230_p0 = scmp.ge.s32.totalorder %s10227_s27, 1  ;;  %s10227_s27 = sphi %s10282_s27, %s18_s27  }
   0x2   : > { %p271_p1 = scmp.lt.s32.totalorder %s10227_s27, 3 }
   0x4   : > { %p272_p2 = pnand %p7230_p0, %p271_p1 }
   0x5   : > { %v327_v0 = vld [vmem:[%s13069_s2 + $0x8] sm:$0xff] (!%p272_p2)  ;;  %v329_v1 = vld [vmem:[%s13069_s2 + $0x18] sm:$0xff] (!%p272_p2)  ;;  %v326_v2 = vld [vmem:[%s13069_s2] sm:$0xff] (!%p272_p2)  ;;  %p309_p3 = scmp.lt.s32.totalorder (!%p272_p2), %s7226_s28, 1  ;;  %v10229_v7 = vmov (!%p272_p2), 0.0   ;;  %vm342_vm0 = vcmask (!%p272_p2), 523264  }
   0x6   : > { %275 = sbr.rel (%p272_p2) target bundleno = 2394 (0x95a), region = 52  ;;  %v8883_v3 = vpack.c.bf16 (!%p272_p2), %v329_v1, %v327_v0  ;;  %v328_v4 = vld [vmem:[%s13069_s2 + $0x10] sm:$0xff] (!%p272_p2)  ;;  %v331_v5 = vld [vmem:[%s13069_s2 + $0x28] sm:$0xff] (!%p272_p2)  ;;  %v333_v6 = vld [vmem:[%s13069_s2 + $0x38] sm:$0xff] (!%p272_p2)  ;;  %410 = vmatprep.mubr.f32.mxu0 (!%p272_p2), %v10229_v7  ;;  %498 = vmatprep.mubr.f32.mxu1 (!%p272_p2), %v10229_v7  ;;  %v10230_v61 = vmov (!%p272_p2), 2   ;;  %v10231_v63 = vmov (!%p272_p2), 3  }
   0x7   : > { %v8885_v8 = vpack.c.bf16 (!%p272_p2), %v328_v4, %v326_v2  ;;  %v8887_v9 = vpack.c.bf16 (!%p272_p2), %v333_v6, %v331_v5  ;;  %v330_v10 = vld [vmem:[%s13069_s2 + $0x20] sm:$0xff] (!%p272_p2)  ;;  %v332_v11 = vld [vmem:[%s13069_s2 + $0x30] sm:$0xff] (!%p272_p2)  ;;  %v335_v12 = vld [vmem:[%s13069_s2 + $0x48] sm:$0xff] (!%p272_p2)  ;;  %8917 = vset.pattern.permute.xlu1 (!%p272_p2), %v10230_v61  ;;  %v10232_v0 = vmov (!%p272_p2), 4   ;;  %v10233_v1 = vmov (!%p272_p2), 6  }
   0x8   : > { %8884 = vmatprep.subr.bf16.mxu0 (!%p272_p2), %v8883_v3  ;;  %v337_v13 = vld [vmem:[%s13069_s2 + $0x58] sm:$0xff] (!%p272_p2)  ;;  %v8889_v14 = vpack.c.bf16 (!%p272_p2), %v332_v11, %v330_v10  ;;  %v334_v15 = vld [vmem:[%s13069_s2 + $0x40] sm:$0xff] (!%p272_p2)  ;;  %v336_v17 = vld [vmem:[%s13069_s2 + $0x50] sm:$0xff] (!%p272_p2)  ;;  %vm427_vm1 = vcmask (!%p272_p2), 1043456   ;;  %vm423_vm2 = vcmask (!%p272_p2), 31744   ;;  %vm2669_vm3 = vcmask (!%p272_p2), 588800  }
   0x9   : > { %8886 = vmatpush1.bf16.msra.mxu0 (!%p272_p2), %v8885_v8  ;;  %v8891_v16 = vpack.c.bf16 (!%p272_p2), %v337_v13, %v335_v12  ;;  %v339_v18 = vld [vmem:[%s13069_s2 + $0x68] sm:$0xff] (!%p272_p2)  ;;  %v341_v19 = vld [vmem:[%s13069_s2 + $0x78] sm:$0xff] (!%p272_p2)  ;;  %v8893_v22 = vpack.c.bf16 (!%p272_p2), %v336_v17, %v334_v15  ;;  %v338_v24 = vld [vmem:[%s13069_s2 + $0x60] sm:$0xff] (!%p272_p2) }
   0xa   : > { %8888 = vmatprep.subr.bf16.mxu0 (!%p272_p2), %v8887_v9  ;;  %v8895_v23 = vpack.c.bf16 (!%p272_p2), %v341_v19, %v339_v18  ;;  %v340_v25 = vld [vmem:[%s13069_s2 + $0x70] sm:$0xff] (!%p272_p2)  ;;  %v8925_v27 = vld [vmem:[%s13070_s3 + $0x104] ss:$8 sps:$4 sm:$0xff] (!%p272_p2)   ;;  %v8923_v29 = vld [vmem:[%s13070_s3 + $0x100] ss:$8 sps:$4 sm:$0xff] (!%p272_p2)  }
   0xb   : > { %v8897_v26 = vpack.c.bf16 (!%p272_p2), %v340_v25, %v338_v24  ;;  %v8928_v30 = vld [vmem:[%s13070_s3 + $0x114] ss:$8 sps:$4 sm:$0xff] (!%p272_p2)   ;;  %v8926_v31 = vld [vmem:[%s13070_s3 + $0x110] ss:$8 sps:$4 sm:$0xff] (!%p272_p2)   ;;  %v8931_v32 = vld [vmem:[%s13070_s3 + $0x124] ss:$8 sps:$4 sm:$0xff] (!%p272_p2)  }
   0xc   : > { %v8929_v33 = vld [vmem:[%s13070_s3 + $0x120] ss:$8 sps:$4 sm:$0xff] (!%p272_p2)   ;;  %v8934_v34 = vld [vmem:[%s13070_s3 + $0x134] ss:$8 sps:$4 sm:$0xff] (!%p272_p2)   ;;  %v8932_v35 = vld [vmem:[%s13070_s3 + $0x130] ss:$8 sps:$4 sm:$0xff] (!%p272_p2)  }
   0xd   : > { %s13077_s28 = smov (!%p309_p3, %s7226_s28), 1  ;;  %8890 = vmatpush1.bf16.msra.mxu0 %v8889_v14  ;;  %v8937_v36 = vld [vmem:[%s13070_s3 + $0x144] ss:$8 sps:$4 sm:$0xff]   ;;  %v8935_v37 = vld [vmem:[%s13070_s3 + $0x140] ss:$8 sps:$4 sm:$0xff]  }
   0xe   : > { %s8881_s9 = sshll.u32 %s13077_s28, 3  ;;  %8892 = vmatprep.subr.bf16.mxu0 %v8891_v16  ;;  %s7231_s23 = sshll.u32 %s13077_s28, 2  ;;  %v8940_v38 = vld [vmem:[%s13070_s3 + $0x154] ss:$8 sps:$4 sm:$0xff]   ;;  %v8938_v39 = vld [vmem:[%s13070_s3 + $0x150] ss:$8 sps:$4 sm:$0xff]  }
   0xf   : > { %s317_s14 = scalar_lea.vmem %s13068_s1, %s8881_s9  ;;  %s312_s26 = scalar_lea.vmem %s13067_s0, %s7231_s23  ;;  %v8943_v40 = vld [vmem:[%s13070_s3 + $0x164] ss:$8 sps:$4 sm:$0xff]   ;;  %v8941_v41 = vld [vmem:[%s13070_s3 + $0x160] ss:$8 sps:$4 sm:$0xff]   ;;  %v8946_v42 = vld [vmem:[%s13070_s3 + $0x174] ss:$8 sps:$4 sm:$0xff]  }
  0x10   : > { %v507_v20 = vld [vmem:[%s317_s14] sm:$0xff]  ;;  %v8944_v43 = vld [vmem:[%s13070_s3 + $0x170] ss:$8 sps:$4 sm:$0xff]   ;;  %v8952_v46 = vld [vmem:[%s13070_s3 + $0x194] ss:$8 sps:$4 sm:$0xff]   ;;  %s8882_s9 = sshll.u32 %s13077_s28, 4 }
  0x11   : > { %v509_v21 = vcombine.low %v507_v20, %v507_v20  ;;  %512 = vst [vmem:[#allocation2 + $0x8] sm:$0xf0] %v507_v20  ;;  %8894 = vmatpush1.bf16.msra.mxu0 %v8893_v22  ;;  %v325_v28 = vld [vmem:[%s312_s26] sm:$0xf]  ;;  %v8949_v44 = vld [vmem:[%s13070_s3 + $0x184] ss:$8 sps:$4 sm:$0xff]   ;;  %s322_s12 = scalar_lea.vmem %s13075_s8, %s8882_s9 }
  0x12   : > { %8896 = vmatprep.subr.bf16.mxu0 %v8895_v23  ;;  %v8947_v45 = vld [vmem:[%s13070_s3 + $0x180] ss:$8 sps:$4 sm:$0xff]   ;;  %v8950_v47 = vld [vmem:[%s13070_s3 + $0x190] ss:$8 sps:$4 sm:$0xff]   ;;  %v8955_v48 = vld [vmem:[%s13070_s3 + $0x1a4] ss:$8 sps:$4 sm:$0xff]  }
  0x13   : > { %511 = vst [vmem:[#allocation2] sm:$0xf0] %v509_v21  ;;  %v8953_v49 = vld [vmem:[%s13070_s3 + $0x1a0] ss:$8 sps:$4 sm:$0xff]   ;;  %v8958_v50 = vld [vmem:[%s13070_s3 + $0x1b4] ss:$8 sps:$4 sm:$0xff]  }
  0x14   : > { %v8956_v51 = vld [vmem:[%s13070_s3 + $0x1b0] ss:$8 sps:$4 sm:$0xff]   ;;  %v8961_v52 = vld [vmem:[%s13070_s3 + $0x1c4] ss:$8 sps:$4 sm:$0xff]   ;;  %v8959_v53 = vld [vmem:[%s13070_s3 + $0x1c0] ss:$8 sps:$4 sm:$0xff]  }
  0x15   : > { %8898 = vmatpush1.bf16.msra.mxu0 %v8897_v26  ;;  %v8964_v54 = vld [vmem:[%s13070_s3 + $0x1d4] ss:$8 sps:$4 sm:$0xff]   ;;  %v8962_v55 = vld [vmem:[%s13070_s3 + $0x1d0] ss:$8 sps:$4 sm:$0xff]   ;;  %v8970_v56 = vld [vmem:[%s13070_s3 + $0x1e4] ss:$8 sps:$4 sm:$0xff]  }
  0x16   : > { %946 = vmatprep.subr.bf16.mxu0 %v8925_v27  ;;  %v8968_v57 = vld [vmem:[%s13070_s3 + $0x1e0] ss:$8 sps:$4 sm:$0xff]   ;;  %v8976_v58 = vld [vmem:[%s13070_s3 + $0x1f4] ss:$8 sps:$4 sm:$0xff]   ;;  %v8974_v59 = vld [vmem:[%s13070_s3 + $0x1f0] ss:$8 sps:$4 sm:$0xff]  }
  0x17   : > { %v8982_v60 = vld [vmem:[%s13070_s3 + $0x304] ss:$8 sps:$4 sm:$0xff]   ;;  %v8965_v4 = vld [vmem:[%s13070_s3] ss:$8 sps:$4 sm:$0xff]   ;;  %v8973_v6 = vld [vmem:[%s13070_s3 + $0x14] ss:$8 sps:$4 sm:$0xff]  }
  0x18   : > { %7236 = vmatmul.mubr.msk.f32.vlgmr.msra.gmra.mrb[0].mxu0 %vm342_vm0, %v325_v28  ;;  %v324_v62 = vld [vmem:[%s13073_s6] sm:$0xff]  ;;  %v8971_v8 = vld [vmem:[%s13070_s3 + $0x10] ss:$8 sps:$4 sm:$0xff]   ;;  %v8985_v15 = vld [vmem:[%s13070_s3 + $0x34] ss:$8 sps:$4 sm:$0xff]  }
  0x19   : > { %947 = vmatpush1.bf16.msra.mxu0 %v8923_v29  ;;  %4931 = vperm.xlu1 %8917, %v324_v62   ;;  %v8967_v2 = vld [vmem:[%s13070_s3 + $0x4] ss:$8 sps:$4 sm:$0xff]   ;;  %v8977_v10 = vld [vmem:[%s13070_s3 + $0x20] ss:$8 sps:$4 sm:$0xff]   ;;  %v8988_v17 = vld [vmem:[%s13070_s3 + $0x314] ss:$8 sps:$4 sm:$0xff]  }
  0x1a   : > { %948 = vmatprep.subr.bf16.mxu0 %v8928_v30  ;;  %v417_v3 = vld [vmem:[%s13074_s7] sm:$0xff]  ;;  %v8983_v18 = vld [vmem:[%s13070_s3 + $0x30] ss:$8 sps:$4 sm:$0xff]   ;;  %v8997_v24 = vld [vmem:[%s13070_s3 + $0x54] ss:$8 sps:$4 sm:$0xff]  }
  0x1b   : > { %v8979_v9 = vld [vmem:[%s13070_s3 + $0x24] ss:$8 sps:$4 sm:$0xff]   ;;  %v8980_v14 = vld [vmem:[%s13070_s3 + $0x300] ss:$8 sps:$4 sm:$0xff]   ;;  %v8986_v19 = vld [vmem:[%s13070_s3 + $0x310] ss:$8 sps:$4 sm:$0xff]  }
  0x1c   : > { %v8991_v20 = vld [vmem:[%s13070_s3 + $0x44] ss:$8 sps:$4 sm:$0xff]   ;;  %v8989_v21 = vld [vmem:[%s13070_s3 + $0x40] ss:$8 sps:$4 sm:$0xff]   ;;  %v8995_v25 = vld [vmem:[%s13070_s3 + $0x50] ss:$8 sps:$4 sm:$0xff]  }
  0x1d   : > { %949 = vmatpush1.bf16.msra.mxu0 %v8926_v31  ;;  %8918 = vset.pattern.permute.xlu1 %v10231_v63  ;;  %v8994_v22 = vld [vmem:[%s13070_s3 + $0x324] ss:$8 sps:$4 sm:$0xff]   ;;  %v8992_v23 = vld [vmem:[%s13070_s3 + $0x320] ss:$8 sps:$4 sm:$0xff]   ;;  %v9000_v26 = vld [vmem:[%s13070_s3 + $0x334] ss:$8 sps:$4 sm:$0xff]  }
  0x1e   : > { %950 = vmatprep.subr.bf16.mxu0 %v8931_v32  ;;  %4937 = vperm.xlu1 %8918, %v324_v62   ;;  %v8998_v27 = vld [vmem:[%s13070_s3 + $0x330] ss:$8 sps:$4 sm:$0xff]   ;;  %v9003_v28 = vld [vmem:[%s13070_s3 + $0x64] ss:$8 sps:$4 sm:$0xff]   ;;  %v9001_v29 = vld [vmem:[%s13070_s3 + $0x60] ss:$8 sps:$4 sm:$0xff]  }
  0x1f   : > { %v9006_v30 = vld [vmem:[%s13070_s3 + $0x344] ss:$8 sps:$4 sm:$0xff]   ;;  %v9004_v31 = vld [vmem:[%s13070_s3 + $0x340] ss:$8 sps:$4 sm:$0xff]   ;;  %v9009_v32 = vld [vmem:[%s13070_s3 + $0x74] ss:$8 sps:$4 sm:$0xff]  }
  0x20   : > { %v9049_v61 = vld [vmem:[%s13070_s3 + $0xe0] ss:$8 sps:$4 sm:$0xff]  }
  0x21   : > { %951 = vmatpush1.bf16.msra.mxu0 %v8929_v33  ;;  %v9007_v33 = vld [vmem:[%s13070_s3 + $0x70] ss:$8 sps:$4 sm:$0xff]   ;;  %v9052_v63 = vld [vmem:[%s13070_s3 + $0x3c0] ss:$8 sps:$4 sm:$0xff]  }
  0x22   : > { %952 = vmatprep.subr.bf16.mxu0 %v8934_v34  ;;  %8919 = vset.pattern.permute.xlu1 %v10232_v0  ;;  %v9012_v34 = vld [vmem:[%s13070_s3 + $0x354] ss:$8 sps:$4 sm:$0xff]  }
  0x23   : > { %7142 = vperm.xlu1 %8919, %v324_v62   ;;  %v9057_v0 = vld [vmem:[%s13070_s3 + $0xf4] ss:$8 sps:$4 sm:$0xff]  }
  0x25   : > { %953 = vmatpush1.bf16.msra.mxu0 %v8932_v35  ;;  %v9010_v35 = vld [vmem:[%s13070_s3 + $0x350] ss:$8 sps:$4 sm:$0xff]  }
  0x26   : > { %954 = vmatprep.subr.bf16.mxu0 %v8937_v36  ;;  %v9015_v36 = vld [vmem:[%s13070_s3 + $0x84] ss:$8 sps:$4 sm:$0xff]  }
  0x27   : > { %8921 = vset.pattern.permute.xlu1 %v10233_v1  ;;  %v9055_v1 = vld [vmem:[%s13070_s3 + $0xf0] ss:$8 sps:$4 sm:$0xff]  }
  0x28   : > { %420 = vperm.xlu1 %8921, %v324_v62   ;;  %v9054_v62 = vld [vmem:[%s13070_s3 + $0x3c4] ss:$8 sps:$4 sm:$0xff]  }
  0x29   : > { %955 = vmatpush1.bf16.msra.mxu0 %v8935_v37  ;;  %v9013_v37 = vld [vmem:[%s13070_s3 + $0x80] ss:$8 sps:$4 sm:$0xff]  }
  0x2a   : > { %956 = vmatprep.subr.bf16.mxu0 %v8940_v38  ;;  %v9018_v38 = vld [vmem:[%s13070_s3 + $0x364] ss:$8 sps:$4 sm:$0xff]  }
  0x2d   : > { %957 = vmatpush1.bf16.msra.mxu0 %v8938_v39  ;;  %v9016_v39 = vld [vmem:[%s13070_s3 + $0x360] ss:$8 sps:$4 sm:$0xff]  }
  0x2e   : > { %958 = vmatprep.subr.bf16.mxu0 %v8943_v40  ;;  %v9021_v40 = vld [vmem:[%s13070_s3 + $0x94] ss:$8 sps:$4 sm:$0xff]  }
  0x31   : > { %959 = vmatpush1.bf16.msra.mxu0 %v8941_v41  ;;  %v9019_v41 = vld [vmem:[%s13070_s3 + $0x90] ss:$8 sps:$4 sm:$0xff]  }
  0x32   : > { %960 = vmatprep.subr.bf16.mxu0 %v8946_v42  ;;  %v9024_v42 = vld [vmem:[%s13070_s3 + $0x374] ss:$8 sps:$4 sm:$0xff]  }
  0x35   : > { %961 = vmatpush1.bf16.msra.mxu0 %v8944_v43  ;;  %v9022_v43 = vld [vmem:[%s13070_s3 + $0x370] ss:$8 sps:$4 sm:$0xff]  }
  0x36   : > { %962 = vmatprep.subr.bf16.mxu0 %v8949_v44  ;;  %v9027_v44 = vld [vmem:[%s13070_s3 + $0xa4] ss:$8 sps:$4 sm:$0xff]  }
  0x39   : > { %963 = vmatpush1.bf16.msra.mxu0 %v8947_v45  ;;  %v9025_v45 = vld [vmem:[%s13070_s3 + $0xa0] ss:$8 sps:$4 sm:$0xff]  }
  0x3a   : > { %964 = vmatprep.subr.bf16.mxu0 %v8952_v46  ;;  %v9030_v46 = vld [vmem:[%s13070_s3 + $0x384] ss:$8 sps:$4 sm:$0xff]  }
  0x3d   : > { %965 = vmatpush1.bf16.msra.mxu0 %v8950_v47  ;;  %v9028_v47 = vld [vmem:[%s13070_s3 + $0x380] ss:$8 sps:$4 sm:$0xff]  }
  0x3e   : > { %966 = vmatprep.subr.bf16.mxu0 %v8955_v48  ;;  %v9033_v48 = vld [vmem:[%s13070_s3 + $0xb4] ss:$8 sps:$4 sm:$0xff]  }
  0x41   : > { %967 = vmatpush1.bf16.msra.mxu0 %v8953_v49  ;;  %v9031_v49 = vld [vmem:[%s13070_s3 + $0xb0] ss:$8 sps:$4 sm:$0xff]  }
  0x42   : > { %968 = vmatprep.subr.bf16.mxu0 %v8958_v50  ;;  %v9036_v50 = vld [vmem:[%s13070_s3 + $0x394] ss:$8 sps:$4 sm:$0xff]  }
  0x45   : > { %969 = vmatpush1.bf16.msra.mxu0 %v8956_v51  ;;  %v9034_v51 = vld [vmem:[%s13070_s3 + $0x390] ss:$8 sps:$4 sm:$0xff]  }
  0x46   : > { %970 = vmatprep.subr.bf16.mxu0 %v8961_v52  ;;  %v9039_v52 = vld [vmem:[%s13070_s3 + $0xc4] ss:$8 sps:$4 sm:$0xff]  }
  0x49   : > { %971 = vmatpush1.bf16.msra.mxu0 %v8959_v53  ;;  %v9037_v53 = vld [vmem:[%s13070_s3 + $0xc0] ss:$8 sps:$4 sm:$0xff]  }
  0x4a   : > { %972 = vmatprep.subr.bf16.mxu0 %v8964_v54  ;;  %v9042_v54 = vld [vmem:[%s13070_s3 + $0x3a4] ss:$8 sps:$4 sm:$0xff]  }
  0x4d   : > { %973 = vmatpush1.bf16.msra.mxu0 %v8962_v55  ;;  %v9040_v55 = vld [vmem:[%s13070_s3 + $0x3a0] ss:$8 sps:$4 sm:$0xff]  }
  0x4e   : > { %974 = vmatprep.subr.bf16.mxu0 %v8970_v56  ;;  %v9045_v56 = vld [vmem:[%s13070_s3 + $0xd4] ss:$8 sps:$4 sm:$0xff]  }
  0x51   : > { %975 = vmatpush1.bf16.msra.mxu0 %v8968_v57  ;;  %v9043_v57 = vld [vmem:[%s13070_s3 + $0xd0] ss:$8 sps:$4 sm:$0xff]  }
  0x52   : > { %976 = vmatprep.subr.bf16.mxu0 %v8976_v58  ;;  %v9048_v58 = vld [vmem:[%s13070_s3 + $0x3b4] ss:$8 sps:$4 sm:$0xff]  }
  0x55   : > { %977 = vmatpush1.bf16.msra.mxu0 %v8974_v59  ;;  %v9046_v59 = vld [vmem:[%s13070_s3 + $0x3b0] ss:$8 sps:$4 sm:$0xff]  }
  0x56   : > { %1418 = vmatprep.subr.bf16.mxu0 %v8982_v60  ;;  %v9051_v60 = vld [vmem:[%s13070_s3 + $0xe4] ss:$8 sps:$4 sm:$0xff]  }
  0xeb   : > { %v412_v5 = vpop.f32.mrb[0].mxu0 }
  0xec   : > { %505 = vst [vmem:[#allocation2] sm:$0xf] %v412_v5  ;;  %v414_v7 = vpop.f32.mrb[1].mxu0 }
  0xed   : > { %506 = vst [vmem:[#allocation2 + $0x8] sm:$0xf] %v414_v7  ;;  %7237 = vmatprep.subr.msk.mxu1 %vm427_vm1, %v414_v7  ;;  %v9064_v7 = vld [vmem:[%s13070_s3 + $0x3e0] ss:$8 sps:$4 sm:$0xff]  }
  0xee   : > { %7238 = vmatpush1.msk.msra.mxu1 %vm427_vm1, %v412_v5  ;;  %v9066_v5 = vld [vmem:[%s13070_s3 + $0x3e4] ss:$8 sps:$4 sm:$0xff]  }
  0xef   : > { %7239 = vmatmul.mubr.msk.f32.vlgmr.msra.gmra.mrb[0].mxu1 %vm423_vm2, %v417_v3  ;;  %710 = vmatprep.subr.bf16.mxu1 %v8967_v2  ;;  %v9060_v2 = vld [vmem:[%s13070_s3 + $0x3d4] ss:$8 sps:$4 sm:$0xff]   ;;  %v9058_v3 = vld [vmem:[%s13070_s3 + $0x3d0] ss:$8 sps:$4 sm:$0xff]  }
  0xf0   : > { %711 = vmatpush1.bf16.msra.mxu1 %v8965_v4  ;;  %v9063_v4 = vld [vmem:[%s13070_s3 + $0x204] ss:$8 sps:$4 sm:$0xff]  }
  0xf1   : > { %712 = vmatprep.subr.bf16.mxu1 %v8973_v6  ;;  %v9061_v6 = vld [vmem:[%s13070_s3 + $0x200] ss:$8 sps:$4 sm:$0xff]  }
  0xf3   : > { %v513_v11 = vld [vmem:[#allocation2] sm:$0xff] }
  0xf4   : > { %v514_v12 = vld [vmem:[#allocation2 + $0x8] sm:$0xff]  ;;  %713 = vmatpush1.bf16.msra.mxu1 %v8971_v8  ;;  %v10481_v16 = vpack.c.bf16 %v513_v11, %v513_v11  ;;  %v9069_v8 = vld [vmem:[%s13070_s3 + $0x214] ss:$8 sps:$4 sm:$0xff]   ;;  %v9070_v11 = vld [vmem:[%s13070_s3 + $0x3f0] ss:$8 sps:$4 sm:$0xff]  }
  0xf5   : > { %v10473_v13 = vpack.c.bf16 %v514_v12, %v514_v12  ;;  %714 = vmatprep.subr.bf16.mxu1 %v8979_v9  ;;  %v9072_v9 = vld [vmem:[%s13070_s3 + $0x3f4] ss:$8 sps:$4 sm:$0xff]   ;;  %v9075_v12 = vld [vmem:[%s13070_s3 + $0x224] ss:$8 sps:$4 sm:$0xff]  }
  0xf7   : > { %742 = vmatprep.mubr.bf16.mxu1 %v10473_v13  ;;  %978 = vmatprep.mubr.bf16.mxu0 %v10473_v13 }
  0xf8   : > { %715 = vmatpush1.bf16.msra.mxu1 %v8977_v10  ;;  %979 = vmatmul.mubr.bf16.vlgmr.msra.gmra.mrb[4].mxu0 %v10481_v16  ;;  %v9067_v10 = vld [vmem:[%s13070_s3 + $0x210] ss:$8 sps:$4 sm:$0xff]  }
  0xf9   : > { %1419 = vmatpush1.bf16.msra.mxu0 %v8980_v14  ;;  %1450 = vmatprep.mubr.bf16.mxu0 %v10473_v13  ;;  %v9073_v14 = vld [vmem:[%s13070_s3 + $0x220] ss:$8 sps:$4 sm:$0xff]  }
  0xfa   : > { %716 = vmatprep.subr.bf16.mxu1 %v8985_v15  ;;  %1420 = vmatprep.subr.bf16.mxu0 %v8988_v17  ;;  %v9078_v15 = vld [vmem:[%s13070_s3 + $0x504] ss:$8 sps:$4 sm:$0xff]   ;;  %v9076_v17 = vld [vmem:[%s13070_s3 + $0x500] ss:$8 sps:$4 sm:$0xff]  }
  0xfc   : > { %717 = vmatpush1.bf16.msra.mxu1 %v8983_v18  ;;  %v9081_v18 = vld [vmem:[%s13070_s3 + $0x234] ss:$8 sps:$4 sm:$0xff]  }
  0xfd   : > { %1421 = vmatpush1.bf16.msra.mxu0 %v8986_v19  ;;  %718 = vmatprep.subr.bf16.mxu1 %v8991_v20  ;;  %v9084_v19 = vld [vmem:[%s13070_s3 + $0x514] ss:$8 sps:$4 sm:$0xff]   ;;  %v9079_v20 = vld [vmem:[%s13070_s3 + $0x230] ss:$8 sps:$4 sm:$0xff]  }
  0xfe   : > { %1422 = vmatprep.subr.bf16.mxu0 %v8994_v22  ;;  %v9087_v22 = vld [vmem:[%s13070_s3 + $0x244] ss:$8 sps:$4 sm:$0xff]  }
 0x100   : > { %719 = vmatpush1.bf16.msra.mxu1 %v8989_v21  ;;  %v9082_v21 = vld [vmem:[%s13070_s3 + $0x510] ss:$8 sps:$4 sm:$0xff]  }
 0x101   : > { %1423 = vmatpush1.bf16.msra.mxu0 %v8992_v23  ;;  %720 = vmatprep.subr.bf16.mxu1 %v8997_v24  ;;  %v9090_v23 = vld [vmem:[%s13070_s3 + $0x524] ss:$8 sps:$4 sm:$0xff]   ;;  %v9085_v24 = vld [vmem:[%s13070_s3 + $0x240] ss:$8 sps:$4 sm:$0xff]  }
 0x102   : > { %1424 = vmatprep.subr.bf16.mxu0 %v9000_v26  ;;  %v9093_v26 = vld [vmem:[%s13070_s3 + $0x254] ss:$8 sps:$4 sm:$0xff]  }
 0x104   : > { %721 = vmatpush1.bf16.msra.mxu1 %v8995_v25  ;;  %v9088_v25 = vld [vmem:[%s13070_s3 + $0x520] ss:$8 sps:$4 sm:$0xff]  }
 0x105   : > { %1425 = vmatpush1.bf16.msra.mxu0 %v8998_v27  ;;  %722 = vmatprep.subr.bf16.mxu1 %v9003_v28  ;;  %v9096_v27 = vld [vmem:[%s13070_s3 + $0x534] ss:$8 sps:$4 sm:$0xff]   ;;  %v9091_v28 = vld [vmem:[%s13070_s3 + $0x250] ss:$8 sps:$4 sm:$0xff]  }
 0x106   : > { %1426 = vmatprep.subr.bf16.mxu0 %v9006_v30  ;;  %v9099_v30 = vld [vmem:[%s13070_s3 + $0x264] ss:$8 sps:$4 sm:$0xff]  }
 0x108   : > { %723 = vmatpush1.bf16.msra.mxu1 %v9001_v29  ;;  %v9094_v29 = vld [vmem:[%s13070_s3 + $0x530] ss:$8 sps:$4 sm:$0xff]  }
 0x109   : > { %1427 = vmatpush1.bf16.msra.mxu0 %v9004_v31  ;;  %724 = vmatprep.subr.bf16.mxu1 %v9009_v32  ;;  %v9097_v31 = vld [vmem:[%s13070_s3 + $0x260] ss:$8 sps:$4 sm:$0xff]   ;;  %v9102_v32 = vld [vmem:[%s13070_s3 + $0x544] ss:$8 sps:$4 sm:$0xff]  }
 0x10a   : > { %1428 = vmatprep.subr.bf16.mxu0 %v9012_v34  ;;  %v9105_v34 = vld [vmem:[%s13070_s3 + $0x274] ss:$8 sps:$4 sm:$0xff]  }
 0x10c   : > { %725 = vmatpush1.bf16.msra.mxu1 %v9007_v33  ;;  %v9100_v33 = vld [vmem:[%s13070_s3 + $0x540] ss:$8 sps:$4 sm:$0xff]  }
 0x10d   : > { %1429 = vmatpush1.bf16.msra.mxu0 %v9010_v35  ;;  %726 = vmatprep.subr.bf16.mxu1 %v9015_v36  ;;  %v9108_v35 = vld [vmem:[%s13070_s3 + $0x554] ss:$8 sps:$4 sm:$0xff]   ;;  %v9103_v36 = vld [vmem:[%s13070_s3 + $0x270] ss:$8 sps:$4 sm:$0xff]  }
 0x10e   : > { %1430 = vmatprep.subr.bf16.mxu0 %v9018_v38  ;;  %v9111_v38 = vld [vmem:[%s13070_s3 + $0x284] ss:$8 sps:$4 sm:$0xff]  }
 0x110   : > { %727 = vmatpush1.bf16.msra.mxu1 %v9013_v37  ;;  %v9106_v37 = vld [vmem:[%s13070_s3 + $0x550] ss:$8 sps:$4 sm:$0xff]  }
 0x111   : > { %1431 = vmatpush1.bf16.msra.mxu0 %v9016_v39  ;;  %728 = vmatprep.subr.bf16.mxu1 %v9021_v40  ;;  %v9109_v39 = vld [vmem:[%s13070_s3 + $0x280] ss:$8 sps:$4 sm:$0xff]   ;;  %v9114_v40 = vld [vmem:[%s13070_s3 + $0x564] ss:$8 sps:$4 sm:$0xff]  }
 0x112   : > { %1432 = vmatprep.subr.bf16.mxu0 %v9024_v42  ;;  %v9117_v42 = vld [vmem:[%s13070_s3 + $0x294] ss:$8 sps:$4 sm:$0xff]  }
 0x114   : > { %729 = vmatpush1.bf16.msra.mxu1 %v9019_v41  ;;  %v9112_v41 = vld [vmem:[%s13070_s3 + $0x560] ss:$8 sps:$4 sm:$0xff]  }
 0x115   : > { %1433 = vmatpush1.bf16.msra.mxu0 %v9022_v43  ;;  %730 = vmatprep.subr.bf16.mxu1 %v9027_v44  ;;  %v9115_v43 = vld [vmem:[%s13070_s3 + $0x290] ss:$8 sps:$4 sm:$0xff]   ;;  %v9120_v44 = vld [vmem:[%s13070_s3 + $0x574] ss:$8 sps:$4 sm:$0xff]  }
 0x116   : > { %1434 = vmatprep.subr.bf16.mxu0 %v9030_v46  ;;  %v9123_v46 = vld [vmem:[%s13070_s3 + $0x2a4] ss:$8 sps:$4 sm:$0xff]  }
 0x118   : > { %731 = vmatpush1.bf16.msra.mxu1 %v9025_v45  ;;  %v9118_v45 = vld [vmem:[%s13070_s3 + $0x570] ss:$8 sps:$4 sm:$0xff]  }
 0x119   : > { %1435 = vmatpush1.bf16.msra.mxu0 %v9028_v47  ;;  %732 = vmatprep.subr.bf16.mxu1 %v9033_v48  ;;  %v9126_v47 = vld [vmem:[%s13070_s3 + $0x584] ss:$8 sps:$4 sm:$0xff]   ;;  %v9121_v48 = vld [vmem:[%s13070_s3 + $0x2a0] ss:$8 sps:$4 sm:$0xff]  }
 0x11a   : > { %1436 = vmatprep.subr.bf16.mxu0 %v9036_v50  ;;  %v9129_v50 = vld [vmem:[%s13070_s3 + $0x2b4] ss:$8 sps:$4 sm:$0xff]  }
 0x11c   : > { %733 = vmatpush1.bf16.msra.mxu1 %v9031_v49  ;;  %v9124_v49 = vld [vmem:[%s13070_s3 + $0x580] ss:$8 sps:$4 sm:$0xff]  }
 0x11d   : > { %1437 = vmatpush1.bf16.msra.mxu0 %v9034_v51  ;;  %734 = vmatprep.subr.bf16.mxu1 %v9039_v52  ;;  %v9132_v51 = vld [vmem:[%s13070_s3 + $0x594] ss:$8 sps:$4 sm:$0xff]   ;;  %v9127_v52 = vld [vmem:[%s13070_s3 + $0x2b0] ss:$8 sps:$4 sm:$0xff]  }
 0x11e   : > { %1438 = vmatprep.subr.bf16.mxu0 %v9042_v54  ;;  %v9135_v54 = vld [vmem:[%s13070_s3 + $0x2c4] ss:$8 sps:$4 sm:$0xff]  }
 0x120   : > { %735 = vmatpush1.bf16.msra.mxu1 %v9037_v53  ;;  %v9130_v53 = vld [vmem:[%s13070_s3 + $0x590] ss:$8 sps:$4 sm:$0xff]  }
 0x121   : > { %1439 = vmatpush1.bf16.msra.mxu0 %v9040_v55  ;;  %736 = vmatprep.subr.bf16.mxu1 %v9045_v56  ;;  %v9138_v55 = vld [vmem:[%s13070_s3 + $0x5a4] ss:$8 sps:$4 sm:$0xff]   ;;  %v9133_v56 = vld [vmem:[%s13070_s3 + $0x2c0] ss:$8 sps:$4 sm:$0xff]  }
 0x122   : > { %1440 = vmatprep.subr.bf16.mxu0 %v9048_v58  ;;  %v9141_v58 = vld [vmem:[%s13070_s3 + $0x2d4] ss:$8 sps:$4 sm:$0xff]  }
 0x124   : > { %737 = vmatpush1.bf16.msra.mxu1 %v9043_v57  ;;  %v9136_v57 = vld [vmem:[%s13070_s3 + $0x5a0] ss:$8 sps:$4 sm:$0xff]  }
 0x125   : > { %1441 = vmatpush1.bf16.msra.mxu0 %v9046_v59  ;;  %738 = vmatprep.subr.bf16.mxu1 %v9051_v60  ;;  %v9144_v59 = vld [vmem:[%s13070_s3 + $0x5b4] ss:$8 sps:$4 sm:$0xff]   ;;  %v9139_v60 = vld [vmem:[%s13070_s3 + $0x2d0] ss:$8 sps:$4 sm:$0xff]  }
 0x126   : > { %1442 = vmatprep.subr.bf16.mxu0 %v9054_v62  ;;  %v9147_v62 = vld [vmem:[%s13070_s3 + $0x2e4] ss:$8 sps:$4 sm:$0xff]  }
 0x128   : > { %739 = vmatpush1.bf16.msra.mxu1 %v9049_v61  ;;  %v9142_v61 = vld [vmem:[%s13070_s3 + $0x5b0] ss:$8 sps:$4 sm:$0xff]  }
 0x129   : > { %1443 = vmatpush1.bf16.msra.mxu0 %v9052_v63  ;;  %740 = vmatprep.subr.bf16.mxu1 %v9057_v0  ;;  %v9150_v63 = vld [vmem:[%s13070_s3 + $0x5c4] ss:$8 sps:$4 sm:$0xff]   ;;  %v9145_v0 = vld [vmem:[%s13070_s3 + $0x2e0] ss:$8 sps:$4 sm:$0xff]  }
 0x12a   : > { %1444 = vmatprep.subr.bf16.mxu0 %v9060_v2  ;;  %v9153_v2 = vld [vmem:[%s13070_s3 + $0x2f4] ss:$8 sps:$4 sm:$0xff]  }
 0x12c   : > { %741 = vmatpush1.bf16.msra.mxu1 %v9055_v1  ;;  %v9148_v1 = vld [vmem:[%s13070_s3 + $0x5c0] ss:$8 sps:$4 sm:$0xff]  }
 0x12d   : > { %1445 = vmatpush1.bf16.msra.mxu0 %v9058_v3  ;;  %1182 = vmatprep.subr.bf16.mxu1 %v9063_v4  ;;  %v9156_v3 = vld [vmem:[%s13070_s3 + $0x5d4] ss:$8 sps:$4 sm:$0xff]   ;;  %v9151_v4 = vld [vmem:[%s13070_s3 + $0x2f0] ss:$8 sps:$4 sm:$0xff]  }
 0x12e   : > { %1446 = vmatprep.subr.bf16.mxu0 %v9066_v5  ;;  %v9154_v5 = vld [vmem:[%s13070_s3 + $0x5d0] ss:$8 sps:$4 sm:$0xff]  }
 0x12f   : > { %743 = vmatmul.mubr.bf16.vlgmr.msra.gmra.mrb[4].mxu1 %v10481_v16 }
 0x130   : > { %1183 = vmatpush1.bf16.msra.mxu1 %v9061_v6  ;;  %1214 = vmatprep.mubr.bf16.mxu1 %v10473_v13  ;;  %v9159_v6 = vld [vmem:[%s13070_s3 + $0x404] ss:$8 sps:$4 sm:$0xff]  }
 0x131   : > { %1447 = vmatpush1.bf16.msra.mxu0 %v9064_v7  ;;  %1184 = vmatprep.subr.bf16.mxu1 %v9069_v8  ;;  %v9162_v7 = vld [vmem:[%s13070_s3 + $0x5e4] ss:$8 sps:$4 sm:$0xff]   ;;  %v9157_v8 = vld [vmem:[%s13070_s3 + $0x400] ss:$8 sps:$4 sm:$0xff]  }
 0x132   : > { %1448 = vmatprep.subr.bf16.mxu0 %v9072_v9  ;;  %v9160_v9 = vld [vmem:[%s13070_s3 + $0x5e0] ss:$8 sps:$4 sm:$0xff]  }
 0x134   : > { %1185 = vmatpush1.bf16.msra.mxu1 %v9067_v10  ;;  %v9165_v10 = vld [vmem:[%s13070_s3 + $0x414] ss:$8 sps:$4 sm:$0xff]  }
 0x135   : > { %1449 = vmatpush1.bf16.msra.mxu0 %v9070_v11  ;;  %1186 = vmatprep.subr.bf16.mxu1 %v9075_v12  ;;  %v9163_v11 = vld [vmem:[%s13070_s3 + $0x410] ss:$8 sps:$4 sm:$0xff]   ;;  %v9168_v12 = vld [vmem:[%s13070_s3 + $0x5f4] ss:$8 sps:$4 sm:$0xff]  }
 0x136   : > { %1890 = vmatprep.subr.bf16.mxu0 %v9078_v15  ;;  %v9171_v15 = vld [vmem:[%s13070_s3 + $0x424] ss:$8 sps:$4 sm:$0xff]  }
 0x138   : > { %1451 = vmatmul.mubr.bf16.vlgmr.msra.gmra.mrb[8].mxu0 %v10481_v16  ;;  %1187 = vmatpush1.bf16.msra.mxu1 %v9073_v14  ;;  %v9166_v14 = vld [vmem:[%s13070_s3 + $0x5f0] ss:$8 sps:$4 sm:$0xff]  }
 0x139   : > { %1891 = vmatpush1.bf16.msra.mxu0 %v9076_v17  ;;  %1922 = vmatprep.mubr.bf16.mxu0 %v10473_v13  ;;  %v9174_v17 = vld [vmem:[%s13070_s3 + $0x704] ss:$8 sps:$4 sm:$0xff]  }
 0x13a   : > { %1188 = vmatprep.subr.bf16.mxu1 %v9081_v18  ;;  %1892 = vmatprep.subr.bf16.mxu0 %v9084_v19  ;;  %v9169_v18 = vld [vmem:[%s13070_s3 + $0x420] ss:$8 sps:$4 sm:$0xff]  }
 0x13b   : > { %v9172_v19 = vld [vmem:[%s13070_s3 + $0x700] ss:$8 sps:$4 sm:$0xff]  }
 0x13c   : > { %1189 = vmatpush1.bf16.msra.mxu1 %v9079_v20  ;;  %v9177_v20 = vld [vmem:[%s13070_s3 + $0x434] ss:$8 sps:$4 sm:$0xff]  }
 0x13d   : > { %1893 = vmatpush1.bf16.msra.mxu0 %v9082_v21  ;;  %1190 = vmatprep.subr.bf16.mxu1 %v9087_v22  ;;  %v9180_v21 = vld [vmem:[%s13070_s3 + $0x714] ss:$8 sps:$4 sm:$0xff]   ;;  %v9175_v22 = vld [vmem:[%s13070_s3 + $0x430] ss:$8 sps:$4 sm:$0xff]  }
 0x13e   : > { %1894 = vmatprep.subr.bf16.mxu0 %v9090_v23  ;;  %v9178_v23 = vld [vmem:[%s13070_s3 + $0x710] ss:$8 sps:$4 sm:$0xff]  }
 0x140   : > { %1191 = vmatpush1.bf16.msra.mxu1 %v9085_v24  ;;  %v9183_v24 = vld [vmem:[%s13070_s3 + $0x444] ss:$8 sps:$4 sm:$0xff]  }
 0x141   : > { %1895 = vmatpush1.bf16.msra.mxu0 %v9088_v25  ;;  %1192 = vmatprep.subr.bf16.mxu1 %v9093_v26  ;;  %v9186_v25 = vld [vmem:[%s13070_s3 + $0x724] ss:$8 sps:$4 sm:$0xff]   ;;  %v9181_v26 = vld [vmem:[%s13070_s3 + $0x440] ss:$8 sps:$4 sm:$0xff]  }
 0x142   : > { %1896 = vmatprep.subr.bf16.mxu0 %v9096_v27  ;;  %v9184_v27 = vld [vmem:[%s13070_s3 + $0x720] ss:$8 sps:$4 sm:$0xff]  }
 0x144   : > { %1193 = vmatpush1.bf16.msra.mxu1 %v9091_v28  ;;  %v9189_v28 = vld [vmem:[%s13070_s3 + $0x454] ss:$8 sps:$4 sm:$0xff]  }
 0x145   : > { %1897 = vmatpush1.bf16.msra.mxu0 %v9094_v29  ;;  %1194 = vmatprep.subr.bf16.mxu1 %v9099_v30  ;;  %v9192_v29 = vld [vmem:[%s13070_s3 + $0x734] ss:$8 sps:$4 sm:$0xff]   ;;  %v9187_v30 = vld [vmem:[%s13070_s3 + $0x450] ss:$8 sps:$4 sm:$0xff]  }
 0x146   : > { %1898 = vmatprep.subr.bf16.mxu0 %v9102_v32  ;;  %v9195_v32 = vld [vmem:[%s13070_s3 + $0x464] ss:$8 sps:$4 sm:$0xff]  }
 0x148   : > { %1195 = vmatpush1.bf16.msra.mxu1 %v9097_v31  ;;  %v9190_v31 = vld [vmem:[%s13070_s3 + $0x730] ss:$8 sps:$4 sm:$0xff]  }
 0x149   : > { %1899 = vmatpush1.bf16.msra.mxu0 %v9100_v33  ;;  %1196 = vmatprep.subr.bf16.mxu1 %v9105_v34  ;;  %v9193_v33 = vld [vmem:[%s13070_s3 + $0x460] ss:$8 sps:$4 sm:$0xff]   ;;  %v9198_v34 = vld [vmem:[%s13070_s3 + $0x744] ss:$8 sps:$4 sm:$0xff]  }
 0x14a   : > { %1900 = vmatprep.subr.bf16.mxu0 %v9108_v35  ;;  %v9196_v35 = vld [vmem:[%s13070_s3 + $0x740] ss:$8 sps:$4 sm:$0xff]  }
 0x14c   : > { %1197 = vmatpush1.bf16.msra.mxu1 %v9103_v36  ;;  %v9201_v36 = vld [vmem:[%s13070_s3 + $0x474] ss:$8 sps:$4 sm:$0xff]  }
 0x14d   : > { %1901 = vmatpush1.bf16.msra.mxu0 %v9106_v37  ;;  %1198 = vmatprep.subr.bf16.mxu1 %v9111_v38  ;;  %v9204_v37 = vld [vmem:[%s13070_s3 + $0x754] ss:$8 sps:$4 sm:$0xff]   ;;  %v9199_v38 = vld [vmem:[%s13070_s3 + $0x470] ss:$8 sps:$4 sm:$0xff]  }
 0x14e   : > { %1902 = vmatprep.subr.bf16.mxu0 %v9114_v40  ;;  %v9207_v40 = vld [vmem:[%s13070_s3 + $0x484] ss:$8 sps:$4 sm:$0xff]  }
 0x150   : > { %1199 = vmatpush1.bf16.msra.mxu1 %v9109_v39  ;;  %v9202_v39 = vld [vmem:[%s13070_s3 + $0x750] ss:$8 sps:$4 sm:$0xff]  }
 0x151   : > { %1903 = vmatpush1.bf16.msra.mxu0 %v9112_v41  ;;  %1200 = vmatprep.subr.bf16.mxu1 %v9117_v42  ;;  %v9210_v41 = vld [vmem:[%s13070_s3 + $0x764] ss:$8 sps:$4 sm:$0xff]   ;;  %v9205_v42 = vld [vmem:[%s13070_s3 + $0x480] ss:$8 sps:$4 sm:$0xff]  }
 0x152   : > { %1904 = vmatprep.subr.bf16.mxu0 %v9120_v44  ;;  %v9213_v44 = vld [vmem:[%s13070_s3 + $0x494] ss:$8 sps:$4 sm:$0xff]  }
 0x154   : > { %1201 = vmatpush1.bf16.msra.mxu1 %v9115_v43  ;;  %v9208_v43 = vld [vmem:[%s13070_s3 + $0x760] ss:$8 sps:$4 sm:$0xff]  }
 0x155   : > { %1905 = vmatpush1.bf16.msra.mxu0 %v9118_v45  ;;  %1202 = vmatprep.subr.bf16.mxu1 %v9123_v46  ;;  %v9216_v45 = vld [vmem:[%s13070_s3 + $0x774] ss:$8 sps:$4 sm:$0xff]   ;;  %v9211_v46 = vld [vmem:[%s13070_s3 + $0x490] ss:$8 sps:$4 sm:$0xff]  }
 0x156   : > { %1906 = vmatprep.subr.bf16.mxu0 %v9126_v47  ;;  %v9214_v47 = vld [vmem:[%s13070_s3 + $0x770] ss:$8 sps:$4 sm:$0xff]  }
 0x158   : > { %1203 = vmatpush1.bf16.msra.mxu1 %v9121_v48  ;;  %v9219_v48 = vld [vmem:[%s13070_s3 + $0x4a4] ss:$8 sps:$4 sm:$0xff]  }
 0x159   : > { %1907 = vmatpush1.bf16.msra.mxu0 %v9124_v49  ;;  %1204 = vmatprep.subr.bf16.mxu1 %v9129_v50  ;;  %v9222_v49 = vld [vmem:[%s13070_s3 + $0x784] ss:$8 sps:$4 sm:$0xff]   ;;  %v9217_v50 = vld [vmem:[%s13070_s3 + $0x4a0] ss:$8 sps:$4 sm:$0xff]  }
 0x15a   : > { %1908 = vmatprep.subr.bf16.mxu0 %v9132_v51  ;;  %v9220_v51 = vld [vmem:[%s13070_s3 + $0x780] ss:$8 sps:$4 sm:$0xff]  }
 0x15c   : > { %1205 = vmatpush1.bf16.msra.mxu1 %v9127_v52  ;;  %v9225_v52 = vld [vmem:[%s13070_s3 + $0x4b4] ss:$8 sps:$4 sm:$0xff]  }
 0x15d   : > { %1909 = vmatpush1.bf16.msra.mxu0 %v9130_v53  ;;  %1206 = vmatprep.subr.bf16.mxu1 %v9135_v54  ;;  %v9228_v53 = vld [vmem:[%s13070_s3 + $0x794] ss:$8 sps:$4 sm:$0xff]   ;;  %v9223_v54 = vld [vmem:[%s13070_s3 + $0x4b0] ss:$8 sps:$4 sm:$0xff]  }
 0x15e   : > { %1910 = vmatprep.subr.bf16.mxu0 %v9138_v55  ;;  %v9226_v55 = vld [vmem:[%s13070_s3 + $0x790] ss:$8 sps:$4 sm:$0xff]  }
 0x160   : > { %1207 = vmatpush1.bf16.msra.mxu1 %v9133_v56  ;;  %v9231_v56 = vld [vmem:[%s13070_s3 + $0x4c4] ss:$8 sps:$4 sm:$0xff]  }
 0x161   : > { %1911 = vmatpush1.bf16.msra.mxu0 %v9136_v57  ;;  %1208 = vmatprep.subr.bf16.mxu1 %v9141_v58  ;;  %v9234_v57 = vld [vmem:[%s13070_s3 + $0x7a4] ss:$8 sps:$4 sm:$0xff]   ;;  %v9229_v58 = vld [vmem:[%s13070_s3 + $0x4c0] ss:$8 sps:$4 sm:$0xff]  }
 0x162   : > { %1912 = vmatprep.subr.bf16.mxu0 %v9144_v59  ;;  %v9232_v59 = vld [vmem:[%s13070_s3 + $0x7a0] ss:$8 sps:$4 sm:$0xff]  }
 0x164   : > { %1209 = vmatpush1.bf16.msra.mxu1 %v9139_v60  ;;  %v9237_v60 = vld [vmem:[%s13070_s3 + $0x4d4] ss:$8 sps:$4 sm:$0xff]  }
 0x165   : > { %1913 = vmatpush1.bf16.msra.mxu0 %v9142_v61  ;;  %1210 = vmatprep.subr.bf16.mxu1 %v9147_v62  ;;  %v9240_v61 = vld [vmem:[%s13070_s3 + $0x7b4] ss:$8 sps:$4 sm:$0xff]   ;;  %v9235_v62 = vld [vmem:[%s13070_s3 + $0x4d0] ss:$8 sps:$4 sm:$0xff]  }
 0x166   : > { %1914 = vmatprep.subr.bf16.mxu0 %v9150_v63  ;;  %v9238_v63 = vld [vmem:[%s13070_s3 + $0x7b0] ss:$8 sps:$4 sm:$0xff]  }
 0x168   : > { %1211 = vmatpush1.bf16.msra.mxu1 %v9145_v0  ;;  %v9243_v0 = vld [vmem:[%s13070_s3 + $0x4e4] ss:$8 sps:$4 sm:$0xff]  }
 0x169   : > { %1915 = vmatpush1.bf16.msra.mxu0 %v9148_v1  ;;  %1212 = vmatprep.subr.bf16.mxu1 %v9153_v2  ;;  %v9246_v1 = vld [vmem:[%s13070_s3 + $0x7c4] ss:$8 sps:$4 sm:$0xff]   ;;  %v9241_v2 = vld [vmem:[%s13070_s3 + $0x4e0] ss:$8 sps:$4 sm:$0xff]  }
 0x16a   : > { %1916 = vmatprep.subr.bf16.mxu0 %v9156_v3  ;;  %v9244_v3 = vld [vmem:[%s13070_s3 + $0x7c0] ss:$8 sps:$4 sm:$0xff]  }
 0x16c   : > { %1213 = vmatpush1.bf16.msra.mxu1 %v9151_v4  ;;  %v9249_v4 = vld [vmem:[%s13070_s3 + $0x4f4] ss:$8 sps:$4 sm:$0xff]  }
 0x16d   : > { %1917 = vmatpush1.bf16.msra.mxu0 %v9154_v5  ;;  %1654 = vmatprep.subr.bf16.mxu1 %v9159_v6  ;;  %v9252_v5 = vld [vmem:[%s13070_s3 + $0x7d4] ss:$8 sps:$4 sm:$0xff]   ;;  %v9247_v6 = vld [vmem:[%s13070_s3 + $0x4f0] ss:$8 sps:$4 sm:$0xff]  }
 0x16e   : > { %1918 = vmatprep.subr.bf16.mxu0 %v9162_v7  ;;  %v9250_v7 = vld [vmem:[%s13070_s3 + $0x7d0] ss:$8 sps:$4 sm:$0xff]  }
 0x16f   : > { %1215 = vmatmul.mubr.bf16.vlgmr.msra.gmra.mrb[8].mxu1 %v10481_v16 }
 0x170   : > { %1655 = vmatpush1.bf16.msra.mxu1 %v9157_v8  ;;  %1686 = vmatprep.mubr.bf16.mxu1 %v10473_v13  ;;  %v9255_v8 = vld [vmem:[%s13070_s3 + $0x604] ss:$8 sps:$4 sm:$0xff]  }
 0x171   : > { %1919 = vmatpush1.bf16.msra.mxu0 %v9160_v9  ;;  %1656 = vmatprep.subr.bf16.mxu1 %v9165_v10  ;;  %v9258_v9 = vld [vmem:[%s13070_s3 + $0x7e4] ss:$8 sps:$4 sm:$0xff]   ;;  %v9253_v10 = vld [vmem:[%s13070_s3 + $0x600] ss:$8 sps:$4 sm:$0xff]  }
 0x172   : > { %1920 = vmatprep.subr.bf16.mxu0 %v9168_v12  ;;  %v9261_v12 = vld [vmem:[%s13070_s3 + $0x614] ss:$8 sps:$4 sm:$0xff]  }
 0x174   : > { %1657 = vmatpush1.bf16.msra.mxu1 %v9163_v11  ;;  %v9256_v11 = vld [vmem:[%s13070_s3 + $0x7e0] ss:$8 sps:$4 sm:$0xff]  }
 0x175   : > { %1921 = vmatpush1.bf16.msra.mxu0 %v9166_v14  ;;  %1658 = vmatprep.subr.bf16.mxu1 %v9171_v15  ;;  %v9264_v14 = vld [vmem:[%s13070_s3 + $0x7f4] ss:$8 sps:$4 sm:$0xff]   ;;  %v9259_v15 = vld [vmem:[%s13070_s3 + $0x610] ss:$8 sps:$4 sm:$0xff]  }
 0x176   : > { %2362 = vmatprep.subr.bf16.mxu0 %v9174_v17  ;;  %v9262_v17 = vld [vmem:[%s13070_s3 + $0x7f0] ss:$8 sps:$4 sm:$0xff]  }
 0x178   : > { %1923 = vmatmul.mubr.bf16.vlgmr.msra.gmra.mrb[12].mxu0 %v10481_v16  ;;  %1659 = vmatpush1.bf16.msra.mxu1 %v9169_v18  ;;  %v9267_v18 = vld [vmem:[%s13070_s3 + $0x624] ss:$8 sps:$4 sm:$0xff]  }
 0x179   : > { %2363 = vmatpush1.bf16.msra.mxu0 %v9172_v19  ;;  %2394 = vmatprep.mubr.bf16.mxu0 %v10473_v13  ;;  %v9265_v19 = vld [vmem:[%s13070_s3 + $0x620] ss:$8 sps:$4 sm:$0xff]  }
 0x17a   : > { %1660 = vmatprep.subr.bf16.mxu1 %v9177_v20  ;;  %2364 = vmatprep.subr.bf16.mxu0 %v9180_v21  ;;  %v9270_v20 = vld [vmem:[%s13070_s3 + $0x634] ss:$8 sps:$4 sm:$0xff]   ;;  %v9268_v21 = vld [vmem:[%s13070_s3 + $0x630] ss:$8 sps:$4 sm:$0xff]  }
 0x17c   : > { %1661 = vmatpush1.bf16.msra.mxu1 %v9175_v22  ;;  %v9273_v22 = vld [vmem:[%s13070_s3 + $0x644] ss:$8 sps:$4 sm:$0xff]  }
 0x17d   : > { %2365 = vmatpush1.bf16.msra.mxu0 %v9178_v23  ;;  %1662 = vmatprep.subr.bf16.mxu1 %v9183_v24  ;;  %v9271_v23 = vld [vmem:[%s13070_s3 + $0x640] ss:$8 sps:$4 sm:$0xff]   ;;  %v9276_v24 = vld [vmem:[%s13070_s3 + $0x654] ss:$8 sps:$4 sm:$0xff]  }
 0x17e   : > { %2366 = vmatprep.subr.bf16.mxu0 %v9186_v25  ;;  %v9274_v25 = vld [vmem:[%s13070_s3 + $0x650] ss:$8 sps:$4 sm:$0xff]  }
 0x180   : > { %1663 = vmatpush1.bf16.msra.mxu1 %v9181_v26  ;;  %v9279_v26 = vld [vmem:[%s13070_s3 + $0x664] ss:$8 sps:$4 sm:$0xff]  }
 0x181   : > { %2367 = vmatpush1.bf16.msra.mxu0 %v9184_v27  ;;  %1664 = vmatprep.subr.bf16.mxu1 %v9189_v28 }
 0x182   : > { %2368 = vmatprep.subr.bf16.mxu0 %v9192_v29  ;;  %v9277_v29 = vld [vmem:[%s13070_s3 + $0x660] ss:$8 sps:$4 sm:$0xff]  }
 0x184   : > { %1665 = vmatpush1.bf16.msra.mxu1 %v9187_v30  ;;  %v9282_v30 = vld [vmem:[%s13070_s3 + $0x674] ss:$8 sps:$4 sm:$0xff]  }
 0x185   : > { %2369 = vmatpush1.bf16.msra.mxu0 %v9190_v31  ;;  %1666 = vmatprep.subr.bf16.mxu1 %v9195_v32  ;;  %v9280_v31 = vld [vmem:[%s13070_s3 + $0x670] ss:$8 sps:$4 sm:$0xff]   ;;  %v9285_v32 = vld [vmem:[%s13070_s3 + $0x684] ss:$8 sps:$4 sm:$0xff]  }
 0x186   : > { %2370 = vmatprep.subr.bf16.mxu0 %v9198_v34 }
 0x188   : > { %1667 = vmatpush1.bf16.msra.mxu1 %v9193_v33 }
 0x189   : > { %2371 = vmatpush1.bf16.msra.mxu0 %v9196_v35  ;;  %1668 = vmatprep.subr.bf16.mxu1 %v9201_v36  ;;  %v9283_v35 = vld [vmem:[%s13070_s3 + $0x680] ss:$8 sps:$4 sm:$0xff]  }
 0x18a   : > { %2372 = vmatprep.subr.bf16.mxu0 %v9204_v37  ;;  %v9288_v37 = vld [vmem:[%s13070_s3 + $0x694] ss:$8 sps:$4 sm:$0xff]  }
 0x18c   : > { %1669 = vmatpush1.bf16.msra.mxu1 %v9199_v38 }
 0x18d   : > { %2373 = vmatpush1.bf16.msra.mxu0 %v9202_v39  ;;  %1670 = vmatprep.subr.bf16.mxu1 %v9207_v40  ;;  %v9286_v39 = vld [vmem:[%s13070_s3 + $0x690] ss:$8 sps:$4 sm:$0xff]   ;;  %v9291_v40 = vld [vmem:[%s13070_s3 + $0x6a4] ss:$8 sps:$4 sm:$0xff]  }
 0x18e   : > { %2374 = vmatprep.subr.bf16.mxu0 %v9210_v41  ;;  %v9289_v41 = vld [vmem:[%s13070_s3 + $0x6a0] ss:$8 sps:$4 sm:$0xff]  }
 0x190   : > { %1671 = vmatpush1.bf16.msra.mxu1 %v9205_v42  ;;  %v9294_v42 = vld [vmem:[%s13070_s3 + $0x6b4] ss:$8 sps:$4 sm:$0xff]  }
 0x191   : > { %2375 = vmatpush1.bf16.msra.mxu0 %v9208_v43  ;;  %1672 = vmatprep.subr.bf16.mxu1 %v9213_v44  ;;  %v9292_v43 = vld [vmem:[%s13070_s3 + $0x6b0] ss:$8 sps:$4 sm:$0xff]   ;;  %v9297_v44 = vld [vmem:[%s13070_s3 + $0x6c4] ss:$8 sps:$4 sm:$0xff]  }
 0x192   : > { %2376 = vmatprep.subr.bf16.mxu0 %v9216_v45  ;;  %v9295_v45 = vld [vmem:[%s13070_s3 + $0x6c0] ss:$8 sps:$4 sm:$0xff]  }
 0x194   : > { %1673 = vmatpush1.bf16.msra.mxu1 %v9211_v46  ;;  %v9300_v46 = vld [vmem:[%s13070_s3 + $0x6d4] ss:$8 sps:$4 sm:$0xff]  }
 0x195   : > { %2377 = vmatpush1.bf16.msra.mxu0 %v9214_v47  ;;  %1674 = vmatprep.subr.bf16.mxu1 %v9219_v48  ;;  %v9298_v47 = vld [vmem:[%s13070_s3 + $0x6d0] ss:$8 sps:$4 sm:$0xff]   ;;  %v9303_v48 = vld [vmem:[%s13070_s3 + $0x6e4] ss:$8 sps:$4 sm:$0xff]  }
 0x196   : > { %2378 = vmatprep.subr.bf16.mxu0 %v9222_v49  ;;  %v9301_v49 = vld [vmem:[%s13070_s3 + $0x6e0] ss:$8 sps:$4 sm:$0xff]  }
 0x198   : > { %1675 = vmatpush1.bf16.msra.mxu1 %v9217_v50  ;;  %v9306_v50 = vld [vmem:[%s13070_s3 + $0x6f4] ss:$8 sps:$4 sm:$0xff]  }
 0x199   : > { %2379 = vmatpush1.bf16.msra.mxu0 %v9220_v51  ;;  %1676 = vmatprep.subr.bf16.mxu1 %v9225_v52  ;;  %v9304_v51 = vld [vmem:[%s13070_s3 + $0x6f0] ss:$8 sps:$4 sm:$0xff]   ;;  %v9309_v52 = vld [vmem:[%s13070_s3 + $0x804] ss:$8 sps:$4 sm:$0xff]  }
 0x19a   : > { %2380 = vmatprep.subr.bf16.mxu0 %v9228_v53  ;;  %v9307_v53 = vld [vmem:[%s13070_s3 + $0x800] ss:$8 sps:$4 sm:$0xff]  }
 0x19c   : > { %1677 = vmatpush1.bf16.msra.mxu1 %v9223_v54  ;;  %v9312_v54 = vld [vmem:[%s13070_s3 + $0x814] ss:$8 sps:$4 sm:$0xff]  }
 0x19d   : > { %2381 = vmatpush1.bf16.msra.mxu0 %v9226_v55  ;;  %1678 = vmatprep.subr.bf16.mxu1 %v9231_v56  ;;  %v9310_v55 = vld [vmem:[%s13070_s3 + $0x810] ss:$8 sps:$4 sm:$0xff]   ;;  %v9315_v56 = vld [vmem:[%s13070_s3 + $0x824] ss:$8 sps:$4 sm:$0xff]  }
 0x19e   : > { %2382 = vmatprep.subr.bf16.mxu0 %v9234_v57  ;;  %v9313_v57 = vld [vmem:[%s13070_s3 + $0x820] ss:$8 sps:$4 sm:$0xff]  }
 0x1a0   : > { %1679 = vmatpush1.bf16.msra.mxu1 %v9229_v58  ;;  %v9318_v58 = vld [vmem:[%s13070_s3 + $0x834] ss:$8 sps:$4 sm:$0xff]  }
 0x1a1   : > { %2383 = vmatpush1.bf16.msra.mxu0 %v9232_v59  ;;  %1680 = vmatprep.subr.bf16.mxu1 %v9237_v60  ;;  %v9321_v59 = vld [vmem:[%s13070_s3 + $0x844] ss:$8 sps:$4 sm:$0xff]   ;;  %v9319_v60 = vld [vmem:[%s13070_s3 + $0x840] ss:$8 sps:$4 sm:$0xff]  }
 0x1a2   : > { %2384 = vmatprep.subr.bf16.mxu0 %v9240_v61  ;;  %v9324_v61 = vld [vmem:[%s13070_s3 + $0x854] ss:$8 sps:$4 sm:$0xff]  }
 0x1a4   : > { %1681 = vmatpush1.bf16.msra.mxu1 %v9235_v62  ;;  %v9322_v62 = vld [vmem:[%s13070_s3 + $0x850] ss:$8 sps:$4 sm:$0xff]  }
 0x1a5   : > { %2385 = vmatpush1.bf16.msra.mxu0 %v9238_v63  ;;  %1682 = vmatprep.subr.bf16.mxu1 %v9243_v0  ;;  %v9327_v63 = vld [vmem:[%s13070_s3 + $0x864] ss:$8 sps:$4 sm:$0xff]  }
 0x1a6   : > { %2386 = vmatprep.subr.bf16.mxu0 %v9246_v1 }
 0x1a8   : > { %1683 = vmatpush1.bf16.msra.mxu1 %v9241_v2 }
 0x1a9   : > { %2387 = vmatpush1.bf16.msra.mxu0 %v9244_v3  ;;  %1684 = vmatprep.subr.bf16.mxu1 %v9249_v4 }
 0x1aa   : > { %2388 = vmatprep.subr.bf16.mxu0 %v9252_v5  ;;  %v9325_v5 = vld [vmem:[%s13070_s3 + $0x860] ss:$8 sps:$4 sm:$0xff]  }
 0x1ac   : > { %1685 = vmatpush1.bf16.msra.mxu1 %v9247_v6 }
 0x1ad   : > { %2389 = vmatpush1.bf16.msra.mxu0 %v9250_v7  ;;  %2126 = vmatprep.subr.bf16.mxu1 %v9255_v8  ;;  %v9330_v7 = vld [vmem:[%s13070_s3 + $0x874] ss:$8 sps:$4 sm:$0xff]   ;;  %v9328_v8 = vld [vmem:[%s13070_s3 + $0x870] ss:$8 sps:$4 sm:$0xff]  }
 0x1ae   : > { %2390 = vmatprep.subr.bf16.mxu0 %v9258_v9  ;;  %v9333_v9 = vld [vmem:[%s13070_s3 + $0x884] ss:$8 sps:$4 sm:$0xff]  }
 0x1af   : > { %1687 = vmatmul.mubr.bf16.vlgmr.msra.gmra.mrb[12].mxu1 %v10481_v16 }
 0x1b0   : > { %2127 = vmatpush1.bf16.msra.mxu1 %v9253_v10  ;;  %2158 = vmatprep.mubr.bf16.mxu1 %v10473_v13 }
 0x1b1   : > { %2391 = vmatpush1.bf16.msra.mxu0 %v9256_v11  ;;  %2128 = vmatprep.subr.bf16.mxu1 %v9261_v12  ;;  %v9331_v12 = vld [vmem:[%s13070_s3 + $0x880] ss:$8 sps:$4 sm:$0xff]  }
 0x1b2   : > { %2392 = vmatprep.subr.bf16.mxu0 %v9264_v14 }
 0x1b4   : > { %2129 = vmatpush1.bf16.msra.mxu1 %v9259_v15  ;;  %v9336_v15 = vld [vmem:[%s13070_s3 + $0x894] ss:$8 sps:$4 sm:$0xff]  }
 0x1b5   : > { %2393 = vmatpush1.bf16.msra.mxu0 %v9262_v17  ;;  %2130 = vmatprep.subr.bf16.mxu1 %v9267_v18  ;;  %v9334_v18 = vld [vmem:[%s13070_s3 + $0x890] ss:$8 sps:$4 sm:$0xff]  }
 0x1b8   : > { %2395 = vmatmul.mubr.bf16.vlgmr.msra.gmra.mrb[16].mxu0 %v10481_v16  ;;  %2131 = vmatpush1.bf16.msra.mxu1 %v9265_v19  ;;  %v9339_v19 = vld [vmem:[%s13070_s3 + $0x8a4] ss:$8 sps:$4 sm:$0xff]  }
 0x1b9   : > { %2132 = vmatprep.subr.bf16.mxu1 %v9270_v20  ;;  %v9337_v20 = vld [vmem:[%s13070_s3 + $0x8a0] ss:$8 sps:$4 sm:$0xff]  }
 0x1bc   : > { %2133 = vmatpush1.bf16.msra.mxu1 %v9268_v21  ;;  %v9342_v21 = vld [vmem:[%s13070_s3 + $0x8b4] ss:$8 sps:$4 sm:$0xff]  }
 0x1bd   : > { %2134 = vmatprep.subr.bf16.mxu1 %v9273_v22  ;;  %v9340_v22 = vld [vmem:[%s13070_s3 + $0x8b0] ss:$8 sps:$4 sm:$0xff]  }
 0x1c0   : > { %2135 = vmatpush1.bf16.msra.mxu1 %v9271_v23  ;;  %v9345_v23 = vld [vmem:[%s13070_s3 + $0x8c4] ss:$8 sps:$4 sm:$0xff]  }
 0x1c1   : > { %2136 = vmatprep.subr.bf16.mxu1 %v9276_v24  ;;  %v9343_v24 = vld [vmem:[%s13070_s3 + $0x8c0] ss:$8 sps:$4 sm:$0xff]  }
 0x1c2   : > { %v11086_v27 = vpop.f32.mrb[0].mxu1 }
 0x1c3   : > { %v11088_v28 = vpop.f32.mrb[1].mxu1 }
 0x1c4   : > { %2137 = vmatpush1.bf16.msra.mxu1 %v9274_v25  ;;  %v9348_v25 = vld [vmem:[%s13070_s3 + $0x8d4] ss:$8 sps:$4 sm:$0xff]  }
 0x1c5   : > { %2138 = vmatprep.subr.bf16.mxu1 %v9279_v26  ;;  %v9346_v26 = vld [vmem:[%s13070_s3 + $0x8d0] ss:$8 sps:$4 sm:$0xff]  }
 0x1c8   : > { %2139 = vmatpush1.bf16.msra.mxu1 %v9277_v29  ;;  %v9351_v29 = vld [vmem:[%s13070_s3 + $0x8e4] ss:$8 sps:$4 sm:$0xff]  }
 0x1c9   : > { %2140 = vmatprep.subr.bf16.mxu1 %v9282_v30  ;;  %v9349_v30 = vld [vmem:[%s13070_s3 + $0x8e0] ss:$8 sps:$4 sm:$0xff]  }
 0x1cb   : > { %v11102_v33 = vpop.f32.mrb[4].mxu0 }
 0x1cc   : > { %v11104_v34 = vpop.f32.mrb[5].mxu0  ;;  %2141 = vmatpush1.bf16.msra.mxu1 %v9280_v31  ;;  %v9354_v31 = vld [vmem:[%s13070_s3 + $0x8f4] ss:$8 sps:$4 sm:$0xff]  }
 0x1cd   : > { %v984_v36 = vpop.f32.mrb[6].mxu0  ;;  %2142 = vmatprep.subr.bf16.mxu1 %v9285_v32  ;;  %v9352_v32 = vld [vmem:[%s13070_s3 + $0x8f0] ss:$8 sps:$4 sm:$0xff]  }
 0x1ce   : > { %v985_v38 = vpop.f32.mrb[7].mxu0 }
 0x1d0   : > { %2143 = vmatpush1.bf16.msra.mxu1 %v9283_v35 }
 0x1d1   : > { %2144 = vmatprep.subr.bf16.mxu1 %v9288_v37 }
 0x1d4   : > { %2145 = vmatpush1.bf16.msra.mxu1 %v9286_v39 }
 0x1d5   : > { %2146 = vmatprep.subr.bf16.mxu1 %v9291_v40 }
 0x1d8   : > { %2147 = vmatpush1.bf16.msra.mxu1 %v9289_v41 }
 0x1d9   : > { %2148 = vmatprep.subr.bf16.mxu1 %v9294_v42 }
 0x1dc   : > { %2149 = vmatpush1.bf16.msra.mxu1 %v9292_v43 }
 0x1dd   : > { %2150 = vmatprep.subr.bf16.mxu1 %v9297_v44 }
 0x1e0   : > { %2151 = vmatpush1.bf16.msra.mxu1 %v9295_v45 }
 0x1e1   : > { %2152 = vmatprep.subr.bf16.mxu1 %v9300_v46 }
 0x1e4   : > { %2153 = vmatpush1.bf16.msra.mxu1 %v9298_v47 }
 0x1e5   : > { %2154 = vmatprep.subr.bf16.mxu1 %v9303_v48 }
 0x1e8   : > { %2155 = vmatpush1.bf16.msra.mxu1 %v9301_v49  ;;  %v10219_v49 = vld [vmem:[%s13073_s6] sm:$0xff] }
 0x1e9   : > { %2156 = vmatprep.subr.bf16.mxu1 %v9306_v50 }
 0x1ec   : > { %2157 = vmatpush1.bf16.msra.mxu1 %v9304_v51  ;;  %v9358_v51 = vld [vmem:[%s13070_s3 + $0x100] ss:$8 sps:$4 sm:$0xff]  }
 0x1ed   : > { %2598 = vmatprep.subr.bf16.mxu1 %v9309_v52  ;;  %v9360_v52 = vld [vmem:[%s13070_s3 + $0x104] ss:$8 sps:$4 sm:$0xff]  }
 0x1ef   : > { %2159 = vmatmul.mubr.bf16.vlgmr.msra.gmra.mrb[16].mxu1 %v10481_v16 }
 0x1f0   : > { %2599 = vmatpush1.bf16.msra.mxu1 %v9307_v53  ;;  %2630 = vmatprep.mubr.bf16.mxu1 %v10473_v13  ;;  %v9316_v13 = vld [vmem:[%s13070_s3 + $0x830] ss:$8 sps:$4 sm:$0xff]  }
 0x1f1   : > { %2600 = vmatprep.subr.bf16.mxu1 %v9312_v54 }
 0x1f4   : > { %2601 = vmatpush1.bf16.msra.mxu1 %v9310_v55  ;;  %v10235_v55 = vmov 1  }
 0x1f5   : > { %2602 = vmatprep.subr.bf16.mxu1 %v9315_v56  ;;  %v9366_v56 = vld [vmem:[%s13070_s3 + $0x114] ss:$8 sps:$4 sm:$0xff]  }
 0x1f8   : > { %2603 = vmatpush1.bf16.msra.mxu1 %v9313_v57 }
 0x1f9   : > { %2604 = vmatprep.subr.bf16.mxu1 %v9318_v58  ;;  %v9364_v58 = vld [vmem:[%s13070_s3 + $0x110] ss:$8 sps:$4 sm:$0xff]  }
 0x1fc   : > { %2605 = vmatpush1.bf16.msra.mxu1 %v9316_v13  ;;  %v9372_v13 = vld [vmem:[%s13070_s3 + $0x124] ss:$8 sps:$4 sm:$0xff]  }
 0x1fd   : > { %2606 = vmatprep.subr.bf16.mxu1 %v9321_v59  ;;  %v9370_v59 = vld [vmem:[%s13070_s3 + $0x120] ss:$8 sps:$4 sm:$0xff]  }
 0x200   : > { %2607 = vmatpush1.bf16.msra.mxu1 %v9319_v60  ;;  %v9378_v60 = vld [vmem:[%s13070_s3 + $0x134] ss:$8 sps:$4 sm:$0xff]  }
 0x201   : > { %2608 = vmatprep.subr.bf16.mxu1 %v9324_v61  ;;  %v9376_v61 = vld [vmem:[%s13070_s3 + $0x130] ss:$8 sps:$4 sm:$0xff]  }
 0x202   : > { %v744_v0 = vpop.f32.mrb[4].mxu1 }
 0x203   : > { %v2659_v1 = vpack.c.bf16 %v11102_v33, %v744_v0  ;;  %v746_v2 = vpop.f32.mrb[5].mxu1  ;;  %v9390_v0 = vld [vmem:[%s13070_s3 + $0x154] ss:$8 sps:$4 sm:$0xff]  }
 0x204   : > { %v2660_v3 = vpack.c.bf16 %v11104_v34, %v746_v2  ;;  %v748_v4 = vpop.f32.mrb[6].mxu1  ;;  %2609 = vmatpush1.bf16.msra.mxu1 %v9322_v62  ;;  %v9384_v62 = vld [vmem:[%s13070_s3 + $0x144] ss:$8 sps:$4 sm:$0xff]  }
 0x205   : > { %v749_v6 = vpop.f32.mrb[7].mxu1  ;;  %2610 = vmatprep.subr.bf16.mxu1 %v9327_v63  ;;  %v9382_v63 = vld [vmem:[%s13070_s3 + $0x140] ss:$8 sps:$4 sm:$0xff]   ;;  %v9396_v2 = vld [vmem:[%s13070_s3 + $0x164] ss:$8 sps:$4 sm:$0xff]  }
 0x206   : > { %2679 = vmatprep.subr.bf16.mxu0 %v2660_v3  ;;  %v9394_v3 = vld [vmem:[%s13070_s3 + $0x160] ss:$8 sps:$4 sm:$0xff]   ;;  %v9402_v4 = vld [vmem:[%s13070_s3 + $0x174] ss:$8 sps:$4 sm:$0xff]   ;;  %v9408_v6 = vld [vmem:[%s13070_s3 + $0x184] ss:$8 sps:$4 sm:$0xff]  }
 0x207   : > { %2680 = vmatpush1.bf16.msra.mxu0 %v2659_v1  ;;  %v9388_v1 = vld [vmem:[%s13070_s3 + $0x150] ss:$8 sps:$4 sm:$0xff]  }
 0x208   : > { %2611 = vmatpush1.bf16.msra.mxu1 %v9325_v5  ;;  %v9400_v5 = vld [vmem:[%s13070_s3 + $0x170] ss:$8 sps:$4 sm:$0xff]  }
 0x209   : > { %2612 = vmatprep.subr.bf16.mxu1 %v9330_v7  ;;  %v9406_v7 = vld [vmem:[%s13070_s3 + $0x180] ss:$8 sps:$4 sm:$0xff]  }
 0x20b   : > { %v1452_v10 = vpop.f32.mrb[8].mxu0 }
 0x20c   : > { %v1454_v11 = vpop.f32.mrb[9].mxu0  ;;  %2613 = vmatpush1.bf16.msra.mxu1 %v9328_v8  ;;  %v9414_v8 = vld [vmem:[%s13070_s3 + $0x194] ss:$8 sps:$4 sm:$0xff]  }
 0x20d   : > { %v1456_v14 = vpop.f32.mrb[10].mxu0  ;;  %2614 = vmatprep.subr.bf16.mxu1 %v9333_v9  ;;  %v9412_v9 = vld [vmem:[%s13070_s3 + $0x190] ss:$8 sps:$4 sm:$0xff]  }
 0x20e   : > { %v1457_v17 = vpop.f32.mrb[11].mxu0  ;;  %v9424_v14 = vld [vmem:[%s13070_s3 + $0x1b0] ss:$8 sps:$4 sm:$0xff]  }
 0x20f   : > { %v9430_v17 = vld [vmem:[%s13070_s3 + $0x1c0] ss:$8 sps:$4 sm:$0xff]  }
 0x210   : > { %2615 = vmatpush1.bf16.msra.mxu1 %v9331_v12  ;;  %v9426_v12 = vld [vmem:[%s13070_s3 + $0x1b4] ss:$8 sps:$4 sm:$0xff]  }
 0x211   : > { %2616 = vmatprep.subr.bf16.mxu1 %v9336_v15  ;;  %v9432_v15 = vld [vmem:[%s13070_s3 + $0x1c4] ss:$8 sps:$4 sm:$0xff]  }
 0x214   : > { %2617 = vmatpush1.bf16.msra.mxu1 %v9334_v18  ;;  %v9438_v18 = vld [vmem:[%s13070_s3 + $0x1d4] ss:$8 sps:$4 sm:$0xff]  }
 0x215   : > { %2618 = vmatprep.subr.bf16.mxu1 %v9339_v19  ;;  %v9436_v19 = vld [vmem:[%s13070_s3 + $0x1d0] ss:$8 sps:$4 sm:$0xff]  }
 0x218   : > { %2619 = vmatpush1.bf16.msra.mxu1 %v9337_v20 }
 0x219   : > { %2620 = vmatprep.subr.bf16.mxu1 %v9342_v21 }
 0x21c   : > { %2621 = vmatpush1.bf16.msra.mxu1 %v9340_v22 }
 0x21d   : > { %2622 = vmatprep.subr.bf16.mxu1 %v9345_v23 }
 0x220   : > { %2623 = vmatpush1.bf16.msra.mxu1 %v9343_v24 }
 0x221   : > { %2624 = vmatprep.subr.bf16.mxu1 %v9348_v25 }
 0x224   : > { %2625 = vmatpush1.bf16.msra.mxu1 %v9346_v26 }
 0x225   : > { %2626 = vmatprep.subr.bf16.mxu1 %v9351_v29 }
 0x228   : > { %2627 = vmatpush1.bf16.msra.mxu1 %v9349_v30 }
 0x229   : > { %2628 = vmatprep.subr.bf16.mxu1 %v9354_v31 }
 0x22c   : > { %2629 = vmatpush1.bf16.msra.mxu1 %v9352_v32 }
 0x22d   : > { %3164 = vmatprep.subr.bf16.mxu1 %v9360_v52  ;;  %v9405_v52 = vld [vmem:[%s13070_s3 + $0x84] ss:$8 sps:$4 sm:$0xff]  }
 0x22f   : > { %2631 = vmatmul.mubr.bf16.vlgmr.msra.gmra.mrb[20].mxu1 %v10481_v16  ;;  %v10234_v16 = vmov 0  }
 0x230   : > { %2711 = vmatprep.mubr.bf16.mxu0 %v10234_v16  ;;  %8915 = vset.pattern.permute.xlu0 %v10234_v16 }
 0x231   : > { %2721 = vperm.xlu0 %8915, %v10219_v49   ;;  %3165 = vmatpush1.bf16.msra.mxu1 %v9358_v51  ;;  %v9397_v51 = vld [vmem:[%s13070_s3 + $0x70] ss:$8 sps:$4 sm:$0xff]  }
 0x232   : > { %3166 = vmatprep.subr.bf16.mxu1 %v9366_v56  ;;  %v9417_v56 = vld [vmem:[%s13070_s3 + $0xa4] ss:$8 sps:$4 sm:$0xff]  }
 0x235   : > { %8916 = vset.pattern.permute.xlu0 %v10235_v55  ;;  %3167 = vmatpush1.bf16.msra.mxu1 %v9364_v58  ;;  %v9409_v55 = vld [vmem:[%s13070_s3 + $0x90] ss:$8 sps:$4 sm:$0xff]   ;;  %v9423_v58 = vld [vmem:[%s13070_s3 + $0xb4] ss:$8 sps:$4 sm:$0xff]  }
 0x236   : > { %2727 = vperm.xlu0 %8916, %v10219_v49   ;;  %3168 = vmatprep.subr.bf16.mxu1 %v9372_v13  ;;  %v9391_v49 = vld [vmem:[%s13070_s3 + $0x60] ss:$8 sps:$4 sm:$0xff]   ;;  %v9421_v13 = vld [vmem:[%s13070_s3 + $0xb0] ss:$8 sps:$4 sm:$0xff]  }
 0x239   : > { %3169 = vmatpush1.bf16.msra.mxu1 %v9370_v59  ;;  %v9429_v59 = vld [vmem:[%s13070_s3 + $0xc4] ss:$8 sps:$4 sm:$0xff]  }
 0x23a   : > { %3170 = vmatprep.subr.bf16.mxu1 %v9378_v60  ;;  %v9427_v60 = vld [vmem:[%s13070_s3 + $0xc0] ss:$8 sps:$4 sm:$0xff]  }
 0x23d   : > { %3171 = vmatpush1.bf16.msra.mxu1 %v9376_v61  ;;  %v9435_v61 = vld [vmem:[%s13070_s3 + $0xd4] ss:$8 sps:$4 sm:$0xff]  }
 0x23e   : > { %3172 = vmatprep.subr.bf16.mxu1 %v9384_v62  ;;  %v9433_v62 = vld [vmem:[%s13070_s3 + $0xd0] ss:$8 sps:$4 sm:$0xff]  }
 0x241   : > { %3173 = vmatpush1.bf16.msra.mxu1 %v9382_v63  ;;  %v9441_v63 = vld [vmem:[%s13070_s3 + $0xe4] ss:$8 sps:$4 sm:$0xff]  }
 0x242   : > { %v1216_v33 = vpop.f32.mrb[8].mxu1  ;;  %3174 = vmatprep.subr.bf16.mxu1 %v9390_v0  ;;  %v9444_v0 = vld [vmem:[%s13070_s3 + $0x1e4] ss:$8 sps:$4 sm:$0xff]  }
 0x243   : > { %v2661_v34 = vpack.c.bf16 %v1452_v10, %v1216_v33  ;;  %v1218_v35 = vpop.f32.mrb[9].mxu1  ;;  %v9420_v10 = vld [vmem:[%s13070_s3 + $0x1a4] ss:$8 sps:$4 sm:$0xff]  }
 0x244   : > { %v2662_v36 = vpack.c.bf16 %v1454_v11, %v1218_v35  ;;  %v1220_v37 = vpop.f32.mrb[10].mxu1  ;;  %v9418_v11 = vld [vmem:[%s13070_s3 + $0x1a0] ss:$8 sps:$4 sm:$0xff]   ;;  %v9357_v33 = vld [vmem:[%s13070_s3 + $0x4] ss:$8 sps:$4 sm:$0xff]  }
 0x245   : > { %v1221_v38 = vpop.f32.mrb[11].mxu1  ;;  %3175 = vmatpush1.bf16.msra.mxu1 %v9388_v1  ;;  %v9355_v37 = vld [vmem:[%s13070_s3] ss:$8 sps:$4 sm:$0xff]  }
 0x246   : > { %2681 = vmatprep.subr.bf16.mxu0 %v2662_v36  ;;  %3176 = vmatprep.subr.bf16.mxu1 %v9396_v2  ;;  %v517_v36 = vld [vmem:[%s13071_s4] sm:$0xf]  ;;  %v9363_v38 = vld [vmem:[%s13070_s3 + $0x14] ss:$8 sps:$4 sm:$0xff]  }
 0x247   : > { %2682 = vmatpush1.bf16.msra.mxu0 %v2661_v34  ;;  %v9439_v1 = vld [vmem:[%s13070_s3 + $0xe0] ss:$8 sps:$4 sm:$0xff]  }
 0x248   : > { %v9442_v2 = vld [vmem:[%s13070_s3 + $0x1e0] ss:$8 sps:$4 sm:$0xff]  }
 0x249   : > { %3177 = vmatpush1.bf16.msra.mxu1 %v9394_v3  ;;  %v9447_v3 = vld [vmem:[%s13070_s3 + $0xf4] ss:$8 sps:$4 sm:$0xff]  }
 0x24a   : > { %3178 = vmatprep.subr.bf16.mxu1 %v9402_v4  ;;  %v9450_v4 = vld [vmem:[%s13070_s3 + $0x1f4] ss:$8 sps:$4 sm:$0xff]  }
 0x24b   : > { %v1924_v39 = vpop.f32.mrb[12].mxu0 }
 0x24c   : > { %v1926_v40 = vpop.f32.mrb[13].mxu0 }
 0x24d   : > { %v1928_v41 = vpop.f32.mrb[14].mxu0  ;;  %3179 = vmatpush1.bf16.msra.mxu1 %v9400_v5  ;;  %v9445_v5 = vld [vmem:[%s13070_s3 + $0xf0] ss:$8 sps:$4 sm:$0xff]  }
 0x24e   : > { %v1929_v42 = vpop.f32.mrb[15].mxu0  ;;  %3180 = vmatprep.subr.bf16.mxu1 %v9408_v6  ;;  %v9367_v41 = vld [vmem:[%s13070_s3 + $0x20] ss:$8 sps:$4 sm:$0xff]   ;;  %v9448_v6 = vld [vmem:[%s13070_s3 + $0x1f0] ss:$8 sps:$4 sm:$0xff]  }
 0x24f   : > { %v9375_v42 = vld [vmem:[%s13070_s3 + $0x34] ss:$8 sps:$4 sm:$0xff]  }
 0x251   : > { %3181 = vmatpush1.bf16.msra.mxu1 %v9406_v7  ;;  %v9453_v7 = vld [vmem:[%s13070_s3 + $0x204] ss:$8 sps:$4 sm:$0xff]  }
 0x252   : > { %3182 = vmatprep.subr.bf16.mxu1 %v9414_v8  ;;  %v9456_v8 = vld [vmem:[%s13070_s3 + $0x304] ss:$8 sps:$4 sm:$0xff]  }
 0x255   : > { %3183 = vmatpush1.bf16.msra.mxu1 %v9412_v9 }
 0x256   : > { %3184 = vmatprep.subr.bf16.mxu1 %v9420_v10 }
 0x259   : > { %3185 = vmatpush1.bf16.msra.mxu1 %v9418_v11 }
 0x25a   : > { %3186 = vmatprep.subr.bf16.mxu1 %v9426_v12 }
 0x25d   : > { %3187 = vmatpush1.bf16.msra.mxu1 %v9424_v14 }
 0x25e   : > { %3188 = vmatprep.subr.bf16.mxu1 %v9432_v15 }
 0x261   : > { %3189 = vmatpush1.bf16.msra.mxu1 %v9430_v17 }
 0x262   : > { %3190 = vmatprep.subr.bf16.mxu1 %v9438_v18 }
 0x265   : > { %3191 = vmatpush1.bf16.msra.mxu1 %v9436_v19 }
 0x266   : > { %3192 = vmatprep.subr.bf16.mxu1 %v9444_v0  ;;  %v9513_v0 = vld [vmem:[%s13070_s3 + $0x2a4] ss:$8 sps:$4 sm:$0xff]  }
 0x269   : > { %3193 = vmatpush1.bf16.msra.mxu1 %v9442_v2  ;;  %v9511_v2 = vld [vmem:[%s13070_s3 + $0x2a0] ss:$8 sps:$4 sm:$0xff]  }
 0x26a   : > { %3194 = vmatprep.subr.bf16.mxu1 %v9450_v4  ;;  %v9519_v4 = vld [vmem:[%s13070_s3 + $0x2b4] ss:$8 sps:$4 sm:$0xff]  }
 0x26d   : > { %3195 = vmatpush1.bf16.msra.mxu1 %v9448_v6  ;;  %v9517_v6 = vld [vmem:[%s13070_s3 + $0x2b0] ss:$8 sps:$4 sm:$0xff]  }
 0x26e   : > { %3634 = vmatprep.subr.bf16.mxu1 %v9456_v8  ;;  %v9525_v8 = vld [vmem:[%s13070_s3 + $0x2c4] ss:$8 sps:$4 sm:$0xff]  }
 0x282   : > { %v1688_v43 = vpop.f32.mrb[12].mxu1 }
 0x283   : > { %v2663_v44 = vpack.c.bf16 %v1924_v39, %v1688_v43  ;;  %v1690_v45 = vpop.f32.mrb[13].mxu1  ;;  %v9361_v39 = vld [vmem:[%s13070_s3 + $0x10] ss:$8 sps:$4 sm:$0xff]  }
 0x284   : > { %v2664_v46 = vpack.c.bf16 %v1926_v40, %v1690_v45  ;;  %v1692_v47 = vpop.f32.mrb[14].mxu1  ;;  %v9369_v40 = vld [vmem:[%s13070_s3 + $0x24] ss:$8 sps:$4 sm:$0xff]   ;;  %v9373_v43 = vld [vmem:[%s13070_s3 + $0x30] ss:$8 sps:$4 sm:$0xff]  }
 0x285   : > { %v1693_v48 = vpop.f32.mrb[15].mxu1  ;;  %v9379_v45 = vld [vmem:[%s13070_s3 + $0x40] ss:$8 sps:$4 sm:$0xff]   ;;  %v9385_v47 = vld [vmem:[%s13070_s3 + $0x50] ss:$8 sps:$4 sm:$0xff]  }
 0x286   : > { %2683 = vmatprep.subr.bf16.mxu0 %v2664_v46  ;;  %v9387_v46 = vld [vmem:[%s13070_s3 + $0x54] ss:$8 sps:$4 sm:$0xff]   ;;  %v9393_v48 = vld [vmem:[%s13070_s3 + $0x64] ss:$8 sps:$4 sm:$0xff]  }
 0x287   : > { %2684 = vmatpush1.bf16.msra.mxu0 %v2663_v44  ;;  %v9381_v44 = vld [vmem:[%s13070_s3 + $0x44] ss:$8 sps:$4 sm:$0xff]  }
 0x28b   : > { %v11257_v50 = vpop.f32.mrb[16].mxu0 }
 0x28c   : > { %v11265_v53 = vpop.f32.mrb[17].mxu0 }
 0x28d   : > { %v2400_v54 = vpop.f32.mrb[18].mxu0 }
 0x28e   : > { %v2401_v57 = vpop.f32.mrb[19].mxu0  ;;  %v9411_v54 = vld [vmem:[%s13070_s3 + $0x94] ss:$8 sps:$4 sm:$0xff]  }
 0x28f   : > { %v9415_v57 = vld [vmem:[%s13070_s3 + $0xa0] ss:$8 sps:$4 sm:$0xff]  }
 0x2b0   : > { %v2722_v9 = vpop.permute.xlu0 %2721 }
 0x2b5   : > { %v2728_v11 = vpop.permute.xlu0 %2727 }
 0x2c2   : > { %v2160_v20 = vpop.f32.mrb[16].mxu1 }
 0x2c3   : > { %v2665_v21 = vpack.c.bf16 %v11257_v50, %v2160_v20  ;;  %v2162_v22 = vpop.f32.mrb[17].mxu1  ;;  %v9399_v50 = vld [vmem:[%s13070_s3 + $0x74] ss:$8 sps:$4 sm:$0xff]  }
 0x2c4   : > { %v2666_v23 = vpack.c.bf16 %v11265_v53, %v2162_v22  ;;  %v2164_v24 = vpop.f32.mrb[18].mxu1  ;;  %v9403_v53 = vld [vmem:[%s13070_s3 + $0x80] ss:$8 sps:$4 sm:$0xff]  }
 0x2c5   : > { %v2165_v25 = vpop.f32.mrb[19].mxu1  ;;  %v9451_v24 = vld [vmem:[%s13070_s3 + $0x200] ss:$8 sps:$4 sm:$0xff]  }
 0x2c6   : > { %2685 = vmatprep.subr.bf16.mxu0 %v2666_v23  ;;  %v9454_v25 = vld [vmem:[%s13070_s3 + $0x300] ss:$8 sps:$4 sm:$0xff]  }
 0x2c7   : > { %2686 = vmatpush1.bf16.msra.mxu0 %v2665_v21 }
 0x302   : > { %v2632_v26 = vpop.f32.mrb[20].mxu1 }
 0x303   : > { %v2667_v29 = vpack.c.bf16 %v2632_v26, %v2632_v26  ;;  %v2634_v30 = vpop.f32.mrb[21].mxu1 }
 0x304   : > { %v2668_v31 = vpack.c.bf16 %v2634_v30, %v2634_v30  ;;  %v2636_v32 = vpop.f32.mrb[22].mxu1  ;;  %v9462_v30 = vld [vmem:[%s13070_s3 + $0x314] ss:$8 sps:$4 sm:$0xff]  }
 0x305   : > { %v2674_v34 = vsel %vm427_vm1, %v2667_v29, 0  ;;  %v2637_v35 = vpop.f32.mrb[23].mxu1  ;;  %v9459_v29 = vld [vmem:[%s13070_s3 + $0x214] ss:$8 sps:$4 sm:$0xff]   ;;  %v9460_v32 = vld [vmem:[%s13070_s3 + $0x310] ss:$8 sps:$4 sm:$0xff]  }
 0x306   : > { %7784 = vmatprep.subr.msk.bf16.mxu0 %vm427_vm1, %v2668_v31  ;;  %v9457_v31 = vld [vmem:[%s13070_s3 + $0x210] ss:$8 sps:$4 sm:$0xff]   ;;  %v9463_v35 = vld [vmem:[%s13070_s3 + $0x220] ss:$8 sps:$4 sm:$0xff]  }
 0x307   : > { %2688 = vmatpush1.bf16.msra.mxu0 %v2674_v34  ;;  %v9468_v34 = vld [vmem:[%s13070_s3 + $0x324] ss:$8 sps:$4 sm:$0xff]  }
 0x308   : > { %2929 = vmatprep.subr.bf16.mxu0 %v9357_v33  ;;  %v9465_v33 = vld [vmem:[%s13070_s3 + $0x224] ss:$8 sps:$4 sm:$0xff]  }
 0x30a   : > { %7785 = vmatmul.mubr.msk.bf16.vlgmr.msra.gmra.mrb[20].mxu0 %vm2669_vm3, %v517_v36  ;;  %v9466_v36 = vld [vmem:[%s13070_s3 + $0x320] ss:$8 sps:$4 sm:$0xff]  }
 0x30b   : > { %2930 = vmatpush1.bf16.msra.mxu0 %v9355_v37  ;;  %v9471_v37 = vld [vmem:[%s13070_s3 + $0x234] ss:$8 sps:$4 sm:$0xff]  }
 0x30c   : > { %2931 = vmatprep.subr.bf16.mxu0 %v9363_v38  ;;  %v9474_v38 = vld [vmem:[%s13070_s3 + $0x334] ss:$8 sps:$4 sm:$0xff]  }
 0x30f   : > { %2932 = vmatpush1.bf16.msra.mxu0 %v9361_v39  ;;  %v9469_v39 = vld [vmem:[%s13070_s3 + $0x230] ss:$8 sps:$4 sm:$0xff]  }
 0x310   : > { %2933 = vmatprep.subr.bf16.mxu0 %v9369_v40  ;;  %v9472_v40 = vld [vmem:[%s13070_s3 + $0x330] ss:$8 sps:$4 sm:$0xff]  }
 0x313   : > { %2934 = vmatpush1.bf16.msra.mxu0 %v9367_v41  ;;  %v9477_v41 = vld [vmem:[%s13070_s3 + $0x244] ss:$8 sps:$4 sm:$0xff]  }
 0x314   : > { %2935 = vmatprep.subr.bf16.mxu0 %v9375_v42  ;;  %v9480_v42 = vld [vmem:[%s13070_s3 + $0x344] ss:$8 sps:$4 sm:$0xff]  }
 0x317   : > { %2936 = vmatpush1.bf16.msra.mxu0 %v9373_v43  ;;  %v9475_v43 = vld [vmem:[%s13070_s3 + $0x240] ss:$8 sps:$4 sm:$0xff]  }
 0x318   : > { %2937 = vmatprep.subr.bf16.mxu0 %v9381_v44  ;;  %v9478_v44 = vld [vmem:[%s13070_s3 + $0x340] ss:$8 sps:$4 sm:$0xff]  }
 0x31b   : > { %2938 = vmatpush1.bf16.msra.mxu0 %v9379_v45  ;;  %v9483_v45 = vld [vmem:[%s13070_s3 + $0x254] ss:$8 sps:$4 sm:$0xff]  }
 0x31c   : > { %2939 = vmatprep.subr.bf16.mxu0 %v9387_v46  ;;  %v9486_v46 = vld [vmem:[%s13070_s3 + $0x354] ss:$8 sps:$4 sm:$0xff]  }
 0x31f   : > { %2940 = vmatpush1.bf16.msra.mxu0 %v9385_v47  ;;  %v9481_v47 = vld [vmem:[%s13070_s3 + $0x250] ss:$8 sps:$4 sm:$0xff]  }
 0x320   : > { %2941 = vmatprep.subr.bf16.mxu0 %v9393_v48  ;;  %v9484_v48 = vld [vmem:[%s13070_s3 + $0x350] ss:$8 sps:$4 sm:$0xff]  }
 0x323   : > { %2942 = vmatpush1.bf16.msra.mxu0 %v9391_v49  ;;  %v9489_v49 = vld [vmem:[%s13070_s3 + $0x264] ss:$8 sps:$4 sm:$0xff]  }
 0x324   : > { %2943 = vmatprep.subr.bf16.mxu0 %v9399_v50  ;;  %v9492_v50 = vld [vmem:[%s13070_s3 + $0x364] ss:$8 sps:$4 sm:$0xff]  }
 0x327   : > { %2944 = vmatpush1.bf16.msra.mxu0 %v9397_v51  ;;  %v9487_v51 = vld [vmem:[%s13070_s3 + $0x260] ss:$8 sps:$4 sm:$0xff]  }
 0x328   : > { %2945 = vmatprep.subr.bf16.mxu0 %v9405_v52  ;;  %v9490_v52 = vld [vmem:[%s13070_s3 + $0x360] ss:$8 sps:$4 sm:$0xff]  }
 0x32b   : > { %2946 = vmatpush1.bf16.msra.mxu0 %v9403_v53  ;;  %v9495_v53 = vld [vmem:[%s13070_s3 + $0x274] ss:$8 sps:$4 sm:$0xff]  }
 0x32c   : > { %2947 = vmatprep.subr.bf16.mxu0 %v9411_v54  ;;  %v9498_v54 = vld [vmem:[%s13070_s3 + $0x374] ss:$8 sps:$4 sm:$0xff]  }
 0x32f   : > { %2948 = vmatpush1.bf16.msra.mxu0 %v9409_v55  ;;  %v9493_v55 = vld [vmem:[%s13070_s3 + $0x270] ss:$8 sps:$4 sm:$0xff]  }
 0x330   : > { %2949 = vmatprep.subr.bf16.mxu0 %v9417_v56  ;;  %v9496_v56 = vld [vmem:[%s13070_s3 + $0x370] ss:$8 sps:$4 sm:$0xff]  }
 0x333   : > { %2950 = vmatpush1.bf16.msra.mxu0 %v9415_v57  ;;  %v9501_v57 = vld [vmem:[%s13070_s3 + $0x284] ss:$8 sps:$4 sm:$0xff]  }
 0x334   : > { %2951 = vmatprep.subr.bf16.mxu0 %v9423_v58  ;;  %v9504_v58 = vld [vmem:[%s13070_s3 + $0x384] ss:$8 sps:$4 sm:$0xff]  }
 0x337   : > { %2952 = vmatpush1.bf16.msra.mxu0 %v9421_v13  ;;  %v9499_v13 = vld [vmem:[%s13070_s3 + $0x280] ss:$8 sps:$4 sm:$0xff]  }
 0x338   : > { %2953 = vmatprep.subr.bf16.mxu0 %v9429_v59  ;;  %v9502_v59 = vld [vmem:[%s13070_s3 + $0x380] ss:$8 sps:$4 sm:$0xff]  }
 0x33b   : > { %2954 = vmatpush1.bf16.msra.mxu0 %v9427_v60  ;;  %v9507_v60 = vld [vmem:[%s13070_s3 + $0x294] ss:$8 sps:$4 sm:$0xff]  }
 0x33c   : > { %2955 = vmatprep.subr.bf16.mxu0 %v9435_v61  ;;  %v9510_v61 = vld [vmem:[%s13070_s3 + $0x394] ss:$8 sps:$4 sm:$0xff]  }
 0x33f   : > { %2956 = vmatpush1.bf16.msra.mxu0 %v9433_v62  ;;  %v9505_v62 = vld [vmem:[%s13070_s3 + $0x290] ss:$8 sps:$4 sm:$0xff]  }
 0x340   : > { %2957 = vmatprep.subr.bf16.mxu0 %v9441_v63  ;;  %v9508_v63 = vld [vmem:[%s13070_s3 + $0x390] ss:$8 sps:$4 sm:$0xff]  }
 0x343   : > { %2958 = vmatpush1.bf16.msra.mxu0 %v9439_v1  ;;  %v9516_v1 = vld [vmem:[%s13070_s3 + $0x3a4] ss:$8 sps:$4 sm:$0xff]  }
 0x344   : > { %2959 = vmatprep.subr.bf16.mxu0 %v9447_v3  ;;  %v9514_v3 = vld [vmem:[%s13070_s3 + $0x3a0] ss:$8 sps:$4 sm:$0xff]  }
 0x347   : > { %2960 = vmatpush1.bf16.msra.mxu0 %v9445_v5  ;;  %v9522_v5 = vld [vmem:[%s13070_s3 + $0x3b4] ss:$8 sps:$4 sm:$0xff]  }
 0x348   : > { %3399 = vmatprep.subr.bf16.mxu0 %v9453_v7  ;;  %v9520_v7 = vld [vmem:[%s13070_s3 + $0x3b0] ss:$8 sps:$4 sm:$0xff]  }
 0x3dd   : > { %v2713_v10 = vpop.f32.mrb[20].mxu0 }
 0x3de   : > { %v2724_v12 = vmul.f32 %v2722_v9, %v2713_v10  ;;  %v2715_v14 = vpop.f32.mrb[21].mxu0  ;;  %v9523_v10 = vld [vmem:[%s13070_s3 + $0x2c0] ss:$8 sps:$4 sm:$0xff]  }
 0x3df   : > { %v2725_v15 = vmul.f32 %v2722_v9, %v2715_v14  ;;  %v2717_v17 = vpop.f32.mrb[22].mxu0  ;;  %v9528_v9 = vld [vmem:[%s13070_s3 + $0x3c4] ss:$8 sps:$4 sm:$0xff]   ;;  %v9534_v14 = vld [vmem:[%s13070_s3 + $0x3d4] ss:$8 sps:$4 sm:$0xff]  }
 0x3e0   : > { %v2730_v18 = vadd.f32 %v2728_v11, %v2724_v12  ;;  %v2718_v19 = vpop.f32.mrb[23].mxu0  ;;  %v9531_v12 = vld [vmem:[%s13070_s3 + $0x2d4] ss:$8 sps:$4 sm:$0xff]   ;;  %v9532_v17 = vld [vmem:[%s13070_s3 + $0x3d0] ss:$8 sps:$4 sm:$0xff]  }
 0x3e1   : > { %v2731_v20 = vadd.f32 %v2728_v11, %v2725_v15  ;;  %v9526_v11 = vld [vmem:[%s13070_s3 + $0x3c0] ss:$8 sps:$4 sm:$0xff]   ;;  %v9529_v15 = vld [vmem:[%s13070_s3 + $0x2d0] ss:$8 sps:$4 sm:$0xff]   ;;  %v9540_v19 = vld [vmem:[%s13070_s3 + $0x3e4] ss:$8 sps:$4 sm:$0xff]  }
 0x3e2   : > { %v2732_v21 = vmax.f32 %v2730_v18, 0.0  ;;  %v9537_v18 = vld [vmem:[%s13070_s3 + $0x2e4] ss:$8 sps:$4 sm:$0xff]  }
 0x3e3   : > { %v2733_v22 = vmax.f32 %v2731_v20, 0.0  ;;  %v9535_v20 = vld [vmem:[%s13070_s3 + $0x2e0] ss:$8 sps:$4 sm:$0xff]  }
 0x3e4   : > { %v11475_v26 = vpack.c.bf16 %v2732_v21, %v2732_v21  ;;  %v9538_v21 = vld [vmem:[%s13070_s3 + $0x3e0] ss:$8 sps:$4 sm:$0xff]  }
 0x3e5   : > { %v11467_v23 = vpack.c.bf16 %v2733_v22, %v2733_v22  ;;  %v9543_v22 = vld [vmem:[%s13070_s3 + $0x2f4] ss:$8 sps:$4 sm:$0xff]  }
 0x3e7   : > { %2961 = vmatprep.mubr.bf16.mxu0 %v11467_v23  ;;  %3196 = vmatprep.mubr.bf16.mxu1 %v11467_v23 }
 0x3e8   : > { %2962 = vmatmul.mubr.bf16.vlgmr.msra.gmra.mrb[24].mxu0 %v11475_v26  ;;  %3197 = vmatmul.mubr.bf16.vlgmr.msra.gmra.mrb[24].mxu1 %v11475_v26 }
 0x3e9   : > { %3400 = vmatpush1.bf16.msra.mxu0 %v9451_v24  ;;  %3635 = vmatpush1.bf16.msra.mxu1 %v9454_v25  ;;  %v9546_v24 = vld [vmem:[%s13070_s3 + $0x3f4] ss:$8 sps:$4 sm:$0xff]   ;;  %v9541_v25 = vld [vmem:[%s13070_s3 + $0x2f0] ss:$8 sps:$4 sm:$0xff]  }
 0x3ea   : > { %3431 = vmatprep.mubr.bf16.mxu0 %v11467_v23  ;;  %3666 = vmatprep.mubr.bf16.mxu1 %v11467_v23 }
 0x3eb   : > { %3401 = vmatprep.subr.bf16.mxu0 %v9459_v29  ;;  %3636 = vmatprep.subr.bf16.mxu1 %v9462_v30  ;;  %v9544_v29 = vld [vmem:[%s13070_s3 + $0x3f0] ss:$8 sps:$4 sm:$0xff]   ;;  %v9549_v30 = vld [vmem:[%s13070_s3 + $0x404] ss:$8 sps:$4 sm:$0xff]  }
 0x3ed   : > { %3402 = vmatpush1.bf16.msra.mxu0 %v9457_v31  ;;  %3637 = vmatpush1.bf16.msra.mxu1 %v9460_v32  ;;  %v9552_v31 = vld [vmem:[%s13070_s3 + $0x504] ss:$8 sps:$4 sm:$0xff]   ;;  %v9547_v32 = vld [vmem:[%s13070_s3 + $0x400] ss:$8 sps:$4 sm:$0xff]  }
 0x3ee   : > { %3403 = vmatprep.subr.bf16.mxu0 %v9465_v33  ;;  %3638 = vmatprep.subr.bf16.mxu1 %v9468_v34  ;;  %v9550_v33 = vld [vmem:[%s13070_s3 + $0x500] ss:$8 sps:$4 sm:$0xff]   ;;  %v9555_v34 = vld [vmem:[%s13070_s3 + $0x414] ss:$8 sps:$4 sm:$0xff]  }
 0x3f1   : > { %3404 = vmatpush1.bf16.msra.mxu0 %v9463_v35  ;;  %3639 = vmatpush1.bf16.msra.mxu1 %v9466_v36  ;;  %v9558_v35 = vld [vmem:[%s13070_s3 + $0x514] ss:$8 sps:$4 sm:$0xff]   ;;  %v9553_v36 = vld [vmem:[%s13070_s3 + $0x410] ss:$8 sps:$4 sm:$0xff]  }
 0x3f2   : > { %3405 = vmatprep.subr.bf16.mxu0 %v9471_v37  ;;  %3640 = vmatprep.subr.bf16.mxu1 %v9474_v38  ;;  %v9556_v37 = vld [vmem:[%s13070_s3 + $0x510] ss:$8 sps:$4 sm:$0xff]   ;;  %v9561_v38 = vld [vmem:[%s13070_s3 + $0x424] ss:$8 sps:$4 sm:$0xff]  }
 0x3f5   : > { %3406 = vmatpush1.bf16.msra.mxu0 %v9469_v39  ;;  %3641 = vmatpush1.bf16.msra.mxu1 %v9472_v40  ;;  %v9564_v39 = vld [vmem:[%s13070_s3 + $0x524] ss:$8 sps:$4 sm:$0xff]   ;;  %v9559_v40 = vld [vmem:[%s13070_s3 + $0x420] ss:$8 sps:$4 sm:$0xff]  }
 0x3f6   : > { %3407 = vmatprep.subr.bf16.mxu0 %v9477_v41  ;;  %3642 = vmatprep.subr.bf16.mxu1 %v9480_v42  ;;  %v9562_v41 = vld [vmem:[%s13070_s3 + $0x520] ss:$8 sps:$4 sm:$0xff]   ;;  %v9567_v42 = vld [vmem:[%s13070_s3 + $0x434] ss:$8 sps:$4 sm:$0xff]  }
 0x3f9   : > { %3408 = vmatpush1.bf16.msra.mxu0 %v9475_v43  ;;  %3643 = vmatpush1.bf16.msra.mxu1 %v9478_v44  ;;  %v9570_v43 = vld [vmem:[%s13070_s3 + $0x534] ss:$8 sps:$4 sm:$0xff]   ;;  %v9565_v44 = vld [vmem:[%s13070_s3 + $0x430] ss:$8 sps:$4 sm:$0xff]  }
 0x3fa   : > { %3409 = vmatprep.subr.bf16.mxu0 %v9483_v45  ;;  %3644 = vmatprep.subr.bf16.mxu1 %v9486_v46  ;;  %v9568_v45 = vld [vmem:[%s13070_s3 + $0x530] ss:$8 sps:$4 sm:$0xff]   ;;  %v9573_v46 = vld [vmem:[%s13070_s3 + $0x444] ss:$8 sps:$4 sm:$0xff]  }
 0x3fd   : > { %3410 = vmatpush1.bf16.msra.mxu0 %v9481_v47  ;;  %3645 = vmatpush1.bf16.msra.mxu1 %v9484_v48  ;;  %v9576_v47 = vld [vmem:[%s13070_s3 + $0x544] ss:$8 sps:$4 sm:$0xff]   ;;  %v9571_v48 = vld [vmem:[%s13070_s3 + $0x440] ss:$8 sps:$4 sm:$0xff]  }
 0x3fe   : > { %3411 = vmatprep.subr.bf16.mxu0 %v9489_v49  ;;  %3646 = vmatprep.subr.bf16.mxu1 %v9492_v50  ;;  %v9574_v49 = vld [vmem:[%s13070_s3 + $0x540] ss:$8 sps:$4 sm:$0xff]   ;;  %v9579_v50 = vld [vmem:[%s13070_s3 + $0x454] ss:$8 sps:$4 sm:$0xff]  }
 0x401   : > { %3412 = vmatpush1.bf16.msra.mxu0 %v9487_v51  ;;  %3647 = vmatpush1.bf16.msra.mxu1 %v9490_v52  ;;  %v9582_v51 = vld [vmem:[%s13070_s3 + $0x554] ss:$8 sps:$4 sm:$0xff]   ;;  %v9577_v52 = vld [vmem:[%s13070_s3 + $0x450] ss:$8 sps:$4 sm:$0xff]  }
 0x402   : > { %3413 = vmatprep.subr.bf16.mxu0 %v9495_v53  ;;  %3648 = vmatprep.subr.bf16.mxu1 %v9498_v54  ;;  %v9580_v53 = vld [vmem:[%s13070_s3 + $0x550] ss:$8 sps:$4 sm:$0xff]   ;;  %v9585_v54 = vld [vmem:[%s13070_s3 + $0x464] ss:$8 sps:$4 sm:$0xff]  }
 0x405   : > { %3414 = vmatpush1.bf16.msra.mxu0 %v9493_v55  ;;  %3649 = vmatpush1.bf16.msra.mxu1 %v9496_v56  ;;  %v9588_v55 = vld [vmem:[%s13070_s3 + $0x564] ss:$8 sps:$4 sm:$0xff]   ;;  %v9583_v56 = vld [vmem:[%s13070_s3 + $0x460] ss:$8 sps:$4 sm:$0xff]  }
 0x406   : > { %3415 = vmatprep.subr.bf16.mxu0 %v9501_v57  ;;  %3650 = vmatprep.subr.bf16.mxu1 %v9504_v58  ;;  %v9586_v57 = vld [vmem:[%s13070_s3 + $0x560] ss:$8 sps:$4 sm:$0xff]   ;;  %v9591_v58 = vld [vmem:[%s13070_s3 + $0x474] ss:$8 sps:$4 sm:$0xff]  }
 0x409   : > { %3416 = vmatpush1.bf16.msra.mxu0 %v9499_v13  ;;  %3651 = vmatpush1.bf16.msra.mxu1 %v9502_v59  ;;  %v9594_v13 = vld [vmem:[%s13070_s3 + $0x574] ss:$8 sps:$4 sm:$0xff]   ;;  %v9589_v59 = vld [vmem:[%s13070_s3 + $0x470] ss:$8 sps:$4 sm:$0xff]  }
 0x40a   : > { %3417 = vmatprep.subr.bf16.mxu0 %v9507_v60  ;;  %3652 = vmatprep.subr.bf16.mxu1 %v9510_v61  ;;  %v9592_v60 = vld [vmem:[%s13070_s3 + $0x570] ss:$8 sps:$4 sm:$0xff]   ;;  %v9597_v61 = vld [vmem:[%s13070_s3 + $0x484] ss:$8 sps:$4 sm:$0xff]  }
 0x40d   : > { %3418 = vmatpush1.bf16.msra.mxu0 %v9505_v62  ;;  %3653 = vmatpush1.bf16.msra.mxu1 %v9508_v63  ;;  %v9600_v62 = vld [vmem:[%s13070_s3 + $0x584] ss:$8 sps:$4 sm:$0xff]   ;;  %v9595_v63 = vld [vmem:[%s13070_s3 + $0x480] ss:$8 sps:$4 sm:$0xff]  }
 0x40e   : > { %3419 = vmatprep.subr.bf16.mxu0 %v9513_v0  ;;  %3654 = vmatprep.subr.bf16.mxu1 %v9516_v1  ;;  %v9598_v0 = vld [vmem:[%s13070_s3 + $0x580] ss:$8 sps:$4 sm:$0xff]   ;;  %v9603_v1 = vld [vmem:[%s13070_s3 + $0x494] ss:$8 sps:$4 sm:$0xff]  }
 0x411   : > { %3420 = vmatpush1.bf16.msra.mxu0 %v9511_v2  ;;  %3655 = vmatpush1.bf16.msra.mxu1 %v9514_v3  ;;  %v9606_v2 = vld [vmem:[%s13070_s3 + $0x594] ss:$8 sps:$4 sm:$0xff]   ;;  %v9601_v3 = vld [vmem:[%s13070_s3 + $0x490] ss:$8 sps:$4 sm:$0xff]  }
 0x412   : > { %3421 = vmatprep.subr.bf16.mxu0 %v9519_v4  ;;  %3656 = vmatprep.subr.bf16.mxu1 %v9522_v5  ;;  %v9604_v4 = vld [vmem:[%s13070_s3 + $0x590] ss:$8 sps:$4 sm:$0xff]   ;;  %v9609_v5 = vld [vmem:[%s13070_s3 + $0x4a4] ss:$8 sps:$4 sm:$0xff]  }
 0x415   : > { %3422 = vmatpush1.bf16.msra.mxu0 %v9517_v6  ;;  %3657 = vmatpush1.bf16.msra.mxu1 %v9520_v7  ;;  %v9612_v6 = vld [vmem:[%s13070_s3 + $0x5a4] ss:$8 sps:$4 sm:$0xff]   ;;  %v9607_v7 = vld [vmem:[%s13070_s3 + $0x4a0] ss:$8 sps:$4 sm:$0xff]  }
 0x416   : > { %3423 = vmatprep.subr.bf16.mxu0 %v9525_v8  ;;  %3658 = vmatprep.subr.bf16.mxu1 %v9528_v9  ;;  %v9610_v8 = vld [vmem:[%s13070_s3 + $0x5a0] ss:$8 sps:$4 sm:$0xff]   ;;  %v9615_v9 = vld [vmem:[%s13070_s3 + $0x4b4] ss:$8 sps:$4 sm:$0xff]  }
 0x419   : > { %3424 = vmatpush1.bf16.msra.mxu0 %v9523_v10  ;;  %3659 = vmatpush1.bf16.msra.mxu1 %v9526_v11  ;;  %v9618_v10 = vld [vmem:[%s13070_s3 + $0x5b4] ss:$8 sps:$4 sm:$0xff]   ;;  %v9613_v11 = vld [vmem:[%s13070_s3 + $0x4b0] ss:$8 sps:$4 sm:$0xff]  }
 0x41a   : > { %3425 = vmatprep.subr.bf16.mxu0 %v9531_v12  ;;  %3660 = vmatprep.subr.bf16.mxu1 %v9534_v14  ;;  %v9616_v12 = vld [vmem:[%s13070_s3 + $0x5b0] ss:$8 sps:$4 sm:$0xff]   ;;  %v9621_v14 = vld [vmem:[%s13070_s3 + $0x4c4] ss:$8 sps:$4 sm:$0xff]  }
 0x41d   : > { %3426 = vmatpush1.bf16.msra.mxu0 %v9529_v15  ;;  %3661 = vmatpush1.bf16.msra.mxu1 %v9532_v17  ;;  %v9624_v15 = vld [vmem:[%s13070_s3 + $0x5c4] ss:$8 sps:$4 sm:$0xff]   ;;  %v9619_v17 = vld [vmem:[%s13070_s3 + $0x4c0] ss:$8 sps:$4 sm:$0xff]  }
 0x41e   : > { %3427 = vmatprep.subr.bf16.mxu0 %v9537_v18  ;;  %3662 = vmatprep.subr.bf16.mxu1 %v9540_v19  ;;  %v9622_v18 = vld [vmem:[%s13070_s3 + $0x5c0] ss:$8 sps:$4 sm:$0xff]   ;;  %v9627_v19 = vld [vmem:[%s13070_s3 + $0x4d4] ss:$8 sps:$4 sm:$0xff]  }
 0x421   : > { %3428 = vmatpush1.bf16.msra.mxu0 %v9535_v20  ;;  %3663 = vmatpush1.bf16.msra.mxu1 %v9538_v21  ;;  %v9630_v20 = vld [vmem:[%s13070_s3 + $0x5d4] ss:$8 sps:$4 sm:$0xff]   ;;  %v9625_v21 = vld [vmem:[%s13070_s3 + $0x4d0] ss:$8 sps:$4 sm:$0xff]  }
 0x422   : > { %3429 = vmatprep.subr.bf16.mxu0 %v9543_v22  ;;  %3664 = vmatprep.subr.bf16.mxu1 %v9546_v24  ;;  %v9628_v22 = vld [vmem:[%s13070_s3 + $0x5d0] ss:$8 sps:$4 sm:$0xff]   ;;  %v9633_v24 = vld [vmem:[%s13070_s3 + $0x4e4] ss:$8 sps:$4 sm:$0xff]  }
 0x425   : > { %3430 = vmatpush1.bf16.msra.mxu0 %v9541_v25  ;;  %3665 = vmatpush1.bf16.msra.mxu1 %v9544_v29  ;;  %v9636_v25 = vld [vmem:[%s13070_s3 + $0x5e4] ss:$8 sps:$4 sm:$0xff]   ;;  %v9631_v29 = vld [vmem:[%s13070_s3 + $0x4e0] ss:$8 sps:$4 sm:$0xff]  }
 0x426   : > { %3869 = vmatprep.subr.bf16.mxu0 %v9549_v30  ;;  %4104 = vmatprep.subr.bf16.mxu1 %v9552_v31  ;;  %v9634_v30 = vld [vmem:[%s13070_s3 + $0x5e0] ss:$8 sps:$4 sm:$0xff]   ;;  %v9639_v31 = vld [vmem:[%s13070_s3 + $0x4f4] ss:$8 sps:$4 sm:$0xff]  }
 0x428   : > { %3432 = vmatmul.mubr.bf16.vlgmr.msra.gmra.mrb[28].mxu0 %v11475_v26  ;;  %3667 = vmatmul.mubr.bf16.vlgmr.msra.gmra.mrb[28].mxu1 %v11475_v26 }
 0x429   : > { %3870 = vmatpush1.bf16.msra.mxu0 %v9547_v32  ;;  %3901 = vmatprep.mubr.bf16.mxu0 %v11467_v23  ;;  %v9642_v32 = vld [vmem:[%s13070_s3 + $0x5f4] ss:$8 sps:$4 sm:$0xff]  }
 0x42a   : > { %4105 = vmatpush1.bf16.msra.mxu1 %v9550_v33  ;;  %4136 = vmatprep.mubr.bf16.mxu1 %v11467_v23  ;;  %v9637_v33 = vld [vmem:[%s13070_s3 + $0x4f0] ss:$8 sps:$4 sm:$0xff]  }
 0x42b   : > { %3871 = vmatprep.subr.bf16.mxu0 %v9555_v34  ;;  %4106 = vmatprep.subr.bf16.mxu1 %v9558_v35  ;;  %v9640_v34 = vld [vmem:[%s13070_s3 + $0x5f0] ss:$8 sps:$4 sm:$0xff]   ;;  %v9645_v35 = vld [vmem:[%s13070_s3 + $0x604] ss:$8 sps:$4 sm:$0xff]  }
 0x42d   : > { %3872 = vmatpush1.bf16.msra.mxu0 %v9553_v36  ;;  %v9648_v36 = vld [vmem:[%s13070_s3 + $0x704] ss:$8 sps:$4 sm:$0xff]  }
 0x42e   : > { %4107 = vmatpush1.bf16.msra.mxu1 %v9556_v37  ;;  %3873 = vmatprep.subr.bf16.mxu0 %v9561_v38  ;;  %v9643_v37 = vld [vmem:[%s13070_s3 + $0x600] ss:$8 sps:$4 sm:$0xff]  }
 0x42f   : > { %4108 = vmatprep.subr.bf16.mxu1 %v9564_v39  ;;  %v9646_v38 = vld [vmem:[%s13070_s3 + $0x700] ss:$8 sps:$4 sm:$0xff]   ;;  %v9651_v39 = vld [vmem:[%s13070_s3 + $0x614] ss:$8 sps:$4 sm:$0xff]  }
 0x431   : > { %3874 = vmatpush1.bf16.msra.mxu0 %v9559_v40  ;;  %v9654_v40 = vld [vmem:[%s13070_s3 + $0x714] ss:$8 sps:$4 sm:$0xff]  }
 0x432   : > { %4109 = vmatpush1.bf16.msra.mxu1 %v9562_v41  ;;  %3875 = vmatprep.subr.bf16.mxu0 %v9567_v42  ;;  %v9649_v41 = vld [vmem:[%s13070_s3 + $0x610] ss:$8 sps:$4 sm:$0xff]  }
 0x433   : > { %4110 = vmatprep.subr.bf16.mxu1 %v9570_v43  ;;  %v9652_v42 = vld [vmem:[%s13070_s3 + $0x710] ss:$8 sps:$4 sm:$0xff]   ;;  %v9657_v43 = vld [vmem:[%s13070_s3 + $0x624] ss:$8 sps:$4 sm:$0xff]  }
 0x435   : > { %3876 = vmatpush1.bf16.msra.mxu0 %v9565_v44  ;;  %v9660_v44 = vld [vmem:[%s13070_s3 + $0x724] ss:$8 sps:$4 sm:$0xff]  }
 0x436   : > { %4111 = vmatpush1.bf16.msra.mxu1 %v9568_v45  ;;  %3877 = vmatprep.subr.bf16.mxu0 %v9573_v46  ;;  %v9655_v45 = vld [vmem:[%s13070_s3 + $0x620] ss:$8 sps:$4 sm:$0xff]  }
 0x437   : > { %4112 = vmatprep.subr.bf16.mxu1 %v9576_v47  ;;  %v9658_v46 = vld [vmem:[%s13070_s3 + $0x720] ss:$8 sps:$4 sm:$0xff]   ;;  %v9663_v47 = vld [vmem:[%s13070_s3 + $0x634] ss:$8 sps:$4 sm:$0xff]  }
 0x439   : > { %3878 = vmatpush1.bf16.msra.mxu0 %v9571_v48  ;;  %v9666_v48 = vld [vmem:[%s13070_s3 + $0x734] ss:$8 sps:$4 sm:$0xff]  }
 0x43a   : > { %4113 = vmatpush1.bf16.msra.mxu1 %v9574_v49  ;;  %3879 = vmatprep.subr.bf16.mxu0 %v9579_v50  ;;  %v9661_v49 = vld [vmem:[%s13070_s3 + $0x630] ss:$8 sps:$4 sm:$0xff]  }
 0x43b   : > { %4114 = vmatprep.subr.bf16.mxu1 %v9582_v51  ;;  %v9664_v50 = vld [vmem:[%s13070_s3 + $0x730] ss:$8 sps:$4 sm:$0xff]   ;;  %v9669_v51 = vld [vmem:[%s13070_s3 + $0x644] ss:$8 sps:$4 sm:$0xff]  }
 0x43d   : > { %3880 = vmatpush1.bf16.msra.mxu0 %v9577_v52  ;;  %v9672_v52 = vld [vmem:[%s13070_s3 + $0x744] ss:$8 sps:$4 sm:$0xff]  }
 0x43e   : > { %4115 = vmatpush1.bf16.msra.mxu1 %v9580_v53  ;;  %3881 = vmatprep.subr.bf16.mxu0 %v9585_v54  ;;  %v9667_v53 = vld [vmem:[%s13070_s3 + $0x640] ss:$8 sps:$4 sm:$0xff]  }
 0x43f   : > { %4116 = vmatprep.subr.bf16.mxu1 %v9588_v55  ;;  %v9670_v54 = vld [vmem:[%s13070_s3 + $0x740] ss:$8 sps:$4 sm:$0xff]   ;;  %v9675_v55 = vld [vmem:[%s13070_s3 + $0x654] ss:$8 sps:$4 sm:$0xff]  }
 0x441   : > { %3882 = vmatpush1.bf16.msra.mxu0 %v9583_v56  ;;  %v9678_v56 = vld [vmem:[%s13070_s3 + $0x754] ss:$8 sps:$4 sm:$0xff]  }
 0x442   : > { %4117 = vmatpush1.bf16.msra.mxu1 %v9586_v57  ;;  %3883 = vmatprep.subr.bf16.mxu0 %v9591_v58  ;;  %v9673_v57 = vld [vmem:[%s13070_s3 + $0x650] ss:$8 sps:$4 sm:$0xff]  }
 0x443   : > { %4118 = vmatprep.subr.bf16.mxu1 %v9594_v13  ;;  %v9676_v58 = vld [vmem:[%s13070_s3 + $0x750] ss:$8 sps:$4 sm:$0xff]   ;;  %v9681_v13 = vld [vmem:[%s13070_s3 + $0x664] ss:$8 sps:$4 sm:$0xff]  }
 0x445   : > { %3884 = vmatpush1.bf16.msra.mxu0 %v9589_v59  ;;  %v9684_v59 = vld [vmem:[%s13070_s3 + $0x764] ss:$8 sps:$4 sm:$0xff]  }
 0x446   : > { %4119 = vmatpush1.bf16.msra.mxu1 %v9592_v60  ;;  %3885 = vmatprep.subr.bf16.mxu0 %v9597_v61  ;;  %v9679_v60 = vld [vmem:[%s13070_s3 + $0x660] ss:$8 sps:$4 sm:$0xff]  }
 0x447   : > { %4120 = vmatprep.subr.bf16.mxu1 %v9600_v62  ;;  %v9682_v61 = vld [vmem:[%s13070_s3 + $0x760] ss:$8 sps:$4 sm:$0xff]   ;;  %v9687_v62 = vld [vmem:[%s13070_s3 + $0x674] ss:$8 sps:$4 sm:$0xff]  }
 0x449   : > { %3886 = vmatpush1.bf16.msra.mxu0 %v9595_v63  ;;  %v9690_v63 = vld [vmem:[%s13070_s3 + $0x774] ss:$8 sps:$4 sm:$0xff]  }
 0x44a   : > { %4121 = vmatpush1.bf16.msra.mxu1 %v9598_v0  ;;  %3887 = vmatprep.subr.bf16.mxu0 %v9603_v1  ;;  %v9685_v0 = vld [vmem:[%s13070_s3 + $0x670] ss:$8 sps:$4 sm:$0xff]  }
 0x44b   : > { %4122 = vmatprep.subr.bf16.mxu1 %v9606_v2  ;;  %v9688_v1 = vld [vmem:[%s13070_s3 + $0x770] ss:$8 sps:$4 sm:$0xff]   ;;  %v9693_v2 = vld [vmem:[%s13070_s3 + $0x684] ss:$8 sps:$4 sm:$0xff]  }
 0x44d   : > { %3888 = vmatpush1.bf16.msra.mxu0 %v9601_v3  ;;  %v9696_v3 = vld [vmem:[%s13070_s3 + $0x784] ss:$8 sps:$4 sm:$0xff]  }
 0x44e   : > { %4123 = vmatpush1.bf16.msra.mxu1 %v9604_v4  ;;  %3889 = vmatprep.subr.bf16.mxu0 %v9609_v5  ;;  %v9691_v4 = vld [vmem:[%s13070_s3 + $0x680] ss:$8 sps:$4 sm:$0xff]  }
 0x44f   : > { %4124 = vmatprep.subr.bf16.mxu1 %v9612_v6  ;;  %v9694_v5 = vld [vmem:[%s13070_s3 + $0x780] ss:$8 sps:$4 sm:$0xff]   ;;  %v9699_v6 = vld [vmem:[%s13070_s3 + $0x694] ss:$8 sps:$4 sm:$0xff]  }
 0x451   : > { %3890 = vmatpush1.bf16.msra.mxu0 %v9607_v7  ;;  %v9702_v7 = vld [vmem:[%s13070_s3 + $0x794] ss:$8 sps:$4 sm:$0xff]  }
 0x452   : > { %4125 = vmatpush1.bf16.msra.mxu1 %v9610_v8  ;;  %3891 = vmatprep.subr.bf16.mxu0 %v9615_v9  ;;  %v9697_v8 = vld [vmem:[%s13070_s3 + $0x690] ss:$8 sps:$4 sm:$0xff]  }
 0x453   : > { %4126 = vmatprep.subr.bf16.mxu1 %v9618_v10  ;;  %v9700_v9 = vld [vmem:[%s13070_s3 + $0x790] ss:$8 sps:$4 sm:$0xff]   ;;  %v9705_v10 = vld [vmem:[%s13070_s3 + $0x6a4] ss:$8 sps:$4 sm:$0xff]  }
 0x455   : > { %3892 = vmatpush1.bf16.msra.mxu0 %v9613_v11  ;;  %v9708_v11 = vld [vmem:[%s13070_s3 + $0x7a4] ss:$8 sps:$4 sm:$0xff]  }
 0x456   : > { %4127 = vmatpush1.bf16.msra.mxu1 %v9616_v12  ;;  %3893 = vmatprep.subr.bf16.mxu0 %v9621_v14  ;;  %v9703_v12 = vld [vmem:[%s13070_s3 + $0x6a0] ss:$8 sps:$4 sm:$0xff]  }
 0x457   : > { %4128 = vmatprep.subr.bf16.mxu1 %v9624_v15  ;;  %v9706_v14 = vld [vmem:[%s13070_s3 + $0x7a0] ss:$8 sps:$4 sm:$0xff]   ;;  %v9711_v15 = vld [vmem:[%s13070_s3 + $0x6b4] ss:$8 sps:$4 sm:$0xff]  }
 0x459   : > { %3894 = vmatpush1.bf16.msra.mxu0 %v9619_v17  ;;  %v9714_v17 = vld [vmem:[%s13070_s3 + $0x7b4] ss:$8 sps:$4 sm:$0xff]  }
 0x45a   : > { %4129 = vmatpush1.bf16.msra.mxu1 %v9622_v18  ;;  %3895 = vmatprep.subr.bf16.mxu0 %v9627_v19  ;;  %v9709_v18 = vld [vmem:[%s13070_s3 + $0x6b0] ss:$8 sps:$4 sm:$0xff]  }
 0x45b   : > { %4130 = vmatprep.subr.bf16.mxu1 %v9630_v20  ;;  %v9712_v19 = vld [vmem:[%s13070_s3 + $0x7b0] ss:$8 sps:$4 sm:$0xff]   ;;  %v9717_v20 = vld [vmem:[%s13070_s3 + $0x6c4] ss:$8 sps:$4 sm:$0xff]  }
 0x45d   : > { %3896 = vmatpush1.bf16.msra.mxu0 %v9625_v21  ;;  %v9720_v21 = vld [vmem:[%s13070_s3 + $0x7c4] ss:$8 sps:$4 sm:$0xff]  }
 0x45e   : > { %4131 = vmatpush1.bf16.msra.mxu1 %v9628_v22  ;;  %3897 = vmatprep.subr.bf16.mxu0 %v9633_v24  ;;  %v9715_v22 = vld [vmem:[%s13070_s3 + $0x6c0] ss:$8 sps:$4 sm:$0xff]  }
 0x45f   : > { %4132 = vmatprep.subr.bf16.mxu1 %v9636_v25  ;;  %v9718_v24 = vld [vmem:[%s13070_s3 + $0x7c0] ss:$8 sps:$4 sm:$0xff]   ;;  %v9723_v25 = vld [vmem:[%s13070_s3 + $0x6d4] ss:$8 sps:$4 sm:$0xff]  }
 0x461   : > { %3898 = vmatpush1.bf16.msra.mxu0 %v9631_v29  ;;  %v9726_v29 = vld [vmem:[%s13070_s3 + $0x7d4] ss:$8 sps:$4 sm:$0xff]  }
 0x462   : > { %4133 = vmatpush1.bf16.msra.mxu1 %v9634_v30  ;;  %3899 = vmatprep.subr.bf16.mxu0 %v9639_v31  ;;  %v9721_v30 = vld [vmem:[%s13070_s3 + $0x6d0] ss:$8 sps:$4 sm:$0xff]  }
 0x463   : > { %4134 = vmatprep.subr.bf16.mxu1 %v9642_v32  ;;  %v9724_v31 = vld [vmem:[%s13070_s3 + $0x7d0] ss:$8 sps:$4 sm:$0xff]   ;;  %v9729_v32 = vld [vmem:[%s13070_s3 + $0x6e4] ss:$8 sps:$4 sm:$0xff]  }
 0x465   : > { %3900 = vmatpush1.bf16.msra.mxu0 %v9637_v33  ;;  %v9732_v33 = vld [vmem:[%s13070_s3 + $0x7e4] ss:$8 sps:$4 sm:$0xff]  }
 0x466   : > { %4135 = vmatpush1.bf16.msra.mxu1 %v9640_v34  ;;  %4339 = vmatprep.subr.bf16.mxu0 %v9645_v35  ;;  %v9727_v34 = vld [vmem:[%s13070_s3 + $0x6e0] ss:$8 sps:$4 sm:$0xff]  }
 0x467   : > { %4574 = vmatprep.subr.bf16.mxu1 %v9648_v36  ;;  %v9730_v35 = vld [vmem:[%s13070_s3 + $0x7e0] ss:$8 sps:$4 sm:$0xff]   ;;  %v9735_v36 = vld [vmem:[%s13070_s3 + $0x6f4] ss:$8 sps:$4 sm:$0xff]  }
 0x468   : > { %3902 = vmatmul.mubr.bf16.vlgmr.msra.gmra.mrb[32].mxu0 %v11475_v26 }
 0x469   : > { %4137 = vmatmul.mubr.bf16.vlgmr.msra.gmra.mrb[32].mxu1 %v11475_v26  ;;  %4340 = vmatpush1.bf16.msra.mxu0 %v9643_v37  ;;  %v9738_v37 = vld [vmem:[%s13070_s3 + $0x7f4] ss:$8 sps:$4 sm:$0xff]  }
 0x46a   : > { %4371 = vmatprep.mubr.bf16.mxu0 %v11467_v23  ;;  %4575 = vmatpush1.bf16.msra.mxu1 %v9646_v38  ;;  %v9733_v38 = vld [vmem:[%s13070_s3 + $0x6f0] ss:$8 sps:$4 sm:$0xff]  }
 0x46b   : > { %4606 = vmatprep.mubr.bf16.mxu1 %v11467_v23  ;;  %4341 = vmatprep.subr.bf16.mxu0 %v9651_v39  ;;  %v9736_v39 = vld [vmem:[%s13070_s3 + $0x7f0] ss:$8 sps:$4 sm:$0xff]  }
 0x46c   : > { %4576 = vmatprep.subr.bf16.mxu1 %v9654_v40  ;;  %v9741_v40 = vld [vmem:[%s13070_s3 + $0x804] ss:$8 sps:$4 sm:$0xff]  }
 0x46d   : > { %4342 = vmatpush1.bf16.msra.mxu0 %v9649_v41  ;;  %v9739_v41 = vld [vmem:[%s13070_s3 + $0x800] ss:$8 sps:$4 sm:$0xff]  }
 0x46e   : > { %4577 = vmatpush1.bf16.msra.mxu1 %v9652_v42  ;;  %4343 = vmatprep.subr.bf16.mxu0 %v9657_v43  ;;  %v9744_v42 = vld [vmem:[%s13070_s3 + $0x814] ss:$8 sps:$4 sm:$0xff]   ;;  %v9742_v43 = vld [vmem:[%s13070_s3 + $0x810] ss:$8 sps:$4 sm:$0xff]  }
 0x46f   : > { %4578 = vmatprep.subr.bf16.mxu1 %v9660_v44  ;;  %v9747_v44 = vld [vmem:[%s13070_s3 + $0x824] ss:$8 sps:$4 sm:$0xff]  }
 0x471   : > { %4344 = vmatpush1.bf16.msra.mxu0 %v9655_v45  ;;  %v9745_v45 = vld [vmem:[%s13070_s3 + $0x820] ss:$8 sps:$4 sm:$0xff]  }
 0x472   : > { %4579 = vmatpush1.bf16.msra.mxu1 %v9658_v46  ;;  %4345 = vmatprep.subr.bf16.mxu0 %v9663_v47  ;;  %v9750_v46 = vld [vmem:[%s13070_s3 + $0x834] ss:$8 sps:$4 sm:$0xff]   ;;  %v9753_v47 = vld [vmem:[%s13070_s3 + $0x844] ss:$8 sps:$4 sm:$0xff]  }
 0x473   : > { %4580 = vmatprep.subr.bf16.mxu1 %v9666_v48  ;;  %v9751_v48 = vld [vmem:[%s13070_s3 + $0x840] ss:$8 sps:$4 sm:$0xff]  }
 0x475   : > { %4346 = vmatpush1.bf16.msra.mxu0 %v9661_v49  ;;  %v9756_v49 = vld [vmem:[%s13070_s3 + $0x854] ss:$8 sps:$4 sm:$0xff]  }
 0x476   : > { %4581 = vmatpush1.bf16.msra.mxu1 %v9664_v50  ;;  %4347 = vmatprep.subr.bf16.mxu0 %v9669_v51  ;;  %v9754_v50 = vld [vmem:[%s13070_s3 + $0x850] ss:$8 sps:$4 sm:$0xff]   ;;  %v9759_v51 = vld [vmem:[%s13070_s3 + $0x864] ss:$8 sps:$4 sm:$0xff]  }
 0x477   : > { %4582 = vmatprep.subr.bf16.mxu1 %v9672_v52 }
 0x479   : > { %4348 = vmatpush1.bf16.msra.mxu0 %v9667_v53 }
 0x47a   : > { %4583 = vmatpush1.bf16.msra.mxu1 %v9670_v54  ;;  %4349 = vmatprep.subr.bf16.mxu0 %v9675_v55 }
 0x47b   : > { %4584 = vmatprep.subr.bf16.mxu1 %v9678_v56 }
 0x47d   : > { %4350 = vmatpush1.bf16.msra.mxu0 %v9673_v57 }
 0x47e   : > { %4585 = vmatpush1.bf16.msra.mxu1 %v9676_v58  ;;  %4351 = vmatprep.subr.bf16.mxu0 %v9681_v13 }
 0x47f   : > { %4586 = vmatprep.subr.bf16.mxu1 %v9684_v59  ;;  %v9757_v59 = vld [vmem:[%s13070_s3 + $0x860] ss:$8 sps:$4 sm:$0xff]  }
 0x481   : > { %4352 = vmatpush1.bf16.msra.mxu0 %v9679_v60 }
 0x482   : > { %4587 = vmatpush1.bf16.msra.mxu1 %v9682_v61  ;;  %4353 = vmatprep.subr.bf16.mxu0 %v9687_v62  ;;  %v9762_v62 = vld [vmem:[%s13070_s3 + $0x874] ss:$8 sps:$4 sm:$0xff]  }
 0x483   : > { %4588 = vmatprep.subr.bf16.mxu1 %v9690_v63  ;;  %v9760_v63 = vld [vmem:[%s13070_s3 + $0x870] ss:$8 sps:$4 sm:$0xff]  }
 0x485   : > { %4354 = vmatpush1.bf16.msra.mxu0 %v9685_v0  ;;  %v9765_v0 = vld [vmem:[%s13070_s3 + $0x884] ss:$8 sps:$4 sm:$0xff]  }
 0x486   : > { %4589 = vmatpush1.bf16.msra.mxu1 %v9688_v1  ;;  %4355 = vmatprep.subr.bf16.mxu0 %v9693_v2  ;;  %v9763_v1 = vld [vmem:[%s13070_s3 + $0x880] ss:$8 sps:$4 sm:$0xff]   ;;  %v9768_v2 = vld [vmem:[%s13070_s3 + $0x894] ss:$8 sps:$4 sm:$0xff]  }
 0x487   : > { %4590 = vmatprep.subr.bf16.mxu1 %v9696_v3  ;;  %v9766_v3 = vld [vmem:[%s13070_s3 + $0x890] ss:$8 sps:$4 sm:$0xff]  }
 0x489   : > { %4356 = vmatpush1.bf16.msra.mxu0 %v9691_v4  ;;  %v9771_v4 = vld [vmem:[%s13070_s3 + $0x8a4] ss:$8 sps:$4 sm:$0xff]  }
 0x48a   : > { %4591 = vmatpush1.bf16.msra.mxu1 %v9694_v5  ;;  %4357 = vmatprep.subr.bf16.mxu0 %v9699_v6  ;;  %v9769_v5 = vld [vmem:[%s13070_s3 + $0x8a0] ss:$8 sps:$4 sm:$0xff]   ;;  %v9774_v6 = vld [vmem:[%s13070_s3 + $0x8b4] ss:$8 sps:$4 sm:$0xff]  }
 0x48b   : > { %4592 = vmatprep.subr.bf16.mxu1 %v9702_v7  ;;  %v9772_v7 = vld [vmem:[%s13070_s3 + $0x8b0] ss:$8 sps:$4 sm:$0xff]  }
 0x48d   : > { %4358 = vmatpush1.bf16.msra.mxu0 %v9697_v8  ;;  %v9777_v8 = vld [vmem:[%s13070_s3 + $0x8c4] ss:$8 sps:$4 sm:$0xff]  }
 0x48e   : > { %4593 = vmatpush1.bf16.msra.mxu1 %v9700_v9  ;;  %4359 = vmatprep.subr.bf16.mxu0 %v9705_v10  ;;  %v9775_v9 = vld [vmem:[%s13070_s3 + $0x8c0] ss:$8 sps:$4 sm:$0xff]   ;;  %v9780_v10 = vld [vmem:[%s13070_s3 + $0x8d4] ss:$8 sps:$4 sm:$0xff]  }
 0x48f   : > { %4594 = vmatprep.subr.bf16.mxu1 %v9708_v11  ;;  %v9778_v11 = vld [vmem:[%s13070_s3 + $0x8d0] ss:$8 sps:$4 sm:$0xff]  }
 0x491   : > { %4360 = vmatpush1.bf16.msra.mxu0 %v9703_v12  ;;  %v9783_v12 = vld [vmem:[%s13070_s3 + $0x8e4] ss:$8 sps:$4 sm:$0xff]  }
 0x492   : > { %4595 = vmatpush1.bf16.msra.mxu1 %v9706_v14  ;;  %4361 = vmatprep.subr.bf16.mxu0 %v9711_v15  ;;  %v9781_v14 = vld [vmem:[%s13070_s3 + $0x8e0] ss:$8 sps:$4 sm:$0xff]   ;;  %v9786_v15 = vld [vmem:[%s13070_s3 + $0x8f4] ss:$8 sps:$4 sm:$0xff]  }
 0x493   : > { %4596 = vmatprep.subr.bf16.mxu1 %v9714_v17  ;;  %v9784_v17 = vld [vmem:[%s13070_s3 + $0x8f0] ss:$8 sps:$4 sm:$0xff]  }
 0x495   : > { %4362 = vmatpush1.bf16.msra.mxu0 %v9709_v18 }
 0x496   : > { %4597 = vmatpush1.bf16.msra.mxu1 %v9712_v19  ;;  %4363 = vmatprep.subr.bf16.mxu0 %v9717_v20 }
 0x497   : > { %4598 = vmatprep.subr.bf16.mxu1 %v9720_v21 }
 0x499   : > { %4364 = vmatpush1.bf16.msra.mxu0 %v9715_v22 }
 0x49a   : > { %4599 = vmatpush1.bf16.msra.mxu1 %v9718_v24  ;;  %4365 = vmatprep.subr.bf16.mxu0 %v9723_v25 }
 0x49b   : > { %4600 = vmatprep.subr.bf16.mxu1 %v9726_v29 }
 0x49d   : > { %4366 = vmatpush1.bf16.msra.mxu0 %v9721_v30 }
 0x49e   : > { %4601 = vmatpush1.bf16.msra.mxu1 %v9724_v31  ;;  %4367 = vmatprep.subr.bf16.mxu0 %v9729_v32 }
 0x49f   : > { %4602 = vmatprep.subr.bf16.mxu1 %v9732_v33 }
 0x4a1   : > { %4368 = vmatpush1.bf16.msra.mxu0 %v9727_v34 }
 0x4a2   : > { %4603 = vmatpush1.bf16.msra.mxu1 %v9730_v35  ;;  %4369 = vmatprep.subr.bf16.mxu0 %v9735_v36 }
 0x4a3   : > { %4604 = vmatprep.subr.bf16.mxu1 %v9738_v37 }
 0x4a5   : > { %4370 = vmatpush1.bf16.msra.mxu0 %v9733_v38 }
 0x4a6   : > { %4605 = vmatpush1.bf16.msra.mxu1 %v9736_v39  ;;  %4809 = vmatprep.subr.bf16.mxu0 %v9741_v40 }
 0x4a8   : > { %4372 = vmatmul.mubr.bf16.vlgmr.msra.gmra.mrb[36].mxu0 %v11475_v26 }
 0x4a9   : > { %4607 = vmatmul.mubr.bf16.vlgmr.msra.gmra.mrb[36].mxu1 %v11475_v26  ;;  %4810 = vmatpush1.bf16.msra.mxu0 %v9739_v41  ;;  %v9787_v41 = vld [vmem:[%s13070_s3] ss:$8 sps:$4 sm:$0xff]  }
 0x4aa   : > { %4841 = vmatprep.mubr.bf16.mxu0 %v11467_v23  ;;  %4811 = vmatprep.subr.bf16.mxu0 %v9744_v42  ;;  %v9748_v23 = vld [vmem:[%s13070_s3 + $0x830] ss:$8 sps:$4 sm:$0xff]   ;;  %v9789_v42 = vld [vmem:[%s13070_s3 + $0x4] ss:$8 sps:$4 sm:$0xff]  }
 0x4ab   : > { %5140 = vmatprep.subr.bf16.mxu1 %v9789_v42  ;;  %v9840_v42 = vld [vmem:[%s13070_s3 + $0x184] ss:$8 sps:$4 sm:$0xff]  }
 0x4ac   : > { %5141 = vmatpush1.bf16.msra.mxu1 %v9787_v41  ;;  %v9832_v41 = vld [vmem:[%s13070_s3 + $0x170] ss:$8 sps:$4 sm:$0xff]  }
 0x4ad   : > { %4812 = vmatpush1.bf16.msra.mxu0 %v9742_v43  ;;  %v9795_v43 = vld [vmem:[%s13070_s3 + $0x14] ss:$8 sps:$4 sm:$0xff]  }
 0x4ae   : > { %4813 = vmatprep.subr.bf16.mxu0 %v9747_v44  ;;  %v9793_v44 = vld [vmem:[%s13070_s3 + $0x10] ss:$8 sps:$4 sm:$0xff]   ;;  %5142 = vmatprep.subr.bf16.mxu1 %v9795_v43  ;;  %v9838_v43 = vld [vmem:[%s13070_s3 + $0x180] ss:$8 sps:$4 sm:$0xff]  }
 0x4b0   : > { %5143 = vmatpush1.bf16.msra.mxu1 %v9793_v44  ;;  %v9846_v44 = vld [vmem:[%s13070_s3 + $0x194] ss:$8 sps:$4 sm:$0xff]  }
 0x4b1   : > { %4814 = vmatpush1.bf16.msra.mxu0 %v9745_v45  ;;  %v9801_v45 = vld [vmem:[%s13070_s3 + $0x24] ss:$8 sps:$4 sm:$0xff]  }
 0x4b2   : > { %4815 = vmatprep.subr.bf16.mxu0 %v9750_v46  ;;  %v9799_v46 = vld [vmem:[%s13070_s3 + $0x20] ss:$8 sps:$4 sm:$0xff]   ;;  %5144 = vmatprep.subr.bf16.mxu1 %v9801_v45  ;;  %v9844_v45 = vld [vmem:[%s13070_s3 + $0x190] ss:$8 sps:$4 sm:$0xff]  }
 0x4b4   : > { %5145 = vmatpush1.bf16.msra.mxu1 %v9799_v46  ;;  %v9852_v46 = vld [vmem:[%s13070_s3 + $0x1a4] ss:$8 sps:$4 sm:$0xff]  }
 0x4b5   : > { %4816 = vmatpush1.bf16.msra.mxu0 %v9748_v23  ;;  %v9807_v23 = vld [vmem:[%s13070_s3 + $0x34] ss:$8 sps:$4 sm:$0xff]  }
 0x4b6   : > { %4817 = vmatprep.subr.bf16.mxu0 %v9753_v47  ;;  %v9805_v47 = vld [vmem:[%s13070_s3 + $0x30] ss:$8 sps:$4 sm:$0xff]   ;;  %5146 = vmatprep.subr.bf16.mxu1 %v9807_v23  ;;  %v9850_v23 = vld [vmem:[%s13070_s3 + $0x1a0] ss:$8 sps:$4 sm:$0xff]  }
 0x4b8   : > { %5147 = vmatpush1.bf16.msra.mxu1 %v9805_v47  ;;  %v9858_v47 = vld [vmem:[%s13070_s3 + $0x1b4] ss:$8 sps:$4 sm:$0xff]  }
 0x4b9   : > { %4818 = vmatpush1.bf16.msra.mxu0 %v9751_v48  ;;  %v9813_v48 = vld [vmem:[%s13070_s3 + $0x44] ss:$8 sps:$4 sm:$0xff]  }
 0x4ba   : > { %4819 = vmatprep.subr.bf16.mxu0 %v9756_v49  ;;  %v9811_v49 = vld [vmem:[%s13070_s3 + $0x40] ss:$8 sps:$4 sm:$0xff]   ;;  %5148 = vmatprep.subr.bf16.mxu1 %v9813_v48  ;;  %v9856_v48 = vld [vmem:[%s13070_s3 + $0x1b0] ss:$8 sps:$4 sm:$0xff]  }
 0x4bb   : > { %v2963_v52 = vpop.f32.mrb[24].mxu0  ;;  %v3198_v53 = vpop.f32.mrb[24].mxu1 }
 0x4bc   : > { %v4870_v54 = vpack.c.bf16 %v3198_v53, %v2963_v52  ;;  %v2965_v55 = vpop.f32.mrb[25].mxu0  ;;  %v3200_v56 = vpop.f32.mrb[25].mxu1  ;;  %5149 = vmatpush1.bf16.msra.mxu1 %v9811_v49  ;;  %v9825_v52 = vld [vmem:[%s13070_s3 + $0x64] ss:$8 sps:$4 sm:$0xff]   ;;  %v9823_v53 = vld [vmem:[%s13070_s3 + $0x60] ss:$8 sps:$4 sm:$0xff]  }
 0x4bd   : > { %v4871_v57 = vpack.c.bf16 %v3200_v56, %v2965_v55  ;;  %4820 = vmatpush1.bf16.msra.mxu0 %v9754_v50  ;;  %v2967_v58 = vpop.f32.mrb[26].mxu0  ;;  %v3202_v13 = vpop.f32.mrb[26].mxu1  ;;  %v9819_v50 = vld [vmem:[%s13070_s3 + $0x54] ss:$8 sps:$4 sm:$0xff]   ;;  %v9829_v55 = vld [vmem:[%s13070_s3 + $0x70] ss:$8 sps:$4 sm:$0xff]  }
 0x4be   : > { %v2968_v60 = vpop.f32.mrb[27].mxu0  ;;  %v3203_v61 = vpop.f32.mrb[27].mxu1  ;;  %4821 = vmatprep.subr.bf16.mxu0 %v9759_v51  ;;  %v9817_v51 = vld [vmem:[%s13070_s3 + $0x50] ss:$8 sps:$4 sm:$0xff]   ;;  %5150 = vmatprep.subr.bf16.mxu1 %v9819_v50  ;;  %v9837_v56 = vld [vmem:[%s13070_s3 + $0x84] ss:$8 sps:$4 sm:$0xff]  }
 0x4bf   : > { %v9843_v58 = vld [vmem:[%s13070_s3 + $0x94] ss:$8 sps:$4 sm:$0xff]   ;;  %v9841_v13 = vld [vmem:[%s13070_s3 + $0x90] ss:$8 sps:$4 sm:$0xff]   ;;  %v9847_v60 = vld [vmem:[%s13070_s3 + $0xa0] ss:$8 sps:$4 sm:$0xff]  }
 0x4c0   : > { %5151 = vmatpush1.bf16.msra.mxu1 %v9817_v51  ;;  %v9855_v61 = vld [vmem:[%s13070_s3 + $0xb4] ss:$8 sps:$4 sm:$0xff]   ;;  %v9864_v49 = vld [vmem:[%s13070_s3 + $0x1c4] ss:$8 sps:$4 sm:$0xff]   ;;  %v9862_v50 = vld [vmem:[%s13070_s3 + $0x1c0] ss:$8 sps:$4 sm:$0xff]  }
 0x4c1   : > { %4822 = vmatpush1.bf16.msra.mxu0 %v9757_v59  ;;  %5152 = vmatprep.subr.bf16.mxu1 %v9825_v52  ;;  %v9849_v59 = vld [vmem:[%s13070_s3 + $0xa4] ss:$8 sps:$4 sm:$0xff]   ;;  %v9870_v51 = vld [vmem:[%s13070_s3 + $0x1d4] ss:$8 sps:$4 sm:$0xff]   ;;  %v9868_v52 = vld [vmem:[%s13070_s3 + $0x1d0] ss:$8 sps:$4 sm:$0xff]  }
 0x4c2   : > { %4823 = vmatprep.subr.bf16.mxu0 %v9762_v62  ;;  %v9853_v62 = vld [vmem:[%s13070_s3 + $0xb0] ss:$8 sps:$4 sm:$0xff]  }
 0x4c4   : > { %5153 = vmatpush1.bf16.msra.mxu1 %v9823_v53  ;;  %v9873_v53 = vld [vmem:[%s13070_s3 + $0xe4] ss:$8 sps:$4 sm:$0xff]  }
 0x4c5   : > { %4824 = vmatpush1.bf16.msra.mxu0 %v9760_v63  ;;  %v9861_v63 = vld [vmem:[%s13070_s3 + $0xc4] ss:$8 sps:$4 sm:$0xff]  }
 0x4c6   : > { %4825 = vmatprep.subr.bf16.mxu0 %v9765_v0  ;;  %v9859_v0 = vld [vmem:[%s13070_s3 + $0xc0] ss:$8 sps:$4 sm:$0xff]  }
 0x4c9   : > { %4826 = vmatpush1.bf16.msra.mxu0 %v9763_v1  ;;  %v9867_v1 = vld [vmem:[%s13070_s3 + $0xd4] ss:$8 sps:$4 sm:$0xff]  }
 0x4ca   : > { %4827 = vmatprep.subr.bf16.mxu0 %v9768_v2  ;;  %v9865_v2 = vld [vmem:[%s13070_s3 + $0xd0] ss:$8 sps:$4 sm:$0xff]  }
 0x4cd   : > { %4828 = vmatpush1.bf16.msra.mxu0 %v9766_v3 }
 0x4ce   : > { %4829 = vmatprep.subr.bf16.mxu0 %v9771_v4 }
 0x4d1   : > { %4830 = vmatpush1.bf16.msra.mxu0 %v9769_v5 }
 0x4d2   : > { %4831 = vmatprep.subr.bf16.mxu0 %v9774_v6 }
 0x4d5   : > { %4832 = vmatpush1.bf16.msra.mxu0 %v9772_v7 }
 0x4d6   : > { %4833 = vmatprep.subr.bf16.mxu0 %v9777_v8 }
 0x4d9   : > { %4834 = vmatpush1.bf16.msra.mxu0 %v9775_v9 }
 0x4da   : > { %4835 = vmatprep.subr.bf16.mxu0 %v9780_v10 }
 0x4dd   : > { %4836 = vmatpush1.bf16.msra.mxu0 %v9778_v11 }
 0x4de   : > { %4837 = vmatprep.subr.bf16.mxu0 %v9783_v12 }
 0x4e1   : > { %4838 = vmatpush1.bf16.msra.mxu0 %v9781_v14 }
 0x4e2   : > { %4839 = vmatprep.subr.bf16.mxu0 %v9786_v15 }
 0x4e5   : > { %4840 = vmatpush1.bf16.msra.mxu0 %v9784_v17 }
 0x4e6   : > { %4889 = vmatprep.subr.bf16.mxu0 %v4871_v57  ;;  %v9835_v57 = vld [vmem:[%s13070_s3 + $0x80] ss:$8 sps:$4 sm:$0xff]  }
 0x4e8   : > { %4842 = vmatmul.mubr.bf16.vlgmr.msra.gmra.mrb[40].mxu0 %v11475_v26 }
 0x4e9   : > { %4890 = vmatpush1.bf16.msra.mxu0 %v4870_v54  ;;  %4921 = vmatprep.mubr.bf16.mxu0 %v10234_v16  ;;  %v9831_v54 = vld [vmem:[%s13070_s3 + $0x74] ss:$8 sps:$4 sm:$0xff]  }
 0x4ea   : > { %5154 = vmatprep.subr.bf16.mxu1 %v9831_v54  ;;  %v9876_v54 = vld [vmem:[%s13070_s3 + $0x1e4] ss:$8 sps:$4 sm:$0xff]  }
 0x4eb   : > { %5155 = vmatpush1.bf16.msra.mxu1 %v9829_v55  ;;  %v9871_v55 = vld [vmem:[%s13070_s3 + $0xe0] ss:$8 sps:$4 sm:$0xff]  }
 0x4ec   : > { %5156 = vmatprep.subr.bf16.mxu1 %v9837_v56  ;;  %v9874_v56 = vld [vmem:[%s13070_s3 + $0x1e0] ss:$8 sps:$4 sm:$0xff]  }
 0x4ef   : > { %5157 = vmatpush1.bf16.msra.mxu1 %v9835_v57  ;;  %v9879_v57 = vld [vmem:[%s13070_s3 + $0xf4] ss:$8 sps:$4 sm:$0xff]  }
 0x4f0   : > { %5158 = vmatprep.subr.bf16.mxu1 %v9843_v58  ;;  %v9882_v58 = vld [vmem:[%s13070_s3 + $0x1f4] ss:$8 sps:$4 sm:$0xff]  }
 0x4f3   : > { %5159 = vmatpush1.bf16.msra.mxu1 %v9841_v13  ;;  %v9877_v13 = vld [vmem:[%s13070_s3 + $0xf0] ss:$8 sps:$4 sm:$0xff]  }
 0x4f4   : > { %5160 = vmatprep.subr.bf16.mxu1 %v9849_v59  ;;  %v9880_v59 = vld [vmem:[%s13070_s3 + $0x1f0] ss:$8 sps:$4 sm:$0xff]  }
 0x4f7   : > { %5161 = vmatpush1.bf16.msra.mxu1 %v9847_v60  ;;  %v9885_v60 = vld [vmem:[%s13070_s3 + $0x204] ss:$8 sps:$4 sm:$0xff]  }
 0x4f8   : > { %5162 = vmatprep.subr.bf16.mxu1 %v9855_v61  ;;  %v9888_v61 = vld [vmem:[%s13070_s3 + $0x304] ss:$8 sps:$4 sm:$0xff]  }
 0x4fb   : > { %v3433_v18 = vpop.f32.mrb[28].mxu0  ;;  %v3668_v19 = vpop.f32.mrb[28].mxu1  ;;  %5163 = vmatpush1.bf16.msra.mxu1 %v9853_v62 }
 0x4fc   : > { %v4872_v20 = vpack.c.bf16 %v3668_v19, %v3433_v18  ;;  %v3435_v21 = vpop.f32.mrb[29].mxu0  ;;  %v3670_v22 = vpop.f32.mrb[29].mxu1  ;;  %5164 = vmatprep.subr.bf16.mxu1 %v9861_v63 }
 0x4fd   : > { %v4873_v24 = vpack.c.bf16 %v3670_v22, %v3435_v21  ;;  %v3437_v25 = vpop.f32.mrb[30].mxu0  ;;  %v3672_v29 = vpop.f32.mrb[30].mxu1 }
 0x4fe   : > { %v3438_v30 = vpop.f32.mrb[31].mxu0  ;;  %v3673_v31 = vpop.f32.mrb[31].mxu1  ;;  %v9790_v25 = vld [vmem:[%s13070_s3 + $0x100] ss:$8 sps:$4 sm:$0xff]   ;;  %v9798_v29 = vld [vmem:[%s13070_s3 + $0x114] ss:$8 sps:$4 sm:$0xff]  }
 0x4ff   : > { %4891 = vmatprep.subr.bf16.mxu0 %v4873_v24  ;;  %5165 = vmatpush1.bf16.msra.mxu1 %v9859_v0  ;;  %v2736_v24 = vld [vmem:[%s13072_s5] sm:$0xf]  ;;  %v9796_v30 = vld [vmem:[%s13070_s3 + $0x110] ss:$8 sps:$4 sm:$0xff]   ;;  %v9804_v31 = vld [vmem:[%s13070_s3 + $0x124] ss:$8 sps:$4 sm:$0xff]   ;;  %v4932_v62 = vpop.permute.xlu1 %4931 }
 0x500   : > { %4892 = vmatpush1.bf16.msra.mxu0 %v4872_v20  ;;  %5166 = vmatprep.subr.bf16.mxu1 %v9867_v1  ;;  %v9792_v20 = vld [vmem:[%s13070_s3 + $0x104] ss:$8 sps:$4 sm:$0xff]  }
 0x503   : > { %5167 = vmatpush1.bf16.msra.mxu1 %v9865_v2  ;;  %v4938_v2 = vpop.permute.xlu1 %4937 }
 0x504   : > { %5168 = vmatprep.subr.bf16.mxu1 %v9873_v53  ;;  %v9940_v53 = vld [vmem:[%s13070_s3 + $0x390] ss:$8 sps:$4 sm:$0xff]  }
 0x507   : > { %5169 = vmatpush1.bf16.msra.mxu1 %v9871_v55  ;;  %v9948_v55 = vld [vmem:[%s13070_s3 + $0x3a4] ss:$8 sps:$4 sm:$0xff]  }
 0x508   : > { %5170 = vmatprep.subr.bf16.mxu1 %v9879_v57  ;;  %v9946_v57 = vld [vmem:[%s13070_s3 + $0x3a0] ss:$8 sps:$4 sm:$0xff]  }
 0x50b   : > { %5171 = vmatpush1.bf16.msra.mxu1 %v9877_v13  ;;  %v9954_v13 = vld [vmem:[%s13070_s3 + $0x3b4] ss:$8 sps:$4 sm:$0xff]  }
 0x50c   : > { %5610 = vmatprep.subr.bf16.mxu1 %v9885_v60  ;;  %v9952_v60 = vld [vmem:[%s13070_s3 + $0x3b0] ss:$8 sps:$4 sm:$0xff]  }
 0x53b   : > { %v3903_v32 = vpop.f32.mrb[32].mxu0 }
 0x53c   : > { %v4138_v33 = vpop.f32.mrb[32].mxu1  ;;  %v3905_v34 = vpop.f32.mrb[33].mxu0 }
 0x53d   : > { %v4874_v35 = vpack.c.bf16 %v4138_v33, %v3903_v32  ;;  %v4140_v26 = vpop.f32.mrb[33].mxu1  ;;  %v3907_v36 = vpop.f32.mrb[34].mxu0  ;;  %v9802_v32 = vld [vmem:[%s13070_s3 + $0x120] ss:$8 sps:$4 sm:$0xff]   ;;  %v9810_v33 = vld [vmem:[%s13070_s3 + $0x134] ss:$8 sps:$4 sm:$0xff]  }
 0x53e   : > { %v4875_v37 = vpack.c.bf16 %v4140_v26, %v3905_v34  ;;  %v4142_v38 = vpop.f32.mrb[34].mxu1  ;;  %v3908_v39 = vpop.f32.mrb[35].mxu0  ;;  %v9808_v34 = vld [vmem:[%s13070_s3 + $0x130] ss:$8 sps:$4 sm:$0xff]   ;;  %v9814_v26 = vld [vmem:[%s13070_s3 + $0x140] ss:$8 sps:$4 sm:$0xff]  }
 0x53f   : > { %v4143_v40 = vpop.f32.mrb[35].mxu1  ;;  %v9822_v36 = vld [vmem:[%s13070_s3 + $0x154] ss:$8 sps:$4 sm:$0xff]   ;;  %v9828_v38 = vld [vmem:[%s13070_s3 + $0x164] ss:$8 sps:$4 sm:$0xff]  }
 0x540   : > { %4893 = vmatprep.subr.bf16.mxu0 %v4875_v37  ;;  %v9820_v37 = vld [vmem:[%s13070_s3 + $0x150] ss:$8 sps:$4 sm:$0xff]   ;;  %v9826_v39 = vld [vmem:[%s13070_s3 + $0x160] ss:$8 sps:$4 sm:$0xff]   ;;  %v9834_v40 = vld [vmem:[%s13070_s3 + $0x174] ss:$8 sps:$4 sm:$0xff]  }
 0x541   : > { %4894 = vmatpush1.bf16.msra.mxu0 %v4874_v35  ;;  %v9816_v35 = vld [vmem:[%s13070_s3 + $0x144] ss:$8 sps:$4 sm:$0xff]  }
 0x57b   : > { %v4373_v3 = vpop.f32.mrb[36].mxu0 }
 0x57c   : > { %v4608_v4 = vpop.f32.mrb[36].mxu1  ;;  %v4375_v5 = vpop.f32.mrb[37].mxu0 }
 0x57d   : > { %v4876_v6 = vpack.c.bf16 %v4608_v4, %v4373_v3  ;;  %v4610_v7 = vpop.f32.mrb[37].mxu1  ;;  %v4377_v8 = vpop.f32.mrb[38].mxu0 }
 0x57e   : > { %v4877_v9 = vpack.c.bf16 %v4610_v7, %v4375_v5  ;;  %v4612_v10 = vpop.f32.mrb[38].mxu1  ;;  %v4378_v11 = vpop.f32.mrb[39].mxu0 }
 0x57f   : > { %v4613_v12 = vpop.f32.mrb[39].mxu1  ;;  %v9883_v11 = vld [vmem:[%s13070_s3 + $0x200] ss:$8 sps:$4 sm:$0xff]  }
 0x580   : > { %4895 = vmatprep.subr.bf16.mxu0 %v4877_v9  ;;  %v9886_v12 = vld [vmem:[%s13070_s3 + $0x300] ss:$8 sps:$4 sm:$0xff]  }
 0x581   : > { %4896 = vmatpush1.bf16.msra.mxu0 %v4876_v6 }
 0x5bb   : > { %v4843_v14 = vpop.f32.mrb[40].mxu0 }
 0x5bc   : > { %v4878_v15 = vpack.c.bf16 %v4843_v14, %v4843_v14  ;;  %v4845_v17 = vpop.f32.mrb[41].mxu0 }
 0x5bd   : > { %v4879_v18 = vpack.c.bf16 %v4845_v17, %v4845_v17  ;;  %v4847_v19 = vpop.f32.mrb[42].mxu0  ;;  %v9894_v17 = vld [vmem:[%s13070_s3 + $0x314] ss:$8 sps:$4 sm:$0xff]  }
 0x5be   : > { %v4884_v21 = vsel %vm427_vm1, %v4878_v15, 0  ;;  %v4848_v22 = vpop.f32.mrb[43].mxu0  ;;  %v9891_v15 = vld [vmem:[%s13070_s3 + $0x214] ss:$8 sps:$4 sm:$0xff]   ;;  %v9892_v19 = vld [vmem:[%s13070_s3 + $0x310] ss:$8 sps:$4 sm:$0xff]  }
 0x5bf   : > { %8330 = vmatprep.subr.msk.bf16.mxu0 %vm427_vm1, %v4879_v18  ;;  %v9889_v18 = vld [vmem:[%s13070_s3 + $0x210] ss:$8 sps:$4 sm:$0xff]   ;;  %v9895_v22 = vld [vmem:[%s13070_s3 + $0x220] ss:$8 sps:$4 sm:$0xff]  }
 0x5c0   : > { %4898 = vmatpush1.bf16.msra.mxu0 %v4884_v21  ;;  %v9900_v21 = vld [vmem:[%s13070_s3 + $0x324] ss:$8 sps:$4 sm:$0xff]  }
 0x5c1   : > { %5375 = vmatprep.subr.bf16.mxu0 %v9792_v20  ;;  %v9897_v20 = vld [vmem:[%s13070_s3 + $0x224] ss:$8 sps:$4 sm:$0xff]  }
 0x5c3   : > { %8331 = vmatmul.mubr.msk.bf16.vlgmr.msra.gmra.mrb[44].mxu0 %vm2669_vm3, %v2736_v24  ;;  %v9898_v24 = vld [vmem:[%s13070_s3 + $0x320] ss:$8 sps:$4 sm:$0xff]  }
 0x5c4   : > { %5376 = vmatpush1.bf16.msra.mxu0 %v9790_v25  ;;  %v9903_v25 = vld [vmem:[%s13070_s3 + $0x234] ss:$8 sps:$4 sm:$0xff]  }
 0x5c5   : > { %5377 = vmatprep.subr.bf16.mxu0 %v9798_v29  ;;  %v9906_v29 = vld [vmem:[%s13070_s3 + $0x334] ss:$8 sps:$4 sm:$0xff]  }
 0x5c8   : > { %5378 = vmatpush1.bf16.msra.mxu0 %v9796_v30  ;;  %v9901_v30 = vld [vmem:[%s13070_s3 + $0x230] ss:$8 sps:$4 sm:$0xff]  }
 0x5c9   : > { %5379 = vmatprep.subr.bf16.mxu0 %v9804_v31  ;;  %v9904_v31 = vld [vmem:[%s13070_s3 + $0x330] ss:$8 sps:$4 sm:$0xff]  }
 0x5cc   : > { %5380 = vmatpush1.bf16.msra.mxu0 %v9802_v32  ;;  %v9909_v32 = vld [vmem:[%s13070_s3 + $0x244] ss:$8 sps:$4 sm:$0xff]  }
 0x5cd   : > { %5381 = vmatprep.subr.bf16.mxu0 %v9810_v33  ;;  %v9912_v33 = vld [vmem:[%s13070_s3 + $0x344] ss:$8 sps:$4 sm:$0xff]  }
 0x5d0   : > { %5382 = vmatpush1.bf16.msra.mxu0 %v9808_v34  ;;  %v9907_v34 = vld [vmem:[%s13070_s3 + $0x240] ss:$8 sps:$4 sm:$0xff]  }
 0x5d1   : > { %5383 = vmatprep.subr.bf16.mxu0 %v9816_v35  ;;  %v9910_v35 = vld [vmem:[%s13070_s3 + $0x340] ss:$8 sps:$4 sm:$0xff]  }
 0x5d4   : > { %5384 = vmatpush1.bf16.msra.mxu0 %v9814_v26  ;;  %v9915_v26 = vld [vmem:[%s13070_s3 + $0x254] ss:$8 sps:$4 sm:$0xff]  }
 0x5d5   : > { %5385 = vmatprep.subr.bf16.mxu0 %v9822_v36  ;;  %v9918_v36 = vld [vmem:[%s13070_s3 + $0x354] ss:$8 sps:$4 sm:$0xff]  }
 0x5d8   : > { %5386 = vmatpush1.bf16.msra.mxu0 %v9820_v37  ;;  %v9913_v37 = vld [vmem:[%s13070_s3 + $0x250] ss:$8 sps:$4 sm:$0xff]  }
 0x5d9   : > { %5387 = vmatprep.subr.bf16.mxu0 %v9828_v38  ;;  %v9916_v38 = vld [vmem:[%s13070_s3 + $0x350] ss:$8 sps:$4 sm:$0xff]  }
 0x5dc   : > { %5388 = vmatpush1.bf16.msra.mxu0 %v9826_v39  ;;  %v9921_v39 = vld [vmem:[%s13070_s3 + $0x264] ss:$8 sps:$4 sm:$0xff]  }
 0x5dd   : > { %5389 = vmatprep.subr.bf16.mxu0 %v9834_v40  ;;  %v9924_v40 = vld [vmem:[%s13070_s3 + $0x364] ss:$8 sps:$4 sm:$0xff]  }
 0x5e0   : > { %5390 = vmatpush1.bf16.msra.mxu0 %v9832_v41  ;;  %v9919_v41 = vld [vmem:[%s13070_s3 + $0x260] ss:$8 sps:$4 sm:$0xff]  }
 0x5e1   : > { %5391 = vmatprep.subr.bf16.mxu0 %v9840_v42  ;;  %v9922_v42 = vld [vmem:[%s13070_s3 + $0x360] ss:$8 sps:$4 sm:$0xff]  }
 0x5e4   : > { %5392 = vmatpush1.bf16.msra.mxu0 %v9838_v43  ;;  %v9927_v43 = vld [vmem:[%s13070_s3 + $0x274] ss:$8 sps:$4 sm:$0xff]  }
 0x5e5   : > { %5393 = vmatprep.subr.bf16.mxu0 %v9846_v44  ;;  %v9930_v44 = vld [vmem:[%s13070_s3 + $0x374] ss:$8 sps:$4 sm:$0xff]  }
 0x5e8   : > { %5394 = vmatpush1.bf16.msra.mxu0 %v9844_v45  ;;  %v9925_v45 = vld [vmem:[%s13070_s3 + $0x270] ss:$8 sps:$4 sm:$0xff]  }
 0x5e9   : > { %5395 = vmatprep.subr.bf16.mxu0 %v9852_v46  ;;  %v9928_v46 = vld [vmem:[%s13070_s3 + $0x370] ss:$8 sps:$4 sm:$0xff]  }
 0x5ec   : > { %5396 = vmatpush1.bf16.msra.mxu0 %v9850_v23  ;;  %v9933_v23 = vld [vmem:[%s13070_s3 + $0x284] ss:$8 sps:$4 sm:$0xff]  }
 0x5ed   : > { %5397 = vmatprep.subr.bf16.mxu0 %v9858_v47  ;;  %v9936_v47 = vld [vmem:[%s13070_s3 + $0x384] ss:$8 sps:$4 sm:$0xff]  }
 0x5f0   : > { %5398 = vmatpush1.bf16.msra.mxu0 %v9856_v48  ;;  %v9931_v48 = vld [vmem:[%s13070_s3 + $0x280] ss:$8 sps:$4 sm:$0xff]  }
 0x5f1   : > { %5399 = vmatprep.subr.bf16.mxu0 %v9864_v49  ;;  %v9934_v49 = vld [vmem:[%s13070_s3 + $0x380] ss:$8 sps:$4 sm:$0xff]  }
 0x5f4   : > { %5400 = vmatpush1.bf16.msra.mxu0 %v9862_v50  ;;  %v9939_v50 = vld [vmem:[%s13070_s3 + $0x294] ss:$8 sps:$4 sm:$0xff]  }
 0x5f5   : > { %5401 = vmatprep.subr.bf16.mxu0 %v9870_v51  ;;  %v9942_v51 = vld [vmem:[%s13070_s3 + $0x394] ss:$8 sps:$4 sm:$0xff]  }
 0x5f8   : > { %5402 = vmatpush1.bf16.msra.mxu0 %v9868_v52  ;;  %v9937_v52 = vld [vmem:[%s13070_s3 + $0x290] ss:$8 sps:$4 sm:$0xff]  }
 0x5f9   : > { %5403 = vmatprep.subr.bf16.mxu0 %v9876_v54  ;;  %v9945_v54 = vld [vmem:[%s13070_s3 + $0x2a4] ss:$8 sps:$4 sm:$0xff]  }
 0x5fc   : > { %5404 = vmatpush1.bf16.msra.mxu0 %v9874_v56  ;;  %v9943_v56 = vld [vmem:[%s13070_s3 + $0x2a0] ss:$8 sps:$4 sm:$0xff]  }
 0x5fd   : > { %5405 = vmatprep.subr.bf16.mxu0 %v9882_v58  ;;  %v9951_v58 = vld [vmem:[%s13070_s3 + $0x2b4] ss:$8 sps:$4 sm:$0xff]  }
 0x600   : > { %5406 = vmatpush1.bf16.msra.mxu0 %v9880_v59  ;;  %v9949_v59 = vld [vmem:[%s13070_s3 + $0x2b0] ss:$8 sps:$4 sm:$0xff]  }
 0x601   : > { %5845 = vmatprep.subr.bf16.mxu0 %v9888_v61  ;;  %v9957_v61 = vld [vmem:[%s13070_s3 + $0x2c4] ss:$8 sps:$4 sm:$0xff]  }
 0x696   : > { %v4923_v63 = vpop.f32.mrb[44].mxu0 }
 0x697   : > { %v4934_v0 = vmul.f32 %v4932_v62, %v4923_v63  ;;  %v4925_v1 = vpop.f32.mrb[45].mxu0  ;;  %v9955_v63 = vld [vmem:[%s13070_s3 + $0x2c0] ss:$8 sps:$4 sm:$0xff]  }
 0x698   : > { %v4935_v3 = vmul.f32 %v4932_v62, %v4925_v1  ;;  %v4927_v4 = vpop.f32.mrb[46].mxu0  ;;  %v9960_v62 = vld [vmem:[%s13070_s3 + $0x3c4] ss:$8 sps:$4 sm:$0xff]   ;;  %v9963_v1 = vld [vmem:[%s13070_s3 + $0x2d4] ss:$8 sps:$4 sm:$0xff]  }
 0x699   : > { %v4940_v5 = vadd.f32 %v4938_v2, %v4934_v0  ;;  %v4928_v6 = vpop.f32.mrb[47].mxu0  ;;  %v9958_v0 = vld [vmem:[%s13070_s3 + $0x3c0] ss:$8 sps:$4 sm:$0xff]   ;;  %v9964_v4 = vld [vmem:[%s13070_s3 + $0x3d0] ss:$8 sps:$4 sm:$0xff]  }
 0x69a   : > { %v4941_v7 = vadd.f32 %v4938_v2, %v4935_v3  ;;  %v9966_v2 = vld [vmem:[%s13070_s3 + $0x3d4] ss:$8 sps:$4 sm:$0xff]   ;;  %v9961_v3 = vld [vmem:[%s13070_s3 + $0x2d0] ss:$8 sps:$4 sm:$0xff]   ;;  %v9972_v6 = vld [vmem:[%s13070_s3 + $0x3e4] ss:$8 sps:$4 sm:$0xff]  }
 0x69b   : > { %v4942_v8 = vmax.f32 %v4940_v5, 0.0  ;;  %v9969_v5 = vld [vmem:[%s13070_s3 + $0x2e4] ss:$8 sps:$4 sm:$0xff]  }
 0x69c   : > { %v4943_v9 = vmax.f32 %v4941_v7, 0.0  ;;  %v9967_v7 = vld [vmem:[%s13070_s3 + $0x2e0] ss:$8 sps:$4 sm:$0xff]  }
 0x69d   : > { %v12368_v14 = vpack.c.bf16 %v4942_v8, %v4942_v8  ;;  %v9970_v8 = vld [vmem:[%s13070_s3 + $0x3e0] ss:$8 sps:$4 sm:$0xff]  }
 0x69e   : > { %v12360_v10 = vpack.c.bf16 %v4943_v9, %v4943_v9  ;;  %v9975_v9 = vld [vmem:[%s13070_s3 + $0x2f4] ss:$8 sps:$4 sm:$0xff]  }
 0x6a0   : > { %5172 = vmatprep.mubr.bf16.mxu1 %v12360_v10  ;;  %5407 = vmatprep.mubr.bf16.mxu0 %v12360_v10 }
 0x6a1   : > { %5173 = vmatmul.mubr.bf16.vlgmr.msra.gmra.mrb[40].mxu1 %v12368_v14  ;;  %5408 = vmatmul.mubr.bf16.vlgmr.msra.gmra.mrb[48].mxu0 %v12368_v14 }
 0x6a2   : > { %5611 = vmatpush1.bf16.msra.mxu1 %v9883_v11  ;;  %5846 = vmatpush1.bf16.msra.mxu0 %v9886_v12  ;;  %v9978_v11 = vld [vmem:[%s13070_s3 + $0x3f4] ss:$8 sps:$4 sm:$0xff]   ;;  %v9973_v12 = vld [vmem:[%s13070_s3 + $0x2f0] ss:$8 sps:$4 sm:$0xff]  }
 0x6a3   : > { %5642 = vmatprep.mubr.bf16.mxu1 %v12360_v10  ;;  %5877 = vmatprep.mubr.bf16.mxu0 %v12360_v10 }
 0x6a4   : > { %5612 = vmatprep.subr.bf16.mxu1 %v9891_v15  ;;  %5847 = vmatprep.subr.bf16.mxu0 %v9894_v17  ;;  %v9976_v15 = vld [vmem:[%s13070_s3 + $0x3f0] ss:$8 sps:$4 sm:$0xff]   ;;  %v9981_v17 = vld [vmem:[%s13070_s3 + $0x404] ss:$8 sps:$4 sm:$0xff]  }
 0x6a6   : > { %5613 = vmatpush1.bf16.msra.mxu1 %v9889_v18  ;;  %5848 = vmatpush1.bf16.msra.mxu0 %v9892_v19  ;;  %v9984_v18 = vld [vmem:[%s13070_s3 + $0x504] ss:$8 sps:$4 sm:$0xff]   ;;  %v9979_v19 = vld [vmem:[%s13070_s3 + $0x400] ss:$8 sps:$4 sm:$0xff]  }
 0x6a7   : > { %5614 = vmatprep.subr.bf16.mxu1 %v9897_v20  ;;  %5849 = vmatprep.subr.bf16.mxu0 %v9900_v21  ;;  %v9982_v20 = vld [vmem:[%s13070_s3 + $0x500] ss:$8 sps:$4 sm:$0xff]   ;;  %v9987_v21 = vld [vmem:[%s13070_s3 + $0x414] ss:$8 sps:$4 sm:$0xff]  }
 0x6aa   : > { %5615 = vmatpush1.bf16.msra.mxu1 %v9895_v22  ;;  %5850 = vmatpush1.bf16.msra.mxu0 %v9898_v24  ;;  %v9990_v22 = vld [vmem:[%s13070_s3 + $0x514] ss:$8 sps:$4 sm:$0xff]   ;;  %v9985_v24 = vld [vmem:[%s13070_s3 + $0x410] ss:$8 sps:$4 sm:$0xff]  }
 0x6ab   : > { %5616 = vmatprep.subr.bf16.mxu1 %v9903_v25  ;;  %5851 = vmatprep.subr.bf16.mxu0 %v9906_v29  ;;  %v9988_v25 = vld [vmem:[%s13070_s3 + $0x510] ss:$8 sps:$4 sm:$0xff]   ;;  %v9993_v29 = vld [vmem:[%s13070_s3 + $0x424] ss:$8 sps:$4 sm:$0xff]  }
 0x6ae   : > { %5617 = vmatpush1.bf16.msra.mxu1 %v9901_v30  ;;  %5852 = vmatpush1.bf16.msra.mxu0 %v9904_v31  ;;  %v9996_v30 = vld [vmem:[%s13070_s3 + $0x524] ss:$8 sps:$4 sm:$0xff]   ;;  %v9991_v31 = vld [vmem:[%s13070_s3 + $0x420] ss:$8 sps:$4 sm:$0xff]  }
 0x6af   : > { %5618 = vmatprep.subr.bf16.mxu1 %v9909_v32  ;;  %5853 = vmatprep.subr.bf16.mxu0 %v9912_v33  ;;  %v9994_v32 = vld [vmem:[%s13070_s3 + $0x520] ss:$8 sps:$4 sm:$0xff]   ;;  %v9999_v33 = vld [vmem:[%s13070_s3 + $0x434] ss:$8 sps:$4 sm:$0xff]  }
 0x6b2   : > { %5619 = vmatpush1.bf16.msra.mxu1 %v9907_v34  ;;  %5854 = vmatpush1.bf16.msra.mxu0 %v9910_v35  ;;  %v10002_v34 = vld [vmem:[%s13070_s3 + $0x534] ss:$8 sps:$4 sm:$0xff]   ;;  %v9997_v35 = vld [vmem:[%s13070_s3 + $0x430] ss:$8 sps:$4 sm:$0xff]  }
 0x6b3   : > { %5620 = vmatprep.subr.bf16.mxu1 %v9915_v26  ;;  %5855 = vmatprep.subr.bf16.mxu0 %v9918_v36  ;;  %v10000_v26 = vld [vmem:[%s13070_s3 + $0x530] ss:$8 sps:$4 sm:$0xff]   ;;  %v10005_v36 = vld [vmem:[%s13070_s3 + $0x444] ss:$8 sps:$4 sm:$0xff]  }
 0x6b6   : > { %5621 = vmatpush1.bf16.msra.mxu1 %v9913_v37  ;;  %5856 = vmatpush1.bf16.msra.mxu0 %v9916_v38  ;;  %v10008_v37 = vld [vmem:[%s13070_s3 + $0x544] ss:$8 sps:$4 sm:$0xff]   ;;  %v10003_v38 = vld [vmem:[%s13070_s3 + $0x440] ss:$8 sps:$4 sm:$0xff]  }
 0x6b7   : > { %5622 = vmatprep.subr.bf16.mxu1 %v9921_v39  ;;  %5857 = vmatprep.subr.bf16.mxu0 %v9924_v40  ;;  %v10006_v39 = vld [vmem:[%s13070_s3 + $0x540] ss:$8 sps:$4 sm:$0xff]   ;;  %v10011_v40 = vld [vmem:[%s13070_s3 + $0x454] ss:$8 sps:$4 sm:$0xff]  }
 0x6ba   : > { %5623 = vmatpush1.bf16.msra.mxu1 %v9919_v41  ;;  %5858 = vmatpush1.bf16.msra.mxu0 %v9922_v42  ;;  %v10014_v41 = vld [vmem:[%s13070_s3 + $0x554] ss:$8 sps:$4 sm:$0xff]   ;;  %v10009_v42 = vld [vmem:[%s13070_s3 + $0x450] ss:$8 sps:$4 sm:$0xff]  }
 0x6bb   : > { %5624 = vmatprep.subr.bf16.mxu1 %v9927_v43  ;;  %5859 = vmatprep.subr.bf16.mxu0 %v9930_v44  ;;  %v10012_v43 = vld [vmem:[%s13070_s3 + $0x550] ss:$8 sps:$4 sm:$0xff]   ;;  %v10017_v44 = vld [vmem:[%s13070_s3 + $0x464] ss:$8 sps:$4 sm:$0xff]  }
 0x6be   : > { %5625 = vmatpush1.bf16.msra.mxu1 %v9925_v45  ;;  %5860 = vmatpush1.bf16.msra.mxu0 %v9928_v46  ;;  %v10020_v45 = vld [vmem:[%s13070_s3 + $0x564] ss:$8 sps:$4 sm:$0xff]   ;;  %v10015_v46 = vld [vmem:[%s13070_s3 + $0x460] ss:$8 sps:$4 sm:$0xff]  }
 0x6bf   : > { %5626 = vmatprep.subr.bf16.mxu1 %v9933_v23  ;;  %5861 = vmatprep.subr.bf16.mxu0 %v9936_v47  ;;  %v10018_v23 = vld [vmem:[%s13070_s3 + $0x560] ss:$8 sps:$4 sm:$0xff]   ;;  %v10023_v47 = vld [vmem:[%s13070_s3 + $0x474] ss:$8 sps:$4 sm:$0xff]  }
 0x6c2   : > { %5627 = vmatpush1.bf16.msra.mxu1 %v9931_v48  ;;  %5862 = vmatpush1.bf16.msra.mxu0 %v9934_v49  ;;  %v10026_v48 = vld [vmem:[%s13070_s3 + $0x574] ss:$8 sps:$4 sm:$0xff]   ;;  %v10021_v49 = vld [vmem:[%s13070_s3 + $0x470] ss:$8 sps:$4 sm:$0xff]  }
 0x6c3   : > { %5628 = vmatprep.subr.bf16.mxu1 %v9939_v50  ;;  %5863 = vmatprep.subr.bf16.mxu0 %v9942_v51  ;;  %v10024_v50 = vld [vmem:[%s13070_s3 + $0x570] ss:$8 sps:$4 sm:$0xff]   ;;  %v10029_v51 = vld [vmem:[%s13070_s3 + $0x484] ss:$8 sps:$4 sm:$0xff]  }
 0x6c6   : > { %5629 = vmatpush1.bf16.msra.mxu1 %v9937_v52  ;;  %5864 = vmatpush1.bf16.msra.mxu0 %v9940_v53  ;;  %v10032_v52 = vld [vmem:[%s13070_s3 + $0x584] ss:$8 sps:$4 sm:$0xff]   ;;  %v10027_v53 = vld [vmem:[%s13070_s3 + $0x480] ss:$8 sps:$4 sm:$0xff]  }
 0x6c7   : > { %5630 = vmatprep.subr.bf16.mxu1 %v9945_v54  ;;  %5865 = vmatprep.subr.bf16.mxu0 %v9948_v55  ;;  %v10030_v54 = vld [vmem:[%s13070_s3 + $0x580] ss:$8 sps:$4 sm:$0xff]   ;;  %v10035_v55 = vld [vmem:[%s13070_s3 + $0x494] ss:$8 sps:$4 sm:$0xff]  }
 0x6ca   : > { %5631 = vmatpush1.bf16.msra.mxu1 %v9943_v56  ;;  %5866 = vmatpush1.bf16.msra.mxu0 %v9946_v57  ;;  %v10038_v56 = vld [vmem:[%s13070_s3 + $0x594] ss:$8 sps:$4 sm:$0xff]   ;;  %v10033_v57 = vld [vmem:[%s13070_s3 + $0x490] ss:$8 sps:$4 sm:$0xff]  }
 0x6cb   : > { %5632 = vmatprep.subr.bf16.mxu1 %v9951_v58  ;;  %5867 = vmatprep.subr.bf16.mxu0 %v9954_v13  ;;  %v10036_v58 = vld [vmem:[%s13070_s3 + $0x590] ss:$8 sps:$4 sm:$0xff]   ;;  %v10041_v13 = vld [vmem:[%s13070_s3 + $0x4a4] ss:$8 sps:$4 sm:$0xff]  }
 0x6ce   : > { %5633 = vmatpush1.bf16.msra.mxu1 %v9949_v59  ;;  %5868 = vmatpush1.bf16.msra.mxu0 %v9952_v60  ;;  %v10044_v59 = vld [vmem:[%s13070_s3 + $0x5a4] ss:$8 sps:$4 sm:$0xff]   ;;  %v10039_v60 = vld [vmem:[%s13070_s3 + $0x4a0] ss:$8 sps:$4 sm:$0xff]  }
 0x6cf   : > { %5634 = vmatprep.subr.bf16.mxu1 %v9957_v61  ;;  %5869 = vmatprep.subr.bf16.mxu0 %v9960_v62  ;;  %v10042_v61 = vld [vmem:[%s13070_s3 + $0x5a0] ss:$8 sps:$4 sm:$0xff]   ;;  %v10047_v62 = vld [vmem:[%s13070_s3 + $0x4b4] ss:$8 sps:$4 sm:$0xff]  }
 0x6d2   : > { %5635 = vmatpush1.bf16.msra.mxu1 %v9955_v63  ;;  %5870 = vmatpush1.bf16.msra.mxu0 %v9958_v0  ;;  %v10050_v63 = vld [vmem:[%s13070_s3 + $0x5b4] ss:$8 sps:$4 sm:$0xff]   ;;  %v10045_v0 = vld [vmem:[%s13070_s3 + $0x4b0] ss:$8 sps:$4 sm:$0xff]  }
 0x6d3   : > { %5636 = vmatprep.subr.bf16.mxu1 %v9963_v1  ;;  %5871 = vmatprep.subr.bf16.mxu0 %v9966_v2  ;;  %v10048_v1 = vld [vmem:[%s13070_s3 + $0x5b0] ss:$8 sps:$4 sm:$0xff]   ;;  %v10053_v2 = vld [vmem:[%s13070_s3 + $0x4c4] ss:$8 sps:$4 sm:$0xff]  }
 0x6d6   : > { %5637 = vmatpush1.bf16.msra.mxu1 %v9961_v3  ;;  %5872 = vmatpush1.bf16.msra.mxu0 %v9964_v4  ;;  %v10056_v3 = vld [vmem:[%s13070_s3 + $0x5c4] ss:$8 sps:$4 sm:$0xff]   ;;  %v10051_v4 = vld [vmem:[%s13070_s3 + $0x4c0] ss:$8 sps:$4 sm:$0xff]  }
 0x6d7   : > { %5638 = vmatprep.subr.bf16.mxu1 %v9969_v5  ;;  %5873 = vmatprep.subr.bf16.mxu0 %v9972_v6  ;;  %v10054_v5 = vld [vmem:[%s13070_s3 + $0x5c0] ss:$8 sps:$4 sm:$0xff]   ;;  %v10059_v6 = vld [vmem:[%s13070_s3 + $0x4d4] ss:$8 sps:$4 sm:$0xff]  }
 0x6da   : > { %5639 = vmatpush1.bf16.msra.mxu1 %v9967_v7  ;;  %5874 = vmatpush1.bf16.msra.mxu0 %v9970_v8  ;;  %v10062_v7 = vld [vmem:[%s13070_s3 + $0x5d4] ss:$8 sps:$4 sm:$0xff]   ;;  %v10057_v8 = vld [vmem:[%s13070_s3 + $0x4d0] ss:$8 sps:$4 sm:$0xff]  }
 0x6db   : > { %5640 = vmatprep.subr.bf16.mxu1 %v9975_v9  ;;  %5875 = vmatprep.subr.bf16.mxu0 %v9978_v11  ;;  %v10060_v9 = vld [vmem:[%s13070_s3 + $0x5d0] ss:$8 sps:$4 sm:$0xff]   ;;  %v10065_v11 = vld [vmem:[%s13070_s3 + $0x4e4] ss:$8 sps:$4 sm:$0xff]  }
 0x6de   : > { %5641 = vmatpush1.bf16.msra.mxu1 %v9973_v12  ;;  %5876 = vmatpush1.bf16.msra.mxu0 %v9976_v15  ;;  %v10068_v12 = vld [vmem:[%s13070_s3 + $0x5e4] ss:$8 sps:$4 sm:$0xff]   ;;  %v10063_v15 = vld [vmem:[%s13070_s3 + $0x4e0] ss:$8 sps:$4 sm:$0xff]  }
 0x6df   : > { %6080 = vmatprep.subr.bf16.mxu1 %v9981_v17  ;;  %6315 = vmatprep.subr.bf16.mxu0 %v9984_v18  ;;  %v10066_v17 = vld [vmem:[%s13070_s3 + $0x5e0] ss:$8 sps:$4 sm:$0xff]   ;;  %v10071_v18 = vld [vmem:[%s13070_s3 + $0x4f4] ss:$8 sps:$4 sm:$0xff]  }
 0x6e1   : > { %5643 = vmatmul.mubr.bf16.vlgmr.msra.gmra.mrb[44].mxu1 %v12368_v14  ;;  %5878 = vmatmul.mubr.bf16.vlgmr.msra.gmra.mrb[52].mxu0 %v12368_v14 }
 0x6e2   : > { %6081 = vmatpush1.bf16.msra.mxu1 %v9979_v19  ;;  %6112 = vmatprep.mubr.bf16.mxu1 %v12360_v10  ;;  %v10074_v19 = vld [vmem:[%s13070_s3 + $0x5f4] ss:$8 sps:$4 sm:$0xff]  }
 0x6e3   : > { %6316 = vmatpush1.bf16.msra.mxu0 %v9982_v20  ;;  %6347 = vmatprep.mubr.bf16.mxu0 %v12360_v10  ;;  %v10069_v20 = vld [vmem:[%s13070_s3 + $0x4f0] ss:$8 sps:$4 sm:$0xff]  }
 0x6e4   : > { %6082 = vmatprep.subr.bf16.mxu1 %v9987_v21  ;;  %6317 = vmatprep.subr.bf16.mxu0 %v9990_v22  ;;  %v10072_v21 = vld [vmem:[%s13070_s3 + $0x5f0] ss:$8 sps:$4 sm:$0xff]   ;;  %v10077_v22 = vld [vmem:[%s13070_s3 + $0x604] ss:$8 sps:$4 sm:$0xff]  }
 0x6e6   : > { %6083 = vmatpush1.bf16.msra.mxu1 %v9985_v24  ;;  %v10080_v24 = vld [vmem:[%s13070_s3 + $0x704] ss:$8 sps:$4 sm:$0xff]  }
 0x6e7   : > { %6318 = vmatpush1.bf16.msra.mxu0 %v9988_v25  ;;  %6084 = vmatprep.subr.bf16.mxu1 %v9993_v29  ;;  %v10075_v25 = vld [vmem:[%s13070_s3 + $0x600] ss:$8 sps:$4 sm:$0xff]  }
 0x6e8   : > { %6319 = vmatprep.subr.bf16.mxu0 %v9996_v30  ;;  %v10078_v29 = vld [vmem:[%s13070_s3 + $0x700] ss:$8 sps:$4 sm:$0xff]   ;;  %v10083_v30 = vld [vmem:[%s13070_s3 + $0x614] ss:$8 sps:$4 sm:$0xff]  }
 0x6ea   : > { %6085 = vmatpush1.bf16.msra.mxu1 %v9991_v31  ;;  %v10086_v31 = vld [vmem:[%s13070_s3 + $0x714] ss:$8 sps:$4 sm:$0xff]  }
 0x6eb   : > { %6320 = vmatpush1.bf16.msra.mxu0 %v9994_v32  ;;  %6086 = vmatprep.subr.bf16.mxu1 %v9999_v33  ;;  %v10081_v32 = vld [vmem:[%s13070_s3 + $0x610] ss:$8 sps:$4 sm:$0xff]  }
 0x6ec   : > { %6321 = vmatprep.subr.bf16.mxu0 %v10002_v34  ;;  %v10084_v33 = vld [vmem:[%s13070_s3 + $0x710] ss:$8 sps:$4 sm:$0xff]   ;;  %v10089_v34 = vld [vmem:[%s13070_s3 + $0x624] ss:$8 sps:$4 sm:$0xff]  }
 0x6ee   : > { %6087 = vmatpush1.bf16.msra.mxu1 %v9997_v35  ;;  %v10092_v35 = vld [vmem:[%s13070_s3 + $0x724] ss:$8 sps:$4 sm:$0xff]  }
 0x6ef   : > { %6322 = vmatpush1.bf16.msra.mxu0 %v10000_v26  ;;  %6088 = vmatprep.subr.bf16.mxu1 %v10005_v36  ;;  %v10087_v26 = vld [vmem:[%s13070_s3 + $0x620] ss:$8 sps:$4 sm:$0xff]  }
 0x6f0   : > { %6323 = vmatprep.subr.bf16.mxu0 %v10008_v37  ;;  %v10090_v36 = vld [vmem:[%s13070_s3 + $0x720] ss:$8 sps:$4 sm:$0xff]   ;;  %v10095_v37 = vld [vmem:[%s13070_s3 + $0x634] ss:$8 sps:$4 sm:$0xff]  }
 0x6f2   : > { %6089 = vmatpush1.bf16.msra.mxu1 %v10003_v38  ;;  %v10098_v38 = vld [vmem:[%s13070_s3 + $0x734] ss:$8 sps:$4 sm:$0xff]  }
 0x6f3   : > { %6324 = vmatpush1.bf16.msra.mxu0 %v10006_v39  ;;  %6090 = vmatprep.subr.bf16.mxu1 %v10011_v40  ;;  %v10093_v39 = vld [vmem:[%s13070_s3 + $0x630] ss:$8 sps:$4 sm:$0xff]  }
 0x6f4   : > { %6325 = vmatprep.subr.bf16.mxu0 %v10014_v41  ;;  %v10096_v40 = vld [vmem:[%s13070_s3 + $0x730] ss:$8 sps:$4 sm:$0xff]   ;;  %v10101_v41 = vld [vmem:[%s13070_s3 + $0x644] ss:$8 sps:$4 sm:$0xff]  }
 0x6f6   : > { %6091 = vmatpush1.bf16.msra.mxu1 %v10009_v42  ;;  %v10104_v42 = vld [vmem:[%s13070_s3 + $0x744] ss:$8 sps:$4 sm:$0xff]  }
 0x6f7   : > { %6326 = vmatpush1.bf16.msra.mxu0 %v10012_v43  ;;  %6092 = vmatprep.subr.bf16.mxu1 %v10017_v44  ;;  %v10099_v43 = vld [vmem:[%s13070_s3 + $0x640] ss:$8 sps:$4 sm:$0xff]  }
 0x6f8   : > { %6327 = vmatprep.subr.bf16.mxu0 %v10020_v45  ;;  %v10102_v44 = vld [vmem:[%s13070_s3 + $0x740] ss:$8 sps:$4 sm:$0xff]   ;;  %v10107_v45 = vld [vmem:[%s13070_s3 + $0x654] ss:$8 sps:$4 sm:$0xff]  }
 0x6fa   : > { %6093 = vmatpush1.bf16.msra.mxu1 %v10015_v46  ;;  %v10110_v46 = vld [vmem:[%s13070_s3 + $0x754] ss:$8 sps:$4 sm:$0xff]  }
 0x6fb   : > { %6328 = vmatpush1.bf16.msra.mxu0 %v10018_v23  ;;  %6094 = vmatprep.subr.bf16.mxu1 %v10023_v47  ;;  %v10105_v23 = vld [vmem:[%s13070_s3 + $0x650] ss:$8 sps:$4 sm:$0xff]  }
 0x6fc   : > { %6329 = vmatprep.subr.bf16.mxu0 %v10026_v48  ;;  %v10108_v47 = vld [vmem:[%s13070_s3 + $0x750] ss:$8 sps:$4 sm:$0xff]   ;;  %v10113_v48 = vld [vmem:[%s13070_s3 + $0x664] ss:$8 sps:$4 sm:$0xff]  }
 0x6fe   : > { %6095 = vmatpush1.bf16.msra.mxu1 %v10021_v49  ;;  %v10116_v49 = vld [vmem:[%s13070_s3 + $0x764] ss:$8 sps:$4 sm:$0xff]  }
 0x6ff   : > { %6330 = vmatpush1.bf16.msra.mxu0 %v10024_v50  ;;  %6096 = vmatprep.subr.bf16.mxu1 %v10029_v51  ;;  %v10111_v50 = vld [vmem:[%s13070_s3 + $0x660] ss:$8 sps:$4 sm:$0xff]  }
 0x700   : > { %6331 = vmatprep.subr.bf16.mxu0 %v10032_v52  ;;  %v10114_v51 = vld [vmem:[%s13070_s3 + $0x760] ss:$8 sps:$4 sm:$0xff]   ;;  %v10119_v52 = vld [vmem:[%s13070_s3 + $0x674] ss:$8 sps:$4 sm:$0xff]  }
 0x702   : > { %6097 = vmatpush1.bf16.msra.mxu1 %v10027_v53  ;;  %v10122_v53 = vld [vmem:[%s13070_s3 + $0x774] ss:$8 sps:$4 sm:$0xff]  }
 0x703   : > { %6332 = vmatpush1.bf16.msra.mxu0 %v10030_v54  ;;  %6098 = vmatprep.subr.bf16.mxu1 %v10035_v55  ;;  %v10117_v54 = vld [vmem:[%s13070_s3 + $0x670] ss:$8 sps:$4 sm:$0xff]  }
 0x704   : > { %6333 = vmatprep.subr.bf16.mxu0 %v10038_v56  ;;  %v10120_v55 = vld [vmem:[%s13070_s3 + $0x770] ss:$8 sps:$4 sm:$0xff]   ;;  %v10125_v56 = vld [vmem:[%s13070_s3 + $0x684] ss:$8 sps:$4 sm:$0xff]  }
 0x706   : > { %6099 = vmatpush1.bf16.msra.mxu1 %v10033_v57  ;;  %v10128_v57 = vld [vmem:[%s13070_s3 + $0x784] ss:$8 sps:$4 sm:$0xff]  }
 0x707   : > { %6334 = vmatpush1.bf16.msra.mxu0 %v10036_v58  ;;  %6100 = vmatprep.subr.bf16.mxu1 %v10041_v13  ;;  %v10123_v58 = vld [vmem:[%s13070_s3 + $0x680] ss:$8 sps:$4 sm:$0xff]  }
 0x708   : > { %6335 = vmatprep.subr.bf16.mxu0 %v10044_v59  ;;  %v10126_v13 = vld [vmem:[%s13070_s3 + $0x780] ss:$8 sps:$4 sm:$0xff]   ;;  %v10131_v59 = vld [vmem:[%s13070_s3 + $0x694] ss:$8 sps:$4 sm:$0xff]  }
 0x70a   : > { %6101 = vmatpush1.bf16.msra.mxu1 %v10039_v60  ;;  %v10134_v60 = vld [vmem:[%s13070_s3 + $0x794] ss:$8 sps:$4 sm:$0xff]  }
 0x70b   : > { %6336 = vmatpush1.bf16.msra.mxu0 %v10042_v61  ;;  %6102 = vmatprep.subr.bf16.mxu1 %v10047_v62  ;;  %v10129_v61 = vld [vmem:[%s13070_s3 + $0x690] ss:$8 sps:$4 sm:$0xff]  }
 0x70c   : > { %6337 = vmatprep.subr.bf16.mxu0 %v10050_v63  ;;  %v10132_v62 = vld [vmem:[%s13070_s3 + $0x790] ss:$8 sps:$4 sm:$0xff]   ;;  %v10137_v63 = vld [vmem:[%s13070_s3 + $0x6a4] ss:$8 sps:$4 sm:$0xff]  }
 0x70e   : > { %6103 = vmatpush1.bf16.msra.mxu1 %v10045_v0  ;;  %v10140_v0 = vld [vmem:[%s13070_s3 + $0x7a4] ss:$8 sps:$4 sm:$0xff]  }
 0x70f   : > { %6338 = vmatpush1.bf16.msra.mxu0 %v10048_v1  ;;  %6104 = vmatprep.subr.bf16.mxu1 %v10053_v2  ;;  %v10135_v1 = vld [vmem:[%s13070_s3 + $0x6a0] ss:$8 sps:$4 sm:$0xff]  }
 0x710   : > { %6339 = vmatprep.subr.bf16.mxu0 %v10056_v3  ;;  %v10138_v2 = vld [vmem:[%s13070_s3 + $0x7a0] ss:$8 sps:$4 sm:$0xff]   ;;  %v10143_v3 = vld [vmem:[%s13070_s3 + $0x6b4] ss:$8 sps:$4 sm:$0xff]  }
 0x712   : > { %6105 = vmatpush1.bf16.msra.mxu1 %v10051_v4  ;;  %v10146_v4 = vld [vmem:[%s13070_s3 + $0x7b4] ss:$8 sps:$4 sm:$0xff]  }
 0x713   : > { %6340 = vmatpush1.bf16.msra.mxu0 %v10054_v5  ;;  %6106 = vmatprep.subr.bf16.mxu1 %v10059_v6  ;;  %v10141_v5 = vld [vmem:[%s13070_s3 + $0x6b0] ss:$8 sps:$4 sm:$0xff]  }
 0x714   : > { %6341 = vmatprep.subr.bf16.mxu0 %v10062_v7  ;;  %v10144_v6 = vld [vmem:[%s13070_s3 + $0x7b0] ss:$8 sps:$4 sm:$0xff]   ;;  %v10149_v7 = vld [vmem:[%s13070_s3 + $0x6c4] ss:$8 sps:$4 sm:$0xff]  }
 0x716   : > { %6107 = vmatpush1.bf16.msra.mxu1 %v10057_v8  ;;  %v10152_v8 = vld [vmem:[%s13070_s3 + $0x7c4] ss:$8 sps:$4 sm:$0xff]  }
 0x717   : > { %6342 = vmatpush1.bf16.msra.mxu0 %v10060_v9  ;;  %6108 = vmatprep.subr.bf16.mxu1 %v10065_v11  ;;  %v10147_v9 = vld [vmem:[%s13070_s3 + $0x6c0] ss:$8 sps:$4 sm:$0xff]  }
 0x718   : > { %6343 = vmatprep.subr.bf16.mxu0 %v10068_v12  ;;  %v10150_v11 = vld [vmem:[%s13070_s3 + $0x7c0] ss:$8 sps:$4 sm:$0xff]   ;;  %v10155_v12 = vld [vmem:[%s13070_s3 + $0x6d4] ss:$8 sps:$4 sm:$0xff]  }
 0x71a   : > { %6109 = vmatpush1.bf16.msra.mxu1 %v10063_v15  ;;  %v10158_v15 = vld [vmem:[%s13070_s3 + $0x7d4] ss:$8 sps:$4 sm:$0xff]  }
 0x71b   : > { %6344 = vmatpush1.bf16.msra.mxu0 %v10066_v17  ;;  %6110 = vmatprep.subr.bf16.mxu1 %v10071_v18  ;;  %v10153_v17 = vld [vmem:[%s13070_s3 + $0x6d0] ss:$8 sps:$4 sm:$0xff]  }
 0x71c   : > { %6345 = vmatprep.subr.bf16.mxu0 %v10074_v19  ;;  %v10156_v18 = vld [vmem:[%s13070_s3 + $0x7d0] ss:$8 sps:$4 sm:$0xff]   ;;  %v10161_v19 = vld [vmem:[%s13070_s3 + $0x6e4] ss:$8 sps:$4 sm:$0xff]  }
 0x71e   : > { %6111 = vmatpush1.bf16.msra.mxu1 %v10069_v20  ;;  %v10164_v20 = vld [vmem:[%s13070_s3 + $0x7e4] ss:$8 sps:$4 sm:$0xff]  }
 0x71f   : > { %6346 = vmatpush1.bf16.msra.mxu0 %v10072_v21  ;;  %6550 = vmatprep.subr.bf16.mxu1 %v10077_v22  ;;  %v10159_v21 = vld [vmem:[%s13070_s3 + $0x6e0] ss:$8 sps:$4 sm:$0xff]  }
 0x720   : > { %6785 = vmatprep.subr.bf16.mxu0 %v10080_v24  ;;  %v10162_v22 = vld [vmem:[%s13070_s3 + $0x7e0] ss:$8 sps:$4 sm:$0xff]   ;;  %v10167_v24 = vld [vmem:[%s13070_s3 + $0x6f4] ss:$8 sps:$4 sm:$0xff]  }
 0x721   : > { %6113 = vmatmul.mubr.bf16.vlgmr.msra.gmra.mrb[48].mxu1 %v12368_v14 }
 0x722   : > { %6348 = vmatmul.mubr.bf16.vlgmr.msra.gmra.mrb[56].mxu0 %v12368_v14  ;;  %6551 = vmatpush1.bf16.msra.mxu1 %v10075_v25  ;;  %v10170_v25 = vld [vmem:[%s13070_s3 + $0x7f4] ss:$8 sps:$4 sm:$0xff]  }
 0x723   : > { %6582 = vmatprep.mubr.bf16.mxu1 %v12360_v10  ;;  %6786 = vmatpush1.bf16.msra.mxu0 %v10078_v29  ;;  %v10165_v29 = vld [vmem:[%s13070_s3 + $0x6f0] ss:$8 sps:$4 sm:$0xff]  }
 0x724   : > { %6817 = vmatprep.mubr.bf16.mxu0 %v12360_v10  ;;  %6552 = vmatprep.subr.bf16.mxu1 %v10083_v30  ;;  %v10168_v30 = vld [vmem:[%s13070_s3 + $0x7f0] ss:$8 sps:$4 sm:$0xff]  }
 0x725   : > { %6787 = vmatprep.subr.bf16.mxu0 %v10086_v31  ;;  %v10173_v31 = vld [vmem:[%s13070_s3 + $0x804] ss:$8 sps:$4 sm:$0xff]  }
 0x726   : > { %6553 = vmatpush1.bf16.msra.mxu1 %v10081_v32  ;;  %v10171_v32 = vld [vmem:[%s13070_s3 + $0x800] ss:$8 sps:$4 sm:$0xff]  }
 0x727   : > { %6788 = vmatpush1.bf16.msra.mxu0 %v10084_v33  ;;  %6554 = vmatprep.subr.bf16.mxu1 %v10089_v34  ;;  %v10176_v33 = vld [vmem:[%s13070_s3 + $0x814] ss:$8 sps:$4 sm:$0xff]   ;;  %v10174_v34 = vld [vmem:[%s13070_s3 + $0x810] ss:$8 sps:$4 sm:$0xff]  }
 0x728   : > { %6789 = vmatprep.subr.bf16.mxu0 %v10092_v35  ;;  %v10179_v35 = vld [vmem:[%s13070_s3 + $0x824] ss:$8 sps:$4 sm:$0xff]  }
 0x72a   : > { %6555 = vmatpush1.bf16.msra.mxu1 %v10087_v26  ;;  %v10177_v26 = vld [vmem:[%s13070_s3 + $0x820] ss:$8 sps:$4 sm:$0xff]  }
 0x72b   : > { %6790 = vmatpush1.bf16.msra.mxu0 %v10090_v36  ;;  %6556 = vmatprep.subr.bf16.mxu1 %v10095_v37  ;;  %v10182_v36 = vld [vmem:[%s13070_s3 + $0x834] ss:$8 sps:$4 sm:$0xff]   ;;  %v10183_v37 = vld [vmem:[%s13070_s3 + $0x840] ss:$8 sps:$4 sm:$0xff]  }
 0x72c   : > { %6791 = vmatprep.subr.bf16.mxu0 %v10098_v38  ;;  %v10188_v38 = vld [vmem:[%s13070_s3 + $0x854] ss:$8 sps:$4 sm:$0xff]  }
 0x72e   : > { %6557 = vmatpush1.bf16.msra.mxu1 %v10093_v39  ;;  %v10186_v39 = vld [vmem:[%s13070_s3 + $0x850] ss:$8 sps:$4 sm:$0xff]  }
 0x72f   : > { %6792 = vmatpush1.bf16.msra.mxu0 %v10096_v40  ;;  %6558 = vmatprep.subr.bf16.mxu1 %v10101_v41  ;;  %v10191_v40 = vld [vmem:[%s13070_s3 + $0x864] ss:$8 sps:$4 sm:$0xff]  }
 0x730   : > { %6793 = vmatprep.subr.bf16.mxu0 %v10104_v42 }
 0x732   : > { %6559 = vmatpush1.bf16.msra.mxu1 %v10099_v43 }
 0x733   : > { %6794 = vmatpush1.bf16.msra.mxu0 %v10102_v44  ;;  %6560 = vmatprep.subr.bf16.mxu1 %v10107_v45 }
 0x734   : > { %6795 = vmatprep.subr.bf16.mxu0 %v10110_v46 }
 0x736   : > { %6561 = vmatpush1.bf16.msra.mxu1 %v10105_v23 }
 0x737   : > { %6796 = vmatpush1.bf16.msra.mxu0 %v10108_v47  ;;  %6562 = vmatprep.subr.bf16.mxu1 %v10113_v48  ;;  %v10189_v48 = vld [vmem:[%s13070_s3 + $0x860] ss:$8 sps:$4 sm:$0xff]  }
 0x738   : > { %6797 = vmatprep.subr.bf16.mxu0 %v10116_v49 }
 0x73a   : > { %6563 = vmatpush1.bf16.msra.mxu1 %v10111_v50 }
 0x73b   : > { %6798 = vmatpush1.bf16.msra.mxu0 %v10114_v51  ;;  %6564 = vmatprep.subr.bf16.mxu1 %v10119_v52  ;;  %v10194_v51 = vld [vmem:[%s13070_s3 + $0x874] ss:$8 sps:$4 sm:$0xff]   ;;  %v10192_v52 = vld [vmem:[%s13070_s3 + $0x870] ss:$8 sps:$4 sm:$0xff]  }
 0x73c   : > { %6799 = vmatprep.subr.bf16.mxu0 %v10122_v53  ;;  %v10197_v53 = vld [vmem:[%s13070_s3 + $0x884] ss:$8 sps:$4 sm:$0xff]  }
 0x73e   : > { %6565 = vmatpush1.bf16.msra.mxu1 %v10117_v54  ;;  %v10195_v54 = vld [vmem:[%s13070_s3 + $0x880] ss:$8 sps:$4 sm:$0xff]  }
 0x73f   : > { %6800 = vmatpush1.bf16.msra.mxu0 %v10120_v55  ;;  %6566 = vmatprep.subr.bf16.mxu1 %v10125_v56  ;;  %v10200_v55 = vld [vmem:[%s13070_s3 + $0x894] ss:$8 sps:$4 sm:$0xff]   ;;  %v10198_v56 = vld [vmem:[%s13070_s3 + $0x890] ss:$8 sps:$4 sm:$0xff]  }
 0x740   : > { %6801 = vmatprep.subr.bf16.mxu0 %v10128_v57  ;;  %v10203_v57 = vld [vmem:[%s13070_s3 + $0x8a4] ss:$8 sps:$4 sm:$0xff]  }
 0x742   : > { %6567 = vmatpush1.bf16.msra.mxu1 %v10123_v58  ;;  %v10201_v58 = vld [vmem:[%s13070_s3 + $0x8a0] ss:$8 sps:$4 sm:$0xff]  }
 0x743   : > { %6802 = vmatpush1.bf16.msra.mxu0 %v10126_v13  ;;  %6568 = vmatprep.subr.bf16.mxu1 %v10131_v59  ;;  %v10206_v13 = vld [vmem:[%s13070_s3 + $0x8b4] ss:$8 sps:$4 sm:$0xff]   ;;  %v10204_v59 = vld [vmem:[%s13070_s3 + $0x8b0] ss:$8 sps:$4 sm:$0xff]  }
 0x744   : > { %6803 = vmatprep.subr.bf16.mxu0 %v10134_v60  ;;  %v10209_v60 = vld [vmem:[%s13070_s3 + $0x8c4] ss:$8 sps:$4 sm:$0xff]  }
 0x746   : > { %6569 = vmatpush1.bf16.msra.mxu1 %v10129_v61  ;;  %v10207_v61 = vld [vmem:[%s13070_s3 + $0x8c0] ss:$8 sps:$4 sm:$0xff]  }
 0x747   : > { %6804 = vmatpush1.bf16.msra.mxu0 %v10132_v62  ;;  %6570 = vmatprep.subr.bf16.mxu1 %v10137_v63  ;;  %v10212_v62 = vld [vmem:[%s13070_s3 + $0x8d4] ss:$8 sps:$4 sm:$0xff]   ;;  %v10210_v63 = vld [vmem:[%s13070_s3 + $0x8d0] ss:$8 sps:$4 sm:$0xff]  }
 0x748   : > { %6805 = vmatprep.subr.bf16.mxu0 %v10140_v0  ;;  %v10215_v0 = vld [vmem:[%s13070_s3 + $0x8e4] ss:$8 sps:$4 sm:$0xff]  }
 0x74a   : > { %6571 = vmatpush1.bf16.msra.mxu1 %v10135_v1  ;;  %v10213_v1 = vld [vmem:[%s13070_s3 + $0x8e0] ss:$8 sps:$4 sm:$0xff]  }
 0x74b   : > { %6806 = vmatpush1.bf16.msra.mxu0 %v10138_v2  ;;  %6572 = vmatprep.subr.bf16.mxu1 %v10143_v3  ;;  %v10218_v2 = vld [vmem:[%s13070_s3 + $0x8f4] ss:$8 sps:$4 sm:$0xff]   ;;  %v10216_v3 = vld [vmem:[%s13070_s3 + $0x8f0] ss:$8 sps:$4 sm:$0xff]  }
 0x74c   : > { %6807 = vmatprep.subr.bf16.mxu0 %v10146_v4 }
 0x74e   : > { %6573 = vmatpush1.bf16.msra.mxu1 %v10141_v5 }
 0x74f   : > { %6808 = vmatpush1.bf16.msra.mxu0 %v10144_v6  ;;  %6574 = vmatprep.subr.bf16.mxu1 %v10149_v7 }
 0x750   : > { %6809 = vmatprep.subr.bf16.mxu0 %v10152_v8 }
 0x752   : > { %6575 = vmatpush1.bf16.msra.mxu1 %v10147_v9 }
 0x753   : > { %6810 = vmatpush1.bf16.msra.mxu0 %v10150_v11  ;;  %6576 = vmatprep.subr.bf16.mxu1 %v10155_v12 }
 0x754   : > { %6811 = vmatprep.subr.bf16.mxu0 %v10158_v15 }
 0x756   : > { %6577 = vmatpush1.bf16.msra.mxu1 %v10153_v17 }
 0x757   : > { %6812 = vmatpush1.bf16.msra.mxu0 %v10156_v18  ;;  %6578 = vmatprep.subr.bf16.mxu1 %v10161_v19 }
 0x758   : > { %6813 = vmatprep.subr.bf16.mxu0 %v10164_v20 }
 0x75a   : > { %6579 = vmatpush1.bf16.msra.mxu1 %v10159_v21 }
 0x75b   : > { %6814 = vmatpush1.bf16.msra.mxu0 %v10162_v22  ;;  %6580 = vmatprep.subr.bf16.mxu1 %v10167_v24 }
 0x75c   : > { %6815 = vmatprep.subr.bf16.mxu0 %v10170_v25 }
 0x75e   : > { %6581 = vmatpush1.bf16.msra.mxu1 %v10165_v29 }
 0x75f   : > { %6816 = vmatpush1.bf16.msra.mxu0 %v10168_v30  ;;  %7020 = vmatprep.subr.bf16.mxu1 %v10173_v31  ;;  %v10236_v31 = vmov 5  }
 0x760   : > { %8920 = vset.pattern.permute.xlu0 %v10236_v31 }
 0x761   : > { %6583 = vmatmul.mubr.bf16.vlgmr.msra.gmra.mrb[52].mxu1 %v12368_v14 }
 0x762   : > { %6818 = vmatmul.mubr.bf16.vlgmr.msra.gmra.mrb[60].mxu0 %v12368_v14  ;;  %7021 = vmatpush1.bf16.msra.mxu1 %v10171_v32  ;;  %v10220_v32 = vld [vmem:[%s13073_s6] sm:$0xff] }
 0x763   : > { %7052 = vmatprep.mubr.bf16.mxu1 %v12360_v10  ;;  %7022 = vmatprep.subr.bf16.mxu1 %v10176_v33  ;;  %v10180_v10 = vld [vmem:[%s13070_s3 + $0x830] ss:$8 sps:$4 sm:$0xff]  }
 0x764   : > { %7132 = vmatprep.mubr.bf16.mxu0 %v10234_v16  ;;  %v10185_v16 = vld [vmem:[%s13070_s3 + $0x844] ss:$8 sps:$4 sm:$0xff]   ;;  %7148 = vperm.xlu0 %8920, %v10220_v32  }
 0x766   : > { %7023 = vmatpush1.bf16.msra.mxu1 %v10174_v34 }
 0x767   : > { %7024 = vmatprep.subr.bf16.mxu1 %v10179_v35 }
 0x76a   : > { %7025 = vmatpush1.bf16.msra.mxu1 %v10177_v26 }
 0x76b   : > { %7026 = vmatprep.subr.bf16.mxu1 %v10182_v36 }
 0x76e   : > { %7027 = vmatpush1.bf16.msra.mxu1 %v10180_v10 }
 0x76f   : > { %7028 = vmatprep.subr.bf16.mxu1 %v10185_v16 }
 0x772   : > { %7029 = vmatpush1.bf16.msra.mxu1 %v10183_v37 }
 0x773   : > { %7030 = vmatprep.subr.bf16.mxu1 %v10188_v38 }
 0x774   : > { %v5174_v41 = vpop.f32.mrb[40].mxu1  ;;  %v5409_v42 = vpop.f32.mrb[48].mxu0 }
 0x775   : > { %v7081_v43 = vpack.c.bf16 %v5409_v42, %v5174_v41  ;;  %v5176_v44 = vpop.f32.mrb[41].mxu1  ;;  %v5411_v45 = vpop.f32.mrb[49].mxu0 }
 0x776   : > { %v7082_v46 = vpack.c.bf16 %v5411_v45, %v5176_v44  ;;  %7031 = vmatpush1.bf16.msra.mxu1 %v10186_v39  ;;  %v5178_v23 = vpop.f32.mrb[42].mxu1  ;;  %v5413_v47 = vpop.f32.mrb[50].mxu0 }
 0x777   : > { %v5179_v49 = vpop.f32.mrb[43].mxu1  ;;  %v5414_v50 = vpop.f32.mrb[51].mxu0  ;;  %7032 = vmatprep.subr.bf16.mxu1 %v10191_v40  ;;  %v8332_v23 = vld [vmem:[%s13072_s5 + $0x4] sm:$0xf] }
 0x778   : > { %7100 = vmatprep.subr.bf16.mxu0 %v7082_v46  ;;  %v7143_v47 = vpop.permute.xlu1 %7142 }
 0x779   : > { %7101 = vmatpush1.bf16.msra.mxu0 %v7081_v43 }
 0x77a   : > { %7033 = vmatpush1.bf16.msra.mxu1 %v10189_v48 }
 0x77b   : > { %7034 = vmatprep.subr.bf16.mxu1 %v10194_v51 }
 0x77e   : > { %7035 = vmatpush1.bf16.msra.mxu1 %v10192_v52  ;;  %v421_v52 = vpop.permute.xlu1 %420 }
 0x77f   : > { %7036 = vmatprep.subr.bf16.mxu1 %v10197_v53 }
 0x782   : > { %7037 = vmatpush1.bf16.msra.mxu1 %v10195_v54 }
 0x783   : > { %7038 = vmatprep.subr.bf16.mxu1 %v10200_v55 }
 0x786   : > { %7039 = vmatpush1.bf16.msra.mxu1 %v10198_v56 }
 0x787   : > { %7040 = vmatprep.subr.bf16.mxu1 %v10203_v57 }
 0x78a   : > { %7041 = vmatpush1.bf16.msra.mxu1 %v10201_v58  ;;  %v501_v58 = vadd.f32 %v11086_v27, %v421_v52 }
 0x78b   : > { %7042 = vmatprep.subr.bf16.mxu1 %v10206_v13 }
 0x78e   : > { %7043 = vmatpush1.bf16.msra.mxu1 %v10204_v59  ;;  %v503_v59 = vadd.f32 %v11088_v28, %v421_v52 }
 0x78f   : > { %7044 = vmatprep.subr.bf16.mxu1 %v10209_v60 }
 0x792   : > { %7045 = vmatpush1.bf16.msra.mxu1 %v10207_v61 }
 0x793   : > { %7046 = vmatprep.subr.bf16.mxu1 %v10212_v62 }
 0x796   : > { %7047 = vmatpush1.bf16.msra.mxu1 %v10210_v63 }
 0x797   : > { %7048 = vmatprep.subr.bf16.mxu1 %v10215_v0 }
 0x79a   : > { %7049 = vmatpush1.bf16.msra.mxu1 %v10213_v1 }
 0x79b   : > { %7050 = vmatprep.subr.bf16.mxu1 %v10218_v2 }
 0x79e   : > { %7051 = vmatpush1.bf16.msra.mxu1 %v10216_v3 }
 0x7a1   : > { %7053 = vmatmul.mubr.bf16.vlgmr.msra.gmra.mrb[56].mxu1 %v12368_v14 }
 0x7b4   : > { %v5644_v4 = vpop.f32.mrb[44].mxu1  ;;  %v5879_v5 = vpop.f32.mrb[52].mxu0 }
 0x7b5   : > { %v7083_v6 = vpack.c.bf16 %v5879_v5, %v5644_v4  ;;  %v5646_v7 = vpop.f32.mrb[45].mxu1  ;;  %v5881_v8 = vpop.f32.mrb[53].mxu0 }
 0x7b6   : > { %v7084_v9 = vpack.c.bf16 %v5881_v8, %v5646_v7  ;;  %v5648_v11 = vpop.f32.mrb[46].mxu1  ;;  %v5883_v12 = vpop.f32.mrb[54].mxu0 }
 0x7b7   : > { %v5649_v15 = vpop.f32.mrb[47].mxu1  ;;  %v5884_v17 = vpop.f32.mrb[55].mxu0 }
 0x7b8   : > { %7102 = vmatprep.subr.bf16.mxu0 %v7084_v9 }
 0x7b9   : > { %7103 = vmatpush1.bf16.msra.mxu0 %v7083_v6 }
 0x7e3   : > { %v7149_v49 = vpop.permute.xlu0 %7148 }
 0x7f4   : > { %v6114_v18 = vpop.f32.mrb[48].mxu1 }
 0x7f5   : > { %v6349_v19 = vpop.f32.mrb[56].mxu0  ;;  %v6116_v20 = vpop.f32.mrb[49].mxu1 }
 0x7f6   : > { %v7085_v21 = vpack.c.bf16 %v6349_v19, %v6114_v18  ;;  %v6351_v22 = vpop.f32.mrb[57].mxu0  ;;  %v6118_v24 = vpop.f32.mrb[50].mxu1 }
 0x7f7   : > { %v7086_v25 = vpack.c.bf16 %v6351_v22, %v6116_v20  ;;  %v6353_v14 = vpop.f32.mrb[58].mxu0  ;;  %v6119_v29 = vpop.f32.mrb[51].mxu1 }
 0x7f8   : > { %v6354_v30 = vpop.f32.mrb[59].mxu0 }
 0x7f9   : > { %7104 = vmatprep.subr.bf16.mxu0 %v7086_v25 }
 0x7fa   : > { %7105 = vmatpush1.bf16.msra.mxu0 %v7085_v21 }
 0x834   : > { %v6584_v33 = vpop.f32.mrb[52].mxu1 }
 0x835   : > { %v6819_v34 = vpop.f32.mrb[60].mxu0  ;;  %v6586_v35 = vpop.f32.mrb[53].mxu1 }
 0x836   : > { %v7087_v26 = vpack.c.bf16 %v6819_v34, %v6584_v33  ;;  %v6821_v36 = vpop.f32.mrb[61].mxu0  ;;  %v6588_v10 = vpop.f32.mrb[54].mxu1 }
 0x837   : > { %v7088_v16 = vpack.c.bf16 %v6821_v36, %v6586_v35  ;;  %v6823_v37 = vpop.f32.mrb[62].mxu0  ;;  %v6589_v38 = vpop.f32.mrb[55].mxu1 }
 0x838   : > { %v6824_v39 = vpop.f32.mrb[63].mxu0 }
 0x839   : > { %7106 = vmatprep.subr.bf16.mxu0 %v7088_v16 }
 0x83a   : > { %7107 = vmatpush1.bf16.msra.mxu0 %v7087_v26 }
 0x874   : > { %v7054_v40 = vpop.f32.mrb[56].mxu1 }
 0x875   : > { %v7089_v41 = vpack.c.bf16 %v7054_v40, %v7054_v40  ;;  %v7056_v42 = vpop.f32.mrb[57].mxu1 }
 0x876   : > { %v7090_v43 = vpack.c.bf16 %v7056_v42, %v7056_v42  ;;  %v7058_v44 = vpop.f32.mrb[58].mxu1 }
 0x877   : > { %v7095_v45 = vsel %vm427_vm1, %v7089_v41, 0  ;;  %v7059_v46 = vpop.f32.mrb[59].mxu1 }
 0x878   : > { %8877 = vmatprep.subr.msk.bf16.mxu0 %vm427_vm1, %v7090_v43 }
 0x879   : > { %7109 = vmatpush1.bf16.msra.mxu0 %v7095_v45 }
 0x87c   : > { %8878 = vmatmul.mubr.msk.bf16.vlgmr.msra.gmra.mrb[64].mxu0 %vm2669_vm3, %v8332_v23 }
 0x94f   : > { %v7134_v48 = vpop.f32.mrb[64].mxu0 }
 0x950   : > { %v7145_v50 = vmul.f32 %v7143_v47, %v7134_v48  ;;  %v7136_v51 = vpop.f32.mrb[65].mxu0 }
 0x951   : > { %v7146_v53 = vmul.f32 %v7143_v47, %v7136_v51  ;;  %v7138_v54 = vpop.f32.mrb[66].mxu0 }
 0x952   : > { %v7151_v55 = vadd.f32 %v7149_v49, %v7145_v50  ;;  %v7139_v56 = vpop.f32.mrb[67].mxu0 }
 0x953   : > { %v7152_v57 = vadd.f32 %v7149_v49, %v7146_v53 }
 0x954   : > { %v7153_v13 = vmax.f32 %v7151_v55, 0.0 }
 0x955   : > { %v7154_v60 = vmax.f32 %v7152_v57, 0.0 }
 0x956   : > { %v7155_v61 = vadd.f32 %v7153_v13, %v501_v58 }
 0x957   : > { %v7156_v62 = vadd.f32 %v7154_v60, %v503_v59 }
 0x958   : > { %7157 = vst [vmem:[%s322_s12] sm:$0xff] %v7155_v61 }
 0x959   : > { %7158 = vst [vmem:[%s322_s12 + $0x8] sm:$0xff] %v7156_v62 }
 0x95a PF: > { %s18_s27 = sadd.s32 1, %s10227_s27  }
 0x95b   : > { %p15_p4 = scmp.ge.s32.totalorder %s18_s27, 4  }
 0x95d   :  { %17 = sbr.rel (!%p15_p4) target bundleno = 1 (0x1), region = 94 }

</bundles_post_ra>
